<compile_context>
chip_gen: v5e
topology: v5e:2x2
jax: 0.10.0
libtpu: 0.0.40
codegen_flags: <defaults>
</compile_context>

<pallas_src>
import functools

import jax
import jax.numpy as jnp
from jax.experimental import pallas as pl
from jax.experimental.pallas import tpu as pltpu

_NEG_BIG = -1e20      # attention mask fill (matches the reference)
_NEG_PAD = -1e30      # fill for the padded lanes of the output head
_OUT_LANES = 128      # lane-dense output width (the 3 classes live in lanes 0..2)


def _decomp_attention_kernel(
    emb_ref,      # (bt, p+h, d)  bf16   token embeddings, null already folded in
    mask_ref,     # (bt, p+h, 1)  f32    [premise mask rows ; hypothesis mask rows]
    hm_row_ref,   # (bt, 1, h)    f32    hypothesis mask in row layout
    w_ref,        # (9*d, d)      bf16   packed weight slab
    b_ref,        # (7, d)        f32    packed bias slab
    w_o3_ref,     # (d, 128)      bf16   final Linear(d, 3) padded to 128 lanes
    b_o3_ref,     # (1, 128)      f32    final bias, lanes >= 3 filled with -1e30
    out_ref,      # (bt, 128)     f32    log-probs in lanes 0..2
    *, bt, p, h, d,
):
    f32, bf16 = jnp.float32, jnp.bfloat16
    L = p + h
    N = bt * L

    def mxdot(a, b):  # bf16 MXU matmul with f32 accumulation
        return jnp.dot(a.astype(bf16), b, preferred_element_type=f32)

    # ---- packed parameter slices (static ref slices) ---------------------------
    w_rot = w_ref[0 * d:1 * d, :]
    w_f1  = w_ref[1 * d:2 * d, :]
    w_f2  = w_ref[2 * d:3 * d, 0:1]
    w_c1a = w_ref[3 * d:4 * d, :]
    w_c1b = w_ref[4 * d:5 * d, :]
    w_c2  = w_ref[5 * d:6 * d, :]
    w_o1a = w_ref[6 * d:7 * d, :]
    w_o1b = w_ref[7 * d:8 * d, :]
    w_o2  = w_ref[8 * d:9 * d, :]
    b_rot = b_ref[0:1, :]
    b_f1  = b_ref[1:2, :]
    b_f2  = b_ref[2:3, 0:1]
    b_c1  = b_ref[3:4, :]
    b_c2  = b_ref[4:5, :]
    b_o1  = b_ref[5:6, :]
    b_o2  = b_ref[6:7, :]

    mask3 = mask_ref[...]                         # (bt, L, 1)
    mask2 = mask3.reshape(N, 1)
    emb2 = emb_ref[...].reshape(N, d)             # (N, d) bf16

    # ---- encode: rotation Linear -> relu -> mask (null added in the wrapper) ---
    enc = jnp.maximum(mxdot(emb2, w_rot) + b_rot, 0.0) * mask2        # (N, d) f32

    # ---- feedforward -> per-token scalar attention weight ----------------------
    ff1 = jnp.maximum(mxdot(enc, w_f1) + b_f1, 0.0)                   # (N, d)
    tok_w = (mxdot(ff1, w_f2) + b_f2) * mask2                         # (N, 1)

    enc3 = enc.reshape(bt, L, d)
    tok_w3 = tok_w.reshape(bt, L, 1)
    prem_enc, hypo_enc = enc3[:, :p, :], enc3[:, p:, :]               # (bt,p,d) (bt,h,d)
    prem_w, hypo_w = tok_w3[:, :p, :], tok_w3[:, p:, :]               # (bt,p,1) (bt,h,1)
    pm_col = mask3[:, :p, :]                                          # (bt,p,1)
    hm_row = hm_row_ref[...]                                          # (bt,1,h)

    # ---- attention logits: outer product of token weights + additive mask ------
    attn = jnp.einsum("bpi,bhi->bph", prem_w, hypo_w,
                      preferred_element_type=f32)                     # (bt, p, h)
    attn = attn + (1.0 - pm_col * hm_row) * _NEG_BIG

    # exp(log_softmax(x, dim)) == softmax over that (target-length) axis.
    def softmax(x, axis):
        m = jnp.max(x, axis=axis, keepdims=True)
        e = jnp.exp(x - m)
        return e * pl.reciprocal(jnp.sum(e, axis=axis, keepdims=True), approx=True)

    a_p = softmax(attn, 1).astype(bf16)   # normalized over the premise axis
    a_h = softmax(attn, 2).astype(bf16)   # normalized over the hypothesis axis
    attended_prem = jnp.einsum("bph,bhd->bpd", a_p, hypo_enc.astype(bf16),
                               preferred_element_type=f32)            # (bt, p, d)
    attended_hypo = jnp.einsum("bph,bpd->bhd", a_h, prem_enc.astype(bf16),
                               preferred_element_type=f32)            # (bt, h, d)

    # ---- compare_ff on cat([target, attended]) via split first-layer weights ---
    # Premise and hypothesis tokens share the compare weights, so run one fused
    # (N, d) pass instead of two half-size ones (halves MXU dispatch count).
    attended_all = jnp.concatenate([attended_prem, attended_hypo], axis=1)
    attended2 = attended_all.reshape(N, d)
    c1 = jnp.maximum(mxdot(enc, w_c1a) + mxdot(attended2, w_c1b) + b_c1, 0.0)
    compared = ((mxdot(c1, w_c2) + b_c2) * mask2).reshape(bt, L, d)   # (bt, L, d)

    prem_agg = jnp.sum(compared[:, :p, :], axis=1)                    # (bt, d)
    hypo_agg = jnp.sum(compared[:, p:, :], axis=1)                    # (bt, d)

    # ---- output layer on cat([prem_agg, hypo_agg]) + log-softmax ---------------
    o1 = jnp.maximum(mxdot(prem_agg, w_o1a) + mxdot(hypo_agg, w_o1b) + b_o1, 0.0)
    o2 = mxdot(o1, w_o2) + b_o2
    logits = mxdot(o2, w_o3_ref[...]) + b_o3_ref[...]                 # (bt, 128)
    m = jnp.max(logits, axis=-1, keepdims=True)
    sh = logits - m
    out_ref[...] = sh - jnp.log(jnp.sum(jnp.exp(sh), axis=-1, keepdims=True))


def decomp_attention_forward(params, prem_idx, hypo_idx, prem_mask, hypo_mask,
                             *, block_b=32):
    B, p = prem_idx.shape
    h = hypo_idx.shape[1]
    d = params["word_mat"].shape[1]
    L = p + h

    # Batch block size: largest divisor of B not exceeding block_b.
    bt = min(block_b, B)
    while B % bt:
        bt -= 1

    # --- glue done in plain JAX: embedding gather, null add, prem/hypo concat ---
    null = params["null"][0]
    prem_emb = params["word_mat"][prem_idx].at[:, 0, :].add(null)     # (B, p, d)
    hypo_emb = params["word_mat"][hypo_idx].at[:, 0, :].add(null)     # (B, h, d)
    emb = jnp.concatenate([prem_emb, hypo_emb], axis=1).astype(jnp.bfloat16)

    pm = prem_mask.astype(jnp.float32)
    hm = hypo_mask.astype(jnp.float32)
    mask_col = jnp.concatenate([pm, hm], axis=1)[:, :, None]          # (B, L, 1)
    hm_row = hm[:, None, :]                                           # (B, 1, h)

    # --- pack parameters into slabs (one DMA each, resident across the grid) ----
    def pad_cols(w, width):
        return jnp.pad(w, ((0, 0), (0, width - w.shape[1])))

    w_slab = jnp.concatenate([
        params["w_rot"], params["w_f1"], pad_cols(params["w_f2"], d),
        params["w_c1a"], params["w_c1b"], params["w_c2"],
        params["w_o1a"], params["w_o1b"], params["w_o2"],
    ], axis=0).astype(jnp.bfloat16)                                   # (9d, d)

    b_slab = jnp.concatenate([
        params["b_rot"], params["b_f1"], pad_cols(params["b_f2"], d),
        params["b_c1"], params["b_c2"], params["b_o1"], params["b_o2"],
    ], axis=0).astype(jnp.float32)                                    # (7, d)

    w_o3 = pad_cols(params["w_o3"], _OUT_LANES).astype(jnp.bfloat16)  # (d, 128)
    b_o3 = jnp.full((1, _OUT_LANES), _NEG_PAD, jnp.float32)
    b_o3 = b_o3.at[:, :params["b_o3"].shape[1]].set(params["b_o3"])   # (1, 128)

    kernel = functools.partial(_decomp_attention_kernel, bt=bt, p=p, h=h, d=d)
    per_block3 = lambda b: (b, 0, 0)
    shared2 = lambda b: (0, 0)

    out = pl.pallas_call(
        kernel,
        out_shape=jax.ShapeDtypeStruct((B, _OUT_LANES), jnp.float32),
        grid_spec=pltpu.PrefetchScalarGridSpec(
            num_scalar_prefetch=0,
            grid=(B // bt,),
            in_specs=[
                pl.BlockSpec((bt, L, d), per_block3),
                pl.BlockSpec((bt, L, 1), per_block3),
                pl.BlockSpec((bt, 1, h), per_block3),
                pl.BlockSpec((9 * d, d), shared2),
                pl.BlockSpec((7, d), shared2),
                pl.BlockSpec((d, _OUT_LANES), shared2),
                pl.BlockSpec((1, _OUT_LANES), shared2),
            ],
            out_specs=pl.BlockSpec((bt, _OUT_LANES), lambda b: (b, 0)),
        ),
        compiler_params=pltpu.CompilerParams(
            dimension_semantics=("parallel",),      # batch blocks are independent
            vmem_limit_bytes=32 * 1024 * 1024,      # safe on v5e/v6e/v7x
        ),
    )(emb, mask_col, hm_row, w_slab, b_slab, w_o3, b_o3)
    return out[:, :3]                               # (B, 3) log-probs


def init_params(key, vocab, d):
    ks = jax.random.split(key, 10)

    def lin(k, fan_in, fan_out):
        kw, kb = jax.random.split(k)
        w = jax.random.normal(kw, (fan_in, fan_out), jnp.float32) * 0.1
        b = jax.random.normal(kb, (1, fan_out), jnp.float32) * 0.1
        return w, b

    params = {}
    params["word_mat"] = jax.random.normal(ks[0], (vocab, d), jnp.float32) * 0.5
    params["null"] = jax.random.normal(ks[1], (1, d), jnp.float32)          # self.null
    params["w_rot"], params["b_rot"] = lin(ks[2], d, d)                     # rotation
    params["w_f1"], params["b_f1"] = lin(ks[3], d, d)                       # feedforward
    params["w_f2"], params["b_f2"] = lin(ks[4], d, 1)
    w_c1, params["b_c1"] = lin(ks[5], 2 * d, d)                             # compare_ff
    params["w_c1a"], params["w_c1b"] = w_c1[:d], w_c1[d:]
    params["w_c2"], params["b_c2"] = lin(ks[6], d, d)
    w_o1, params["b_o1"] = lin(ks[7], 2 * d, d)                             # output_layer
    params["w_o1a"], params["w_o1b"] = w_o1[:d], w_o1[d:]
    params["w_o2"], params["b_o2"] = lin(ks[8], d, d)
    params["w_o3"], params["b_o3"] = lin(ks[9], d, 3)
    return params


def reference_forward(params, prem_idx, hypo_idx, prem_mask, hypo_mask):
    """Pure-JAX f32 reference mirroring the PyTorch forward (values-only path)."""
    pm = prem_mask.astype(jnp.float32)
    hm = hypo_mask.astype(jnp.float32)

    def encode(idx, mask):
        vecs = params["word_mat"][idx]
        vecs = vecs.at[:, 0, :].add(params["null"][0])
        rot = vecs @ params["w_rot"] + params["b_rot"]
        return jnp.maximum(rot, 0.0) * mask[..., None]

    prem_enc = encode(prem_idx, pm)
    hypo_enc = encode(hypo_idx, hm)

    def ff(x):
        h1 = jnp.maximum(x @ params["w_f1"] + params["b_f1"], 0.0)
        return h1 @ params["w_f2"] + params["b_f2"]

    prem_w = ff(prem_enc) * pm[..., None]
    hypo_w = ff(hypo_enc) * hm[..., None]

    attn = jnp.einsum("bpi,bhi->bph", prem_w, hypo_w)
    amask = pm[:, :, None] * hm[:, None, :]
    attn_m = attn + (1.0 - amask) * (-1e20)

    def attend(source, target, attention):
        a = jnp.exp(jax.nn.log_softmax(attention, axis=1))
        att = jnp.einsum("bts,bse->bte", a, source)
        return jnp.concatenate([target, att], axis=-1)

    attended_prem = attend(hypo_enc, prem_enc, attn_m)
    attended_hypo = attend(prem_enc, hypo_enc, jnp.transpose(attn_m, (0, 2, 1)))

    w_c1 = jnp.concatenate([params["w_c1a"], params["w_c1b"]], axis=0)

    def cmp(x):
        h1 = jnp.maximum(x @ w_c1 + params["b_c1"], 0.0)
        return h1 @ params["w_c2"] + params["b_c2"]

    compared_prem = cmp(attended_prem) * pm[..., None]
    compared_hypo = cmp(attended_hypo) * hm[..., None]

    agg = jnp.concatenate(
        [compared_prem.sum(axis=1), compared_hypo.sum(axis=1)], axis=-1)
    w_o1 = jnp.concatenate([params["w_o1a"], params["w_o1b"]], axis=0)
    h1 = jnp.maximum(agg @ w_o1 + params["b_o1"], 0.0)
    h2 = h1 @ params["w_o2"] + params["b_o2"]
    logits = h2 @ params["w_o3"] + params["b_o3"]
    return jax.nn.log_softmax(logits, axis=1)


if __name__ == "__main__":
    key = jax.random.PRNGKey(0)
    B, p, h, d, vocab = 32, 8, 8, 32, 64
    bt = 16  # batch block per grid step -> kernel matmul M = bt*(p+h) = 256 rows

    k_par, k_p, k_h, k_pl, k_hl = jax.random.split(key, 5)
    params = init_params(k_par, vocab, d)

    prem_idx = jax.random.randint(k_p, (B, p), 0, vocab)
    hypo_idx = jax.random.randint(k_h, (B, h), 0, vocab)
    prem_len = jax.random.randint(k_pl, (B,), 2, p + 1)
    hypo_len = jax.random.randint(k_hl, (B,), 2, h + 1)
    prem_mask = (jnp.arange(p)[None, :] < prem_len[:, None]).astype(jnp.float32)
    hypo_mask = (jnp.arange(h)[None, :] < hypo_len[:, None]).astype(jnp.float32)

    out = decomp_attention_forward(params, prem_idx, hypo_idx, prem_mask,
                                   hypo_mask, block_b=bt)
    out = jax.block_until_ready(out)

    ref = reference_forward(params, prem_idx, hypo_idx, prem_mask, hypo_mask)
    assert out.shape == (B, 3)
    assert bool(jnp.all(jnp.isfinite(out)))
    # Matmul operands are bf16 (f32 accumulation), so compare at bf16-level
    # tolerance rather than f32 round-off.
    assert bool(jnp.allclose(out, ref, atol=3e-2, rtol=3e-2)), (out, ref)
    print("KERNEL_OK")
</pallas_src>

<mosaic_0001>
module attributes {stable_mosaic.version = 11 : i64} {
  func.func @_decomp_attention_kernel(%arg0: i32, %arg1: memref<16x16x32xbf16, #tpu.memory_space<vmem>>, %arg2: memref<16x16x1xf32, #tpu.memory_space<vmem>>, %arg3: memref<16x1x8xf32, #tpu.memory_space<vmem>>, %arg4: memref<288x32xbf16, #tpu.memory_space<vmem>>, %arg5: memref<7x32xf32, #tpu.memory_space<vmem>>, %arg6: memref<32x128xbf16, #tpu.memory_space<vmem>>, %arg7: memref<1x128xf32, #tpu.memory_space<vmem>>, %arg8: memref<16x128xf32, #tpu.memory_space<vmem>>) attributes {dimension_semantics = [#tpu.dimension_semantics<parallel>], iteration_bounds = array<i64: 2>, scalar_prefetch = 0 : i64, scratch_operands = 0 : i64, tpu.core_type = #tpu.core_type<tc>, window_params = [{transform_indices = @transform_0, window_bounds = array<i64: 16, 16, 32>}, {transform_indices = @transform_1, window_bounds = array<i64: 16, 16, 1>}, {transform_indices = @transform_2, window_bounds = array<i64: 16, 1, 8>}, {pipeline_mode = #tpu.pipeline_mode<synchronous>, transform_indices = @transform_3, window_bounds = array<i64: 288, 32>}, {pipeline_mode = #tpu.pipeline_mode<synchronous>, transform_indices = @transform_4, window_bounds = array<i64: 7, 32>}, {pipeline_mode = #tpu.pipeline_mode<synchronous>, transform_indices = @transform_5, window_bounds = array<i64: 32, 128>}, {pipeline_mode = #tpu.pipeline_mode<synchronous>, transform_indices = @transform_6, window_bounds = array<i64: 1, 128>}, {transform_indices = @transform_7, window_bounds = array<i64: 16, 128>}]} {
    %c0 = arith.constant 0 : index
    %c0_0 = arith.constant 0 : index
    %0 = vector.load %arg4[%c0, %c0_0] : memref<288x32xbf16, #tpu.memory_space<vmem>>, vector<32x32xbf16>
    %c32 = arith.constant 32 : index
    %c0_1 = arith.constant 0 : index
    %1 = vector.load %arg4[%c32, %c0_1] : memref<288x32xbf16, #tpu.memory_space<vmem>>, vector<32x32xbf16>
    %c64 = arith.constant 64 : index
    %c0_2 = arith.constant 0 : index
    %2 = vector.load %arg4[%c64, %c0_2] : memref<288x32xbf16, #tpu.memory_space<vmem>>, vector<32x1xbf16>
    %c96 = arith.constant 96 : index
    %c0_3 = arith.constant 0 : index
    %3 = vector.load %arg4[%c96, %c0_3] : memref<288x32xbf16, #tpu.memory_space<vmem>>, vector<32x32xbf16>
    %c128 = arith.constant 128 : index
    %c0_4 = arith.constant 0 : index
    %4 = vector.load %arg4[%c128, %c0_4] : memref<288x32xbf16, #tpu.memory_space<vmem>>, vector<32x32xbf16>
    %c160 = arith.constant 160 : index
    %c0_5 = arith.constant 0 : index
    %5 = vector.load %arg4[%c160, %c0_5] : memref<288x32xbf16, #tpu.memory_space<vmem>>, vector<32x32xbf16>
    %c192 = arith.constant 192 : index
    %c0_6 = arith.constant 0 : index
    %6 = vector.load %arg4[%c192, %c0_6] : memref<288x32xbf16, #tpu.memory_space<vmem>>, vector<32x32xbf16>
    %c224 = arith.constant 224 : index
    %c0_7 = arith.constant 0 : index
    %7 = vector.load %arg4[%c224, %c0_7] : memref<288x32xbf16, #tpu.memory_space<vmem>>, vector<32x32xbf16>
    %c256 = arith.constant 256 : index
    %c0_8 = arith.constant 0 : index
    %8 = vector.load %arg4[%c256, %c0_8] : memref<288x32xbf16, #tpu.memory_space<vmem>>, vector<32x32xbf16>
    %c0_9 = arith.constant 0 : index
    %c0_10 = arith.constant 0 : index
    %9 = vector.load %arg5[%c0_9, %c0_10] : memref<7x32xf32, #tpu.memory_space<vmem>>, vector<1x32xf32>
    %c1 = arith.constant 1 : index
    %c0_11 = arith.constant 0 : index
    %10 = vector.load %arg5[%c1, %c0_11] : memref<7x32xf32, #tpu.memory_space<vmem>>, vector<1x32xf32>
    %c2 = arith.constant 2 : index
    %c0_12 = arith.constant 0 : index
    %11 = vector.load %arg5[%c2, %c0_12] : memref<7x32xf32, #tpu.memory_space<vmem>>, vector<1x1xf32>
    %c3 = arith.constant 3 : index
    %c0_13 = arith.constant 0 : index
    %12 = vector.load %arg5[%c3, %c0_13] : memref<7x32xf32, #tpu.memory_space<vmem>>, vector<1x32xf32>
    %c4 = arith.constant 4 : index
    %c0_14 = arith.constant 0 : index
    %13 = vector.load %arg5[%c4, %c0_14] : memref<7x32xf32, #tpu.memory_space<vmem>>, vector<1x32xf32>
    %c5 = arith.constant 5 : index
    %c0_15 = arith.constant 0 : index
    %14 = vector.load %arg5[%c5, %c0_15] : memref<7x32xf32, #tpu.memory_space<vmem>>, vector<1x32xf32>
    %c6 = arith.constant 6 : index
    %c0_16 = arith.constant 0 : index
    %15 = vector.load %arg5[%c6, %c0_16] : memref<7x32xf32, #tpu.memory_space<vmem>>, vector<1x32xf32>
    %c0_17 = arith.constant 0 : index
    %c0_18 = arith.constant 0 : index
    %c0_19 = arith.constant 0 : index
    %16 = vector.load %arg2[%c0_17, %c0_18, %c0_19] : memref<16x16x1xf32, #tpu.memory_space<vmem>>, vector<16x16x1xf32>
    %17 = vector.shape_cast %16 : vector<16x16x1xf32> to vector<256x1xf32>
    %c0_20 = arith.constant 0 : index
    %c0_21 = arith.constant 0 : index
    %c0_22 = arith.constant 0 : index
    %18 = vector.load %arg1[%c0_20, %c0_21, %c0_22] : memref<16x16x32xbf16, #tpu.memory_space<vmem>>, vector<16x16x32xbf16>
    %19 = vector.shape_cast %18 : vector<16x16x32xbf16> to vector<256x32xbf16>
    %cst = arith.constant dense<0.000000e+00> : vector<256x32xf32>
    %20 = tpu.matmul %19, %0, %cst {dimension_numbers = #tpu.dot_dimension_numbers<[1], [0], [0], [1], [0, 0, 1, 1], [], []>} : vector<256x32xbf16>, vector<32x32xbf16>, vector<256x32xf32> -> vector<256x32xf32>
    %21 = vector.broadcast %9 : vector<1x32xf32> to vector<256x32xf32>
    %22 = arith.addf %20, %21 : vector<256x32xf32>
    %cst_23 = arith.constant 0.000000e+00 : f32
    %23 = vector.broadcast %cst_23 : f32 to vector<256x32xf32>
    %24 = arith.maximumf %22, %23 : vector<256x32xf32>
    %25 = vector.broadcast %17 : vector<256x1xf32> to vector<256x32xf32>
    %26 = arith.mulf %24, %25 : vector<256x32xf32>
    %27 = arith.truncf %26 : vector<256x32xf32> to vector<256x32xbf16>
    %cst_24 = arith.constant dense<0.000000e+00> : vector<256x32xf32>
    %28 = tpu.matmul %27, %1, %cst_24 {dimension_numbers = #tpu.dot_dimension_numbers<[1], [0], [0], [1], [0, 0, 1, 1], [], []>} : vector<256x32xbf16>, vector<32x32xbf16>, vector<256x32xf32> -> vector<256x32xf32>
    %29 = vector.broadcast %10 : vector<1x32xf32> to vector<256x32xf32>
    %30 = arith.addf %28, %29 : vector<256x32xf32>
    %cst_25 = arith.constant 0.000000e+00 : f32
    %31 = vector.broadcast %cst_25 : f32 to vector<256x32xf32>
    %32 = arith.maximumf %30, %31 : vector<256x32xf32>
    %33 = arith.truncf %32 : vector<256x32xf32> to vector<256x32xbf16>
    %cst_26 = arith.constant dense<0.000000e+00> : vector<256x1xf32>
    %34 = tpu.matmul %33, %2, %cst_26 {dimension_numbers = #tpu.dot_dimension_numbers<[1], [0], [0], [1], [0, 0, 1, 1], [], []>} : vector<256x32xbf16>, vector<32x1xbf16>, vector<256x1xf32> -> vector<256x1xf32>
    %35 = vector.broadcast %11 : vector<1x1xf32> to vector<256x1xf32>
    %36 = arith.addf %34, %35 : vector<256x1xf32>
    %37 = arith.mulf %36, %17 : vector<256x1xf32>
    %38 = vector.shape_cast %26 : vector<256x32xf32> to vector<16x16x32xf32>
    %39 = vector.shape_cast %37 : vector<256x1xf32> to vector<16x16x1xf32>
    %40 = vector.extract_strided_slice %38 {offsets = [0, 0, 0], sizes = [16, 8, 32], strides = [1, 1, 1]} : vector<16x16x32xf32> to vector<16x8x32xf32>
    %41 = vector.extract_strided_slice %38 {offsets = [0, 8, 0], sizes = [16, 8, 32], strides = [1, 1, 1]} : vector<16x16x32xf32> to vector<16x8x32xf32>
    %42 = vector.extract_strided_slice %39 {offsets = [0, 0, 0], sizes = [16, 8, 1], strides = [1, 1, 1]} : vector<16x16x1xf32> to vector<16x8x1xf32>
    %43 = vector.extract_strided_slice %39 {offsets = [0, 8, 0], sizes = [16, 8, 1], strides = [1, 1, 1]} : vector<16x16x1xf32> to vector<16x8x1xf32>
    %44 = vector.extract_strided_slice %16 {offsets = [0, 0, 0], sizes = [16, 8, 1], strides = [1, 1, 1]} : vector<16x16x1xf32> to vector<16x8x1xf32>
    %c0_27 = arith.constant 0 : index
    %c0_28 = arith.constant 0 : index
    %c0_29 = arith.constant 0 : index
    %45 = vector.load %arg3[%c0_27, %c0_28, %c0_29] : memref<16x1x8xf32, #tpu.memory_space<vmem>>, vector<16x1x8xf32>
    "tpu.trace_start"() <{level = 10 : i32, message = "bpi,bhi->bph"}> : () -> ()
    %cst_30 = arith.constant dense<0.000000e+00> : vector<16x8x8xf32>
    %46 = tpu.matmul %42, %43, %cst_30 {dimension_numbers = #tpu.dot_dimension_numbers<[2], [2], [1], [1], [0, 0, 0, 1, 1, 1], [0], [0]>} : vector<16x8x1xf32>, vector<16x8x1xf32>, vector<16x8x8xf32> -> vector<16x8x8xf32>
    "tpu.trace_stop"() : () -> ()
    %47 = vector.broadcast %44 : vector<16x8x1xf32> to vector<16x8x8xf32>
    %48 = vector.broadcast %45 : vector<16x1x8xf32> to vector<16x8x8xf32>
    %49 = arith.mulf %47, %48 : vector<16x8x8xf32>
    %cst_31 = arith.constant 1.000000e+00 : f32
    %50 = vector.broadcast %cst_31 : f32 to vector<16x8x8xf32>
    %51 = arith.subf %50, %49 : vector<16x8x8xf32>
    %cst_32 = arith.constant -1.000000e+20 : f32
    %52 = vector.broadcast %cst_32 : f32 to vector<16x8x8xf32>
    %53 = arith.mulf %51, %52 : vector<16x8x8xf32>
    %54 = arith.addf %46, %53 : vector<16x8x8xf32>
    %cst_33 = arith.constant dense<0xFF800000> : vector<16x8xf32>
    %55 = vector.multi_reduction <maximumf>, %54, %cst_33 [1] : vector<16x8x8xf32> to vector<16x8xf32>
    %56 = vector.shape_cast %55 : vector<16x8xf32> to vector<16x1x8xf32>
    %57 = vector.broadcast %56 : vector<16x1x8xf32> to vector<16x8x8xf32>
    %58 = arith.subf %54, %57 : vector<16x8x8xf32>
    %59 = math.exp %58 : vector<16x8x8xf32>
    %cst_34 = arith.constant dense<0.000000e+00> : vector<16x8xf32>
    %60 = vector.multi_reduction <add>, %59, %cst_34 [1] : vector<16x8x8xf32> to vector<16x8xf32>
    %61 = vector.shape_cast %60 : vector<16x8xf32> to vector<16x1x8xf32>
    %62 = tpu.reciprocal %61 {approx = true} : vector<16x1x8xf32> -> vector<16x1x8xf32>
    %63 = vector.broadcast %62 : vector<16x1x8xf32> to vector<16x8x8xf32>
    %64 = arith.mulf %59, %63 : vector<16x8x8xf32>
    %65 = arith.truncf %64 : vector<16x8x8xf32> to vector<16x8x8xbf16>
    %cst_35 = arith.constant dense<0xFF800000> : vector<16x8xf32>
    %66 = vector.multi_reduction <maximumf>, %54, %cst_35 [2] : vector<16x8x8xf32> to vector<16x8xf32>
    %67 = vector.shape_cast %66 : vector<16x8xf32> to vector<16x8x1xf32>
    %68 = vector.broadcast %67 : vector<16x8x1xf32> to vector<16x8x8xf32>
    %69 = arith.subf %54, %68 : vector<16x8x8xf32>
    %70 = math.exp %69 : vector<16x8x8xf32>
    %cst_36 = arith.constant dense<0.000000e+00> : vector<16x8xf32>
    %71 = vector.multi_reduction <add>, %70, %cst_36 [2] : vector<16x8x8xf32> to vector<16x8xf32>
    %72 = vector.shape_cast %71 : vector<16x8xf32> to vector<16x8x1xf32>
    %73 = tpu.reciprocal %72 {approx = true} : vector<16x8x1xf32> -> vector<16x8x1xf32>
    %74 = vector.broadcast %73 : vector<16x8x1xf32> to vector<16x8x8xf32>
    %75 = arith.mulf %70, %74 : vector<16x8x8xf32>
    %76 = arith.truncf %75 : vector<16x8x8xf32> to vector<16x8x8xbf16>
    %77 = arith.truncf %41 : vector<16x8x32xf32> to vector<16x8x32xbf16>
    "tpu.trace_start"() <{level = 10 : i32, message = "bph,bhd->bpd"}> : () -> ()
    %cst_37 = arith.constant dense<0.000000e+00> : vector<16x8x32xf32>
    %78 = tpu.matmul %65, %77, %cst_37 {dimension_numbers = #tpu.dot_dimension_numbers<[2], [1], [1], [2], [0, 0, 0, 1, 1, 2], [0], [0]>} : vector<16x8x8xbf16>, vector<16x8x32xbf16>, vector<16x8x32xf32> -> vector<16x8x32xf32>
    "tpu.trace_stop"() : () -> ()
    %79 = arith.truncf %40 : vector<16x8x32xf32> to vector<16x8x32xbf16>
    "tpu.trace_start"() <{level = 10 : i32, message = "bph,bpd->bhd"}> : () -> ()
    %cst_38 = arith.constant dense<0.000000e+00> : vector<16x8x32xf32>
    %80 = tpu.matmul %76, %79, %cst_38 {dimension_numbers = #tpu.dot_dimension_numbers<[1], [1], [2], [2], [0, 0, 0, 2, 1, 2], [0], [0]>} : vector<16x8x8xbf16>, vector<16x8x32xbf16>, vector<16x8x32xf32> -> vector<16x8x32xf32>
    "tpu.trace_stop"() : () -> ()
    %81 = tpu.concatenate %78, %80 in 1 : vector<16x8x32xf32>, vector<16x8x32xf32> -> vector<16x16x32xf32>
    %82 = vector.shape_cast %81 : vector<16x16x32xf32> to vector<256x32xf32>
    %83 = arith.truncf %26 : vector<256x32xf32> to vector<256x32xbf16>
    %cst_39 = arith.constant dense<0.000000e+00> : vector<256x32xf32>
    %84 = tpu.matmul %83, %3, %cst_39 {dimension_numbers = #tpu.dot_dimension_numbers<[1], [0], [0], [1], [0, 0, 1, 1], [], []>} : vector<256x32xbf16>, vector<32x32xbf16>, vector<256x32xf32> -> vector<256x32xf32>
    %85 = arith.truncf %82 : vector<256x32xf32> to vector<256x32xbf16>
    %cst_40 = arith.constant dense<0.000000e+00> : vector<256x32xf32>
    %86 = tpu.matmul %85, %4, %cst_40 {dimension_numbers = #tpu.dot_dimension_numbers<[1], [0], [0], [1], [0, 0, 1, 1], [], []>} : vector<256x32xbf16>, vector<32x32xbf16>, vector<256x32xf32> -> vector<256x32xf32>
    %87 = arith.addf %84, %86 : vector<256x32xf32>
    %88 = vector.broadcast %12 : vector<1x32xf32> to vector<256x32xf32>
    %89 = arith.addf %87, %88 : vector<256x32xf32>
    %cst_41 = arith.constant 0.000000e+00 : f32
    %90 = vector.broadcast %cst_41 : f32 to vector<256x32xf32>
    %91 = arith.maximumf %89, %90 : vector<256x32xf32>
    %92 = arith.truncf %91 : vector<256x32xf32> to vector<256x32xbf16>
    %cst_42 = arith.constant dense<0.000000e+00> : vector<256x32xf32>
    %93 = tpu.matmul %92, %5, %cst_42 {dimension_numbers = #tpu.dot_dimension_numbers<[1], [0], [0], [1], [0, 0, 1, 1], [], []>} : vector<256x32xbf16>, vector<32x32xbf16>, vector<256x32xf32> -> vector<256x32xf32>
    %94 = vector.broadcast %13 : vector<1x32xf32> to vector<256x32xf32>
    %95 = arith.addf %93, %94 : vector<256x32xf32>
    %96 = vector.broadcast %17 : vector<256x1xf32> to vector<256x32xf32>
    %97 = arith.mulf %95, %96 : vector<256x32xf32>
    %98 = vector.shape_cast %97 : vector<256x32xf32> to vector<16x16x32xf32>
    %99 = vector.extract_strided_slice %98 {offsets = [0, 0, 0], sizes = [16, 8, 32], strides = [1, 1, 1]} : vector<16x16x32xf32> to vector<16x8x32xf32>
    %cst_43 = arith.constant dense<0.000000e+00> : vector<16x32xf32>
    %100 = vector.multi_reduction <add>, %99, %cst_43 [1] : vector<16x8x32xf32> to vector<16x32xf32>
    %101 = vector.extract_strided_slice %98 {offsets = [0, 8, 0], sizes = [16, 8, 32], strides = [1, 1, 1]} : vector<16x16x32xf32> to vector<16x8x32xf32>
    %cst_44 = arith.constant dense<0.000000e+00> : vector<16x32xf32>
    %102 = vector.multi_reduction <add>, %101, %cst_44 [1] : vector<16x8x32xf32> to vector<16x32xf32>
    %103 = arith.truncf %100 : vector<16x32xf32> to vector<16x32xbf16>
    %cst_45 = arith.constant dense<0.000000e+00> : vector<16x32xf32>
    %104 = tpu.matmul %103, %6, %cst_45 {dimension_numbers = #tpu.dot_dimension_numbers<[1], [0], [0], [1], [0, 0, 1, 1], [], []>} : vector<16x32xbf16>, vector<32x32xbf16>, vector<16x32xf32> -> vector<16x32xf32>
    %105 = arith.truncf %102 : vector<16x32xf32> to vector<16x32xbf16>
    %cst_46 = arith.constant dense<0.000000e+00> : vector<16x32xf32>
    %106 = tpu.matmul %105, %7, %cst_46 {dimension_numbers = #tpu.dot_dimension_numbers<[1], [0], [0], [1], [0, 0, 1, 1], [], []>} : vector<16x32xbf16>, vector<32x32xbf16>, vector<16x32xf32> -> vector<16x32xf32>
    %107 = arith.addf %104, %106 : vector<16x32xf32>
    %108 = vector.broadcast %14 : vector<1x32xf32> to vector<16x32xf32>
    %109 = arith.addf %107, %108 : vector<16x32xf32>
    %cst_47 = arith.constant 0.000000e+00 : f32
    %110 = vector.broadcast %cst_47 : f32 to vector<16x32xf32>
    %111 = arith.maximumf %109, %110 : vector<16x32xf32>
    %112 = arith.truncf %111 : vector<16x32xf32> to vector<16x32xbf16>
    %cst_48 = arith.constant dense<0.000000e+00> : vector<16x32xf32>
    %113 = tpu.matmul %112, %8, %cst_48 {dimension_numbers = #tpu.dot_dimension_numbers<[1], [0], [0], [1], [0, 0, 1, 1], [], []>} : vector<16x32xbf16>, vector<32x32xbf16>, vector<16x32xf32> -> vector<16x32xf32>
    %114 = vector.broadcast %15 : vector<1x32xf32> to vector<16x32xf32>
    %115 = arith.addf %113, %114 : vector<16x32xf32>
    %c0_49 = arith.constant 0 : index
    %c0_50 = arith.constant 0 : index
    %116 = vector.load %arg6[%c0_49, %c0_50] : memref<32x128xbf16, #tpu.memory_space<vmem>>, vector<32x128xbf16>
    %117 = arith.truncf %115 : vector<16x32xf32> to vector<16x32xbf16>
    %cst_51 = arith.constant dense<0.000000e+00> : vector<16x128xf32>
    %118 = tpu.matmul %117, %116, %cst_51 {dimension_numbers = #tpu.dot_dimension_numbers<[1], [0], [0], [1], [0, 0, 1, 1], [], []>} : vector<16x32xbf16>, vector<32x128xbf16>, vector<16x128xf32> -> vector<16x128xf32>
    %c0_52 = arith.constant 0 : index
    %c0_53 = arith.constant 0 : index
    %119 = vector.load %arg7[%c0_52, %c0_53] : memref<1x128xf32, #tpu.memory_space<vmem>>, vector<1x128xf32>
    %120 = vector.broadcast %119 : vector<1x128xf32> to vector<16x128xf32>
    %121 = arith.addf %118, %120 : vector<16x128xf32>
    %cst_54 = arith.constant dense<0xFF800000> : vector<16xf32>
    %122 = vector.multi_reduction <maximumf>, %121, %cst_54 [1] : vector<16x128xf32> to vector<16xf32>
    %123 = vector.shape_cast %122 : vector<16xf32> to vector<16x1xf32>
    %124 = vector.broadcast %123 : vector<16x1xf32> to vector<16x128xf32>
    %125 = arith.subf %121, %124 : vector<16x128xf32>
    %126 = math.exp %125 : vector<16x128xf32>
    %cst_55 = arith.constant dense<0.000000e+00> : vector<16xf32>
    %127 = vector.multi_reduction <add>, %126, %cst_55 [1] : vector<16x128xf32> to vector<16xf32>
    %128 = vector.shape_cast %127 : vector<16xf32> to vector<16x1xf32>
    %129 = math.log %128 : vector<16x1xf32>
    %130 = vector.broadcast %129 : vector<16x1xf32> to vector<16x128xf32>
    %131 = arith.subf %125, %130 : vector<16x128xf32>
    %c0_56 = arith.constant 0 : index
    %c0_57 = arith.constant 0 : index
    %132 = vector.load %arg8[%c0_56, %c0_57] : memref<16x128xf32, #tpu.memory_space<vmem>>, vector<16x128xf32>
    tpu.vector_store %arg8[%c0_56, %c0_57], %131 {strides = array<i32>} : memref<16x128xf32, #tpu.memory_space<vmem>>, vector<16x128xf32>,
    return
  }
  func.func @transform_0(%arg0: i32) -> (i32, i32, i32) {
    %c0_i32 = arith.constant 0 : i32
    %c0_i32_0 = arith.constant 0 : i32
    %c0_i32_1 = arith.constant 0 : i32
    return %arg0, %c0_i32, %c0_i32_0 : i32, i32, i32
  }
  func.func @transform_1(%arg0: i32) -> (i32, i32, i32) {
    %c0_i32 = arith.constant 0 : i32
    %c0_i32_0 = arith.constant 0 : i32
    %c0_i32_1 = arith.constant 0 : i32
    return %arg0, %c0_i32, %c0_i32_0 : i32, i32, i32
  }
  func.func @transform_2(%arg0: i32) -> (i32, i32, i32) {
    %c0_i32 = arith.constant 0 : i32
    %c0_i32_0 = arith.constant 0 : i32
    %c0_i32_1 = arith.constant 0 : i32
    return %arg0, %c0_i32, %c0_i32_0 : i32, i32, i32
  }
  func.func @transform_3(%arg0: i32) -> (i32, i32) {
    %c0_i32 = arith.constant 0 : i32
    %c0_i32_0 = arith.constant 0 : i32
    %c0_i32_1 = arith.constant 0 : i32
    return %c0_i32, %c0_i32_0 : i32, i32
  }
  func.func @transform_4(%arg0: i32) -> (i32, i32) {
    %c0_i32 = arith.constant 0 : i32
    %c0_i32_0 = arith.constant 0 : i32
    %c0_i32_1 = arith.constant 0 : i32
    return %c0_i32, %c0_i32_0 : i32, i32
  }
  func.func @transform_5(%arg0: i32) -> (i32, i32) {
    %c0_i32 = arith.constant 0 : i32
    %c0_i32_0 = arith.constant 0 : i32
    %c0_i32_1 = arith.constant 0 : i32
    return %c0_i32, %c0_i32_0 : i32, i32
  }
  func.func @transform_6(%arg0: i32) -> (i32, i32) {
    %c0_i32 = arith.constant 0 : i32
    %c0_i32_0 = arith.constant 0 : i32
    %c0_i32_1 = arith.constant 0 : i32
    return %c0_i32, %c0_i32_0 : i32, i32
  }
  func.func @transform_7(%arg0: i32) -> (i32, i32) {
    %c0_i32 = arith.constant 0 : i32
    %c0_i32_0 = arith.constant 0 : i32
    return %arg0, %c0_i32 : i32, i32
  }
}

</mosaic_0001>

<bundles_post_ra>
// kernel: tpu_custom_call.1
= control target key start
LH: loop header
LB: loop body
LE: loop exit
PB: predicated region body
PF: predicated region fallthrough
CT: control target
= control target key end

     0   :  { %12 = vsyncpa [#allocation3], 0  ;;  %s6518_s0 = inlined_call_operand.vmem [shape: bf16[32,16,32], index: 0, kind: input, shape index: {}]   ;;  %s6519_s1 = inlined_call_operand.vmem [shape: f32[32,16,1], index: 1, kind: input, shape index: {}]   ;;  %s6520_s2 = inlined_call_operand.vmem [shape: f32[32,1,8], index: 2, kind: input, shape index: {}]   ;;  %s6521_s3 = inlined_call_operand.vmem [shape: bf16[288,32], index: 3, kind: input, shape index: {}]   ;;  %s6522_s4 = inlined_call_operand.vmem [shape: f32[7,32], index: 4, kind: input, shape index: {}]   ;;  %s6523_s5 = inlined_call_operand.vmem [shape: bf16[32,128], index: 5, kind: input, shape index: {}]   ;;  %s6524_s6 = inlined_call_operand.vmem [shape: f32[1,128], index: 6, kind: input, shape index: {}]   ;;  %s6525_s7 = inlined_call_operand.hbm [shape: f32[32,128], index: 7, kind: output, shape index: {}]  }
   0x1   :  { %14 = vsyncpa [#allocation3 + $0x1], 0  ;;  %s5061_s24 = smov 0   ;;  %s5063_s25 = smov 0  }
   0x2   :  { %s5065_s26 = smov 0   ;;  %s5067_s27 = smov 0  }
   0x3 LB: > { %s4347_s28 = sadd.s32 4294967295, %s5016_s27   ;;  %s4348_s29 = sadd.s32 4294967294, %s5016_s27   ;;  %s5016_s27 = sphi %s5067_s27, %s6697_s27   ;;  %s5012_s26 = sphi %s5065_s26, %s6696_s26   ;;  %s5008_s25 = sphi %s5063_s25, %s6695_s25   ;;  %s5004_s24 = sphi %s5061_s24, %s6694_s24  }
   0x4   : > { %s5084_s30 = sadd.s32 1, %s5016_s27   ;;  %s189_s8 = sadd.s32 1, %s5012_s26 }
   0x5   : > { %s186_s9 = ssub.s32 %s5016_s27, %s5084_s30  ;;  %p199_p0 = scmp.ne.s32.totalorder %s5012_s26, %s5008_s25 }
   0x6   : > { %p187_p1 = scmp.eq.s32.totalorder %s186_s9, 0  ;;  %p200_p2 = scmp.eq.s32.totalorder %s4347_s28, 1 }
   0x7   : > { %p205_p3 = scmp.ne.s32.totalorder %s5008_s25, %s5004_s24  ;;  %p206_p4 = scmp.eq.s32.totalorder %s4348_s29, 1 }
   0x8   : > { %s5094_s10 = scalar_select %p187_p1, %s5012_s26, %s189_s8  }
   0x9   : > { %p5096_p5 = por %p200_p2, %p199_p0  ;;  %p5100_p6 = por %p206_p4, %p205_p3 }
   0xa   : > { %p4351_p7 = scmp.ge.s32.totalorder %s5016_s27, 1  ;;  %p264_p8 = scmp.lt.s32.totalorder %s5016_s27, 3 }
   0xc   : > { %p265_p9 = pnand %p4351_p7, %p264_p8 }
   0xe   : > { %268 = sbr.rel (%p265_p9) target bundleno = 2860 (0xb2c), region = 48 }
  0x13   : > { %v4676_v0 = vld [vmem:[%s6521_s3 + $0x8] sm:$0xff]  ;;  %s5109_s15 = sshll.u32 %s4347_s28, 4  ;;  %v5018_v1 = vmov 0   ;;  %v4675_v2 = vld [vmem:[%s6521_s3] sm:$0xff]  ;;  %vm528_vm0 = vcmask 261120   ;;  %v4678_v45 = vld [vmem:[%s6521_s3 + $0x18] sm:$0xff] }
  0x14   : > { %4761 = vset.pattern.permute.xlu1 %v5018_v1  ;;  %4760 = vset.pattern.permute.xlu0 %v5018_v1  ;;  %p308_p10 = scmp.lt.s32.totalorder %s5109_s15, 31  ;;  %v4677_v46 = vld [vmem:[%s6521_s3 + $0x10] sm:$0xff]  ;;  %v4680_v49 = vld [vmem:[%s6521_s3 + $0x28] sm:$0xff]  ;;  %v4679_v52 = vld [vmem:[%s6521_s3 + $0x20] sm:$0xff]  ;;  %vm2331_vm1 = vcmask 1043456   ;;  %vm1398_vm2 = vcmask 7168  }
  0x15   : > { %583 = vmatpush.bf16.msra.mxu0 %v4676_v0  ;;  %4712 = vmatpush.bf16.msra.mxu2 %v4676_v0  ;;  %v5279_v58 = vld [vmem:[%s6522_s4] ss:$0 sm:$0xff]  ;;  %vm1815_vm3 = vcmask 64512   ;;  %vm4026_vm4 = vcmask 1041409   ;;  %vm4028_vm5 = vcmask 1042434   ;;  %vm4030_vm6 = vcmask 1043459  }
  0x16   : > { %4762 = vset.pattern.permute.xlu2 %v5018_v1  ;;  %s309_s18 = scalar_select %p308_p10, %s5109_s15, 31  ;;  %973 = vmatpush.bf16.msra.mxu1 %v4678_v45  ;;  %vm4032_vm7 = vcmask 1044484   ;;  %vm4034_vm8 = vcmask 1045509   ;;  %vm4036_vm9 = vcmask 1046534   ;;  %vm4038_vm10 = vcmask 1047559  }
  0x18   : > { %s4674_s19 = sshll.u32 %s309_s18, 4  ;;  %s4673_s20 = sshll.u32 %s309_s18, 3 }
  0x19   : > { %584 = vmatpush.bf16.msra.mxu0 %v4675_v2  ;;  %4713 = vmatpush.bf16.msra.mxu2 %v4675_v2  ;;  %s5119_s23 = scalar_lea.vmem %s6519_s1, %s4674_s19  ;;  %s5124_s8 = scalar_lea.vmem %s6518_s0, %s4673_s20 }
  0x1a   : > { %v5127_v3 = vld [vmem:[%s5119_s23 + $0x10] sm:$0xff]  ;;  %v5130_v4 = vld [vmem:[%s5119_s23] sm:$0xff]  ;;  %v4706_v7 = vld [vmem:[%s5124_s8 + $0x68] sm:$0xff]  ;;  %s5151_s14 = scalar_lea.vmem %s6520_s2, %s309_s18  ;;  %974 = vmatpush.bf16.msra.mxu1 %v4677_v46 }
  0x1b   : > { %v5133_v5 = vld [vmem:[%s5119_s23 + $0x20] sm:$0xff]  ;;  %710 = vperm.xlu1 %4761, %v5127_v3   ;;  %700 = vperm.xlu0 %4760, %v5130_v4   ;;  %v5143_v8 = vld [vmem:[%s5119_s23 + $0x18] sm:$0xff]  ;;  %v5146_v9 = vld [vmem:[%s5119_s23 + $0x8] sm:$0xff] }
  0x1c   : > { %v4693_v6 = vld [vmem:[%s5124_s8] sm:$0xff]  ;;  %720 = vperm.xlu2 %4762, %v5133_v5   ;;  %4445 = vmatmul.msk.bf16.vlgmr.msra.gmra.mxu2 %vm528_vm0, %v4706_v7  ;;  %v5154_v10 = vld [vmem:[%s5119_s23 + $0x28] sm:$0xff]  ;;  %v5160_v11 = vld [vmem:[%s5119_s23 + $0x38] sm:$0xff] }
  0x1d   : > { %4432 = vmatmul.msk.bf16.vlgmr.msra.gmra.mxu0 %vm528_vm0, %v4693_v6  ;;  %v5163_v12 = vld [vmem:[%s5119_s23 + $0x30] sm:$0xff]  ;;  %v5166_v13 = vld [vmem:[%s5119_s23 + $0x40] sm:$0xff]  ;;  %v4694_v14 = vld [vmem:[%s5124_s8 + $0x8] sm:$0xff]  ;;  %4714 = vmatpush.bf16.msrb.mxu2 %v4678_v45 }
  0x1e   : > { %v4707_v15 = vld [vmem:[%s5124_s8 + $0x70] sm:$0xff]  ;;  %v5179_v17 = vld [vmem:[%s5119_s23 + $0x48] sm:$0xff]  ;;  %v5182_v18 = vld [vmem:[%s5119_s23 + $0x58] sm:$0xff] }
  0x1f   : > { %v5176_v16 = vld [vmem:[%s5119_s23 + $0x50] sm:$0xff]  ;;  %v398_v19 = vld [vmem:[%s5119_s23 + $0xd8] sm:$0xff]  ;;  %v5190_v21 = vld [vmem:[%s5119_s23 + $0x60] sm:$0xff] }
  0x20   : > { %v397_v20 = vld [vmem:[%s5119_s23 + $0xd0] sm:$0xff]  ;;  %v4708_v23 = vld [vmem:[%s5124_s8 + $0x78] sm:$0xff]  ;;  %v399_v24 = vld [vmem:[%s5119_s23 + $0xe0] sm:$0xff] }
  0x21   : > { %v4695_v22 = vld [vmem:[%s5124_s8 + $0x10] sm:$0xff]  ;;  %v5199_v25 = vld [vmem:[%s5119_s23 + $0x68] sm:$0xff]  ;;  %v5204_v27 = vld [vmem:[%s5119_s23 + $0x78] sm:$0xff]  ;;  %4715 = vmatpush.bf16.msrb.mxu2 %v4677_v46 }
  0x22   : > { %v400_v26 = vld [vmem:[%s5119_s23 + $0xe8] sm:$0xff]  ;;  %v5207_v28 = vld [vmem:[%s5119_s23 + $0x70] sm:$0xff]  ;;  %v4696_v30 = vld [vmem:[%s5124_s8 + $0x18] sm:$0xff] }
  0x23   : > { %715 = vperm.xlu1 %4761, %v5143_v8   ;;  %705 = vperm.xlu0 %4760, %v5146_v9   ;;  %v401_v29 = vld [vmem:[%s5119_s23 + $0xf0] sm:$0xff]  ;;  %v5215_v31 = vld [vmem:[%s5119_s23 + $0x80] sm:$0xff]  ;;  %v402_v32 = vld [vmem:[%s5119_s23 + $0xf8] sm:$0xff] }
  0x24   : > { %725 = vperm.xlu2 %4762, %v5154_v10   ;;  %v5219_v33 = vld [vmem:[%s5119_s23 + $0x88] sm:$0xff]  ;;  %v5224_v34 = vld [vmem:[%s5119_s23 + $0x98] sm:$0xff]  ;;  %v5227_v35 = vld [vmem:[%s5119_s23 + $0x90] sm:$0xff] }
  0x25   : > { %v5230_v36 = vld [vmem:[%s5119_s23 + $0xa0] sm:$0xff]  ;;  %v393_v38 = vld [vmem:[%s5119_s23 + $0xb0] sm:$0xff]  ;;  %v5239_v39 = vld [vmem:[%s5119_s23 + $0xa8] sm:$0xff]  ;;  %1171 = vmatpush.bf16.msra.mxu2 %v4680_v49 }
  0x26   : > { %v4697_v37 = vld [vmem:[%s5124_s8 + $0x20] sm:$0xff]  ;;  %v394_v40 = vld [vmem:[%s5119_s23 + $0xb8] sm:$0xff]  ;;  %v396_v41 = vld [vmem:[%s5119_s23 + $0xc8] sm:$0xff] }
  0x27   : > { %v395_v42 = vld [vmem:[%s5119_s23 + $0xc0] sm:$0xff]  ;;  %v4698_v43 = vld [vmem:[%s5124_s8 + $0x28] sm:$0xff]  ;;  %v4699_v44 = vld [vmem:[%s5124_s8 + $0x30] sm:$0xff] }
  0x28   : > { %v4700_v47 = vld [vmem:[%s5124_s8 + $0x38] sm:$0xff]  ;;  %v4701_v56 = vld [vmem:[%s5124_s8 + $0x40] sm:$0xff] }
  0x29   : > { %1172 = vmatpush.bf16.msra.mxu2 %v4679_v52 }
  0x2b   : > { %735 = vperm.xlu1 %4761, %v5160_v11   ;;  %730 = vperm.xlu0 %4760, %v5163_v12  }
  0x2c   : > { %740 = vperm.xlu2 %4762, %v5166_v13   ;;  %4446 = vmatmul.msk.bf16.gmra.mxu2 %vm528_vm0, %v4707_v15 }
  0x2d   : > { %4433 = vmatmul.msk.bf16.gmra.mxu0 %vm528_vm0, %v4694_v14 }
  0x33   : > { %750 = vperm.xlu1 %4761, %v5176_v16   ;;  %745 = vperm.xlu0 %4760, %v5179_v17  }
  0x34   : > { %755 = vperm.xlu2 %4762, %v5182_v18  }
  0x3b   : > { %835 = vperm.xlu1 %4761, %v398_v19   ;;  %830 = vperm.xlu0 %4760, %v397_v20  }
  0x3c   : > { %760 = vperm.xlu2 %4762, %v5190_v21   ;;  %4447 = vmatmul.msk.bf16.gmra.mxu2 %vm528_vm0, %v4708_v23 }
  0x3d   : > { %4434 = vmatmul.msk.bf16.gmra.mxu0 %vm528_vm0, %v4695_v22 }
  0x43   : > { %840 = vperm.xlu1 %4761, %v399_v24   ;;  %765 = vperm.xlu0 %4760, %v5199_v25  }
  0x44   : > { %845 = vperm.xlu2 %4762, %v400_v26  }
  0x4b   : > { %775 = vperm.xlu1 %4761, %v5204_v27   ;;  %770 = vperm.xlu0 %4760, %v5207_v28  }
  0x4c   : > { %850 = vperm.xlu2 %4762, %v401_v29   ;;  %v4702_v29 = vld [vmem:[%s5124_s8 + $0x48] sm:$0xff] }
  0x4d   : > { %4435 = vmatmul.msk.bf16.gmra.mxu0 %vm528_vm0, %v4696_v30 }
  0x53   : > { %780 = vperm.xlu1 %4761, %v5215_v31   ;;  %855 = vperm.xlu0 %4760, %v402_v32  }
  0x54   : > { %785 = vperm.xlu2 %4762, %v5219_v33  }
  0x5b   : > { %795 = vperm.xlu1 %4761, %v5224_v34   ;;  %790 = vperm.xlu0 %4760, %v5227_v35  }
  0x5c   : > { %800 = vperm.xlu2 %4762, %v5230_v36  }
  0x5d   : > { %4436 = vmatmul.msk.bf16.gmra.mxu0 %vm528_vm0, %v4697_v37 }
  0x63   : > { %810 = vperm.xlu1 %4761, %v393_v38   ;;  %805 = vperm.xlu0 %4760, %v5239_v39  }
  0x64   : > { %815 = vperm.xlu2 %4762, %v394_v40  }
  0x6b   : > { %825 = vperm.xlu1 %4761, %v396_v41   ;;  %820 = vperm.xlu0 %4760, %v395_v42  }
  0x6d   : > { %4437 = vmatmul.msk.bf16.gmra.mxu0 %vm528_vm0, %v4698_v43 }
  0x76   : > { %v5256_v48 = vpop.permute.xlu2 %720 }
  0x7d   : > { %4438 = vmatmul.msk.bf16.gmra.mxu0 %vm528_vm0, %v4699_v44 }
  0x7e   : > { %v5269_v53 = vpop.permute.xlu2 %725 }
  0x7f   : > { %6586 = vst [vmem:[#allocation5_spill] sm:$0xff] %v5269_v53 }
  0x86   : > { %v5286_v61 = vpop.permute.xlu2 %740 }
  0x8d   : > { %v5261_v50 = vpop.permute.xlu1 %710  ;;  %v5263_v51 = vpop.permute.xlu0 %700  ;;  %4439 = vmatmul.msk.bf16.gmra.mxu0 %vm528_vm0, %v4700_v47 }
  0x8e   : > { %v5299_v22 = vpop.permute.xlu2 %755 }
  0x8f   : > { %6592 = vst [vmem:[#allocation11_spill] sm:$0xff] %v5299_v22 }
  0x95   : > { %v5271_v54 = vpop.permute.xlu1 %715  ;;  %v5273_v55 = vpop.permute.xlu0 %705 }
  0x96   : > { %6587 = vst [vmem:[#allocation6_spill] sm:$0xff] %v5271_v54  ;;  %v5324_v47 = vpop.permute.xlu2 %760 }
  0x97   : > { %6588 = vst [vmem:[#allocation7_spill] sm:$0xff] %v5273_v55 }
  0x9a   : > { %v586_v57 = vpop.f32.mrf.mxu0 }
  0x9b   : > { %v587_v62 = vadd.f32 %v5279_v58, %v586_v57 }
  0x9d   : > { %v5281_v59 = vpop.permute.xlu1 %735  ;;  %v5283_v60 = vpop.permute.xlu0 %730  ;;  %4440 = vmatmul.msk.bf16.gmra.mxu0 %vm528_vm0, %v4701_v56  ;;  %v666_v1 = vmax.f32 %v587_v62, 0.0 }
  0x9e   : > { %6589 = vst [vmem:[#allocation8_spill] sm:$0xff] %v5281_v59 }
  0x9f   : > { %v651_v63 = vpop.f32.mrf.mxu2  ;;  %v5296_v19 = vmul.f32 %v5263_v51, %v666_v1 }
  0xa0   : > { %v652_v15 = vadd.f32 %v5279_v58, %v651_v63 }
  0xa1   : > { %6591 = vst [vmem:[#allocation10_spill] sm:$0xff] %v5296_v19 }
  0xa2   : > { %v588_v0 = vpop.f32.mrf.mxu0  ;;  %v692_v30 = vmax.f32 %v652_v15, 0.0 }
  0xa3   : > { %v589_v2 = vadd.f32 %v5279_v58, %v588_v0 }
  0xa5   : > { %v667_v6 = vmax.f32 %v589_v2, 0.0  ;;  %v5290_v7 = vpop.permute.xlu1 %750  ;;  %v5292_v14 = vpop.permute.xlu0 %745 }
  0xa6   : > { %6590 = vst [vmem:[#allocation9_spill] sm:$0xff] %v5292_v14 }
  0xa7   : > { %v859_v20 = vmul.f32 %v5273_v55, %v667_v6  ;;  %v653_v23 = vpop.f32.mrf.mxu2 }
  0xa8   : > { %v654_v24 = vadd.f32 %v5279_v58, %v653_v23  ;;  %v4703_v23 = vld [vmem:[%s5124_s8 + $0x50] sm:$0xff] }
  0xa9   : > { %v5303_v26 = vpack.c.bf16 %v859_v20, %v5296_v19  ;;  %v2312_v43 = vpack.c.bf16 %v859_v20, %v859_v20 }
  0xaa   : > { %v591_v32 = vpop.f32.mrf.mxu0  ;;  %v693_v37 = vmax.f32 %v654_v24, 0.0 }
  0xab   : > { %6593 = vst [vmem:[#allocation12_spill] sm:$0xff] %v5303_v26  ;;  %4456 = vmatmul.msk.bf16.vlgmr.msra.gmra.mxu1 %vm528_vm0, %v5303_v26  ;;  %v592_v44 = vadd.f32 %v5279_v58, %v591_v32  ;;  %v2333_v52 = vsel %vm2331_vm1, %v2312_v43, 0 }
  0xad   : > { %v5308_v38 = vpop.permute.xlu1 %835  ;;  %v5310_v40 = vpop.permute.xlu0 %830  ;;  %4441 = vmatmul.msk.bf16.gmra.mxu0 %vm528_vm0, %v4702_v29  ;;  %v668_v56 = vmax.f32 %v592_v44, 0.0 }
  0xae   : > { %6594 = vst [vmem:[#allocation13_spill] sm:$0xff] %v5308_v38  ;;  %v5314_v41 = vmul.f32 %v5308_v38, %v693_v37  ;;  %v5317_v42 = vmul.f32 %v5310_v40, %v692_v30  ;;  %v5349_v37 = vpop.permute.xlu2 %845  ;;  %v4704_v38 = vld [vmem:[%s5124_s8 + $0x58] sm:$0xff] }
  0xaf   : > { %6595 = vst [vmem:[#allocation14_spill] sm:$0xff] %v5310_v40  ;;  %v656_v46 = vpop.f32.mrf.mxu2  ;;  %v5332_v0 = vmul.f32 %v5261_v50, %v668_v56 }
  0xb0   : > { %6596 = vst [vmem:[#allocation15_spill] sm:$0xff] %v5317_v42  ;;  %v5322_v45 = vpack.c.bf16 %v5314_v41, %v5317_v42  ;;  %v657_v63 = vadd.f32 %v5279_v58, %v656_v46 }
  0xb1   : > { %6598 = vst [vmem:[#allocation17_spill] sm:$0xff] %v5332_v0 }
  0xb2   : > { %6597 = vst [vmem:[#allocation16_spill] sm:$0xff] %v5322_v45  ;;  %v593_v49 = vpop.f32.mrf.mxu0  ;;  %4469 = vmatmul.msk.bf16.vlgmr.msrb.gmra.mxu2 %vm528_vm0, %v5322_v45  ;;  %v694_v24 = vmax.f32 %v657_v63, 0.0 }
  0xb3   : > { %v594_v57 = vadd.f32 %v5279_v58, %v593_v49  ;;  %2342 = vmatpush.bf16.msrb.mxu2 %v2333_v52  ;;  %6602 = vst [vmem:[#allocation21_spill] sm:$0xff] %v5349_v37 }
  0xb5   : > { %v669_v62 = vmax.f32 %v594_v57, 0.0  ;;  %v5337_v2 = vpop.permute.xlu0 %765  ;;  %v5345_v30 = vpop.permute.xlu1 %840 }
  0xb6   : > { %6599 = vst [vmem:[#allocation18_spill] sm:$0xff] %v5337_v2  ;;  %v5356_v44 = vmul.f32 %v5345_v30, %v694_v24 }
  0xb7   : > { %v5335_v1 = vmul.f32 %v5271_v54, %v669_v62  ;;  %v658_v6 = vpop.f32.mrf.mxu2  ;;  %6601 = vst [vmem:[#allocation20_spill] sm:$0xff] %v5345_v30 }
  0xb8   : > { %v659_v15 = vadd.f32 %v5279_v58, %v658_v6  ;;  %6603 = vst [vmem:[#allocation22_spill] sm:$0xff] %v5356_v44 }
  0xb9   : > { %v5342_v20 = vpack.c.bf16 %v5335_v1, %v5332_v0 }
  0xba   : > { %v596_v29 = vpop.f32.mrf.mxu0  ;;  %v695_v32 = vmax.f32 %v659_v15, 0.0 }
  0xbb   : > { %6600 = vst [vmem:[#allocation19_spill] sm:$0xff] %v5342_v20  ;;  %4457 = vmatmul.msk.bf16.gmra.mxu1 %vm528_vm0, %v5342_v20  ;;  %v597_v46 = vadd.f32 %v5279_v58, %v596_v29 }
  0xbc   : > { %v5352_v43 = vmul.f32 %v5349_v37, %v695_v32 }
  0xbd   : > { %4442 = vmatmul.msk.bf16.gmra.mxu0 %vm528_vm0, %v4703_v23  ;;  %v5363_v56 = vpop.permute.xlu0 %770  ;;  %v670_v62 = vmax.f32 %v597_v46, 0.0 }
  0xbe   : > { %v5361_v52 = vpack.c.bf16 %v5352_v43, %v5356_v44 }
  0xbf   : > { %v661_v49 = vpop.f32.mrf.mxu2  ;;  %v5370_v23 = vmul.f32 %v5256_v48, %v670_v62  ;;  %v5385_v62 = vpop.permute.xlu2 %850 }
  0xc0   : > { %6604 = vst [vmem:[#allocation23_spill] sm:$0xff] %v5361_v52  ;;  %v662_v15 = vadd.f32 %v5279_v58, %v661_v49 }
  0xc1   : > { %6605 = vst [vmem:[#allocation24_spill] sm:$0xff] %v5370_v23 }
  0xc2   : > { %v598_v57 = vpop.f32.mrf.mxu0  ;;  %4470 = vmatmul.msk.bf16.gmra.mxu2 %vm528_vm0, %v5361_v52  ;;  %v696_v46 = vmax.f32 %v662_v15, 0.0  ;;  %6608 = vst [vmem:[#allocation27_spill] sm:$0xff] %v5385_v62 }
  0xc3   : > { %v599_v63 = vadd.f32 %v5279_v58, %v598_v57 }
  0xc5   : > { %v671_v6 = vmax.f32 %v599_v63, 0.0  ;;  %v5383_v49 = vpop.permute.xlu0 %855 }
  0xc6   : > { %6607 = vst [vmem:[#allocation26_spill] sm:$0xff] %v5383_v49 }
  0xc7   : > { %v5373_v24 = vmul.f32 %v5269_v53, %v671_v6  ;;  %v663_v29 = vpop.f32.mrf.mxu2  ;;  %v5392_v6 = vmul.f32 %v5385_v62, %v696_v46  ;;  %v4705_v46 = vld [vmem:[%s5124_s8 + $0x60] sm:$0xff]  ;;  %s304_s8 = sand.u32 1, %s5008_s25  }
  0xc8   : > { %v664_v32 = vadd.f32 %v5279_v58, %v663_v29  ;;  %s4352_s13 = sshll.u32 %s304_s8, 4  ;;  %s4250_s20 = scalar_lea.sflag [#allocation3], %s304_s8 }
  0xc9   : > { %v5378_v37 = vpack.c.bf16 %v5373_v24, %v5370_v23  ;;  %6609 = vst [vmem:[#allocation28_spill] sm:$0xff] %v5392_v6  ;;  %s306_s16 = scalar_lea.vmem [#allocation2], %s4352_s13 }
  0xca   : > { %v601_v54 = vpop.f32.mrf.mxu0  ;;  %v697_v57 = vmax.f32 %v664_v32, 0.0  ;;  %s4262_s18 = sshll.u32 %s306_s16, 4  ;;  %s4263_s18 = int_to_ptr.vmem [resolvable:$true] %s4262_s18 }
  0xcb   : > { %6606 = vst [vmem:[#allocation25_spill] sm:$0xff] %v5378_v37  ;;  %4458 = vmatmul.msk.bf16.gmra.mxu1 %vm528_vm0, %v5378_v37  ;;  %v602_v15 = vadd.f32 %v5279_v58, %v601_v54 }
  0xcc   : > { %v5388_v63 = vmul.f32 %v5383_v49, %v697_v57 }
  0xcd   : > { %4443 = vmatmul.msk.bf16.gmra.mxu0 %vm528_vm0, %v4704_v38  ;;  %v672_v53 = vmax.f32 %v602_v15, 0.0 }
  0xce   : > { %v5397_v29 = vpack.c.bf16 %v5388_v63, %v5392_v6 }
  0xcf   : > { %v5403_v49 = vmul.f32 %v5283_v60, %v672_v53 }
  0xd0   : > { %6610 = vst [vmem:[#allocation29_spill] sm:$0xff] %v5397_v29 }
  0xd1   : > { %6611 = vst [vmem:[#allocation30_spill] sm:$0xff] %v5403_v49 }
  0xd2   : > { %v603_v32 = vpop.f32.mrf.mxu0  ;;  %4471 = vmatmul.msk.bf16.gmra.mxu2 %vm528_vm0, %v5397_v29 }
  0xd3   : > { %v604_v55 = vadd.f32 %v5279_v58, %v603_v32 }
  0xd5   : > { %v673_v57 = vmax.f32 %v604_v55, 0.0 }
  0xd7   : > { %v5406_v38 = vmul.f32 %v5281_v59, %v673_v57 }
  0xd9   : > { %v5410_v54 = vpack.c.bf16 %v5406_v38, %v5403_v49  ;;  %v5503_v49 = vpop.permute.xlu0 %790 }
  0xda   : > { %v606_v52 = vpop.f32.mrf.mxu0 }
  0xdb   : > { %6612 = vst [vmem:[#allocation31_spill] sm:$0xff] %v5410_v54  ;;  %4459 = vmatmul.msk.bf16.gmra.mxu1 %vm528_vm0, %v5410_v54  ;;  %v607_v15 = vadd.f32 %v5279_v58, %v606_v52 }
  0xdd   : > { %4444 = vmatmul.msk.bf16.gmra.mxu0 %vm528_vm0, %v4705_v46  ;;  %v674_v32 = vmax.f32 %v607_v15, 0.0 }
  0xdf   : > { %v5419_v57 = vmul.f32 %v5286_v61, %v674_v32 }
  0xe1   : > { %6613 = vst [vmem:[#allocation32_spill] sm:$0xff] %v5419_v57 }
  0xe2   : > { %v608_v55 = vpop.f32.mrf.mxu0 }
  0xe3   : > { %v609_v53 = vadd.f32 %v5279_v58, %v608_v55 }
  0xe5   : > { %v675_v29 = vmax.f32 %v609_v53, 0.0 }
  0xe7   : > { %v5422_v59 = vmul.f32 %v5292_v14, %v675_v29 }
  0xe9   : > { %v5426_v45 = vpack.c.bf16 %v5422_v59, %v5419_v57 }
  0xea   : > { %v611_v54 = vpop.f32.mrf.mxu0 }
  0xeb   : > { %6614 = vst [vmem:[#allocation33_spill] sm:$0xff] %v5426_v45  ;;  %4460 = vmatmul.msk.bf16.gmra.mxu1 %vm528_vm0, %v5426_v45  ;;  %v612_v52 = vadd.f32 %v5279_v58, %v611_v54 }
  0xed   : > { %v676_v15 = vmax.f32 %v612_v52, 0.0 }
  0xef   : > { %v5433_v32 = vmul.f32 %v5290_v7, %v676_v15 }
  0xf1   : > { %6615 = vst [vmem:[#allocation34_spill] sm:$0xff] %v5433_v32 }
  0xf2   : > { %v613_v46 = vpop.f32.mrf.mxu0 }
  0xf3   : > { %v614_v55 = vadd.f32 %v5279_v58, %v613_v46 }
  0xf5   : > { %v677_v53 = vmax.f32 %v614_v55, 0.0 }
  0xf7   : > { %v5436_v29 = vmul.f32 %v5299_v22, %v677_v53 }
  0xf9   : > { %v5440_v14 = vpack.c.bf16 %v5436_v29, %v5433_v32 }
  0xfa   : > { %v616_v37 = vpop.f32.mrf.mxu0 }
  0xfb   : > { %6616 = vst [vmem:[#allocation35_spill] sm:$0xff] %v5440_v14  ;;  %4461 = vmatmul.msk.bf16.gmra.mxu1 %vm528_vm0, %v5440_v14  ;;  %v617_v54 = vadd.f32 %v5279_v58, %v616_v37 }
  0xfd   : > { %v678_v45 = vmax.f32 %v617_v54, 0.0 }
  0xff   : > { %v5447_v15 = vmul.f32 %v5324_v47, %v678_v45  ;;  %v5460_v45 = vpop.permute.xlu1 %775 }
 0x100   : > { %6619 = vst [vmem:[#allocation38_spill] sm:$0xff] %v5460_v45 }
 0x101   : > { %6617 = vst [vmem:[#allocation36_spill] sm:$0xff] %v5447_v15 }
 0x102   : > { %v618_v52 = vpop.f32.mrf.mxu0 }
 0x103   : > { %v619_v46 = vadd.f32 %v5279_v58, %v618_v52 }
 0x105   : > { %v679_v55 = vmax.f32 %v619_v46, 0.0 }
 0x107   : > { %v5450_v53 = vmul.f32 %v5337_v2, %v679_v55  ;;  %v5478_v6 = vpop.permute.xlu1 %780 }
 0x109   : > { %v5454_v22 = vpack.c.bf16 %v5450_v53, %v5447_v15 }
 0x10a   : > { %v621_v20 = vpop.f32.mrf.mxu0 }
 0x10b   : > { %6618 = vst [vmem:[#allocation37_spill] sm:$0xff] %v5454_v22  ;;  %4462 = vmatmul.msk.bf16.gmra.mxu1 %vm528_vm0, %v5454_v22  ;;  %v622_v37 = vadd.f32 %v5279_v58, %v621_v20 }
 0x10d   : > { %v680_v14 = vmax.f32 %v622_v37, 0.0 }
 0x10f   : > { %v5463_v55 = vmul.f32 %v5363_v56, %v680_v14  ;;  %v5476_v14 = vpop.permute.xlu2 %785  ;;  %v5501_v19 = vpop.permute.xlu1 %795 }
 0x110   : > { %6622 = vst [vmem:[#allocation41_spill] sm:$0xff] %v5476_v14 }
 0x111   : > { %6620 = vst [vmem:[#allocation39_spill] sm:$0xff] %v5463_v55 }
 0x112   : > { %v623_v54 = vpop.f32.mrf.mxu0  ;;  %6626 = vst [vmem:[#allocation45_spill] sm:$0xff] %v5501_v19 }
 0x113   : > { %v624_v52 = vadd.f32 %v5279_v58, %v623_v54 }
 0x115   : > { %v681_v46 = vmax.f32 %v624_v52, 0.0 }
 0x117   : > { %v5466_v2 = vmul.f32 %v5460_v45, %v681_v46 }
 0x119   : > { %v5470_v26 = vpack.c.bf16 %v5466_v2, %v5463_v55 }
 0x11a   : > { %v626_v22 = vpop.f32.mrf.mxu0 }
 0x11b   : > { %6621 = vst [vmem:[#allocation40_spill] sm:$0xff] %v5470_v26  ;;  %4463 = vmatmul.msk.bf16.gmra.mxu1 %vm528_vm0, %v5470_v26  ;;  %v627_v20 = vadd.f32 %v5279_v58, %v626_v22 }
 0x11d   : > { %v682_v54 = vmax.f32 %v627_v20, 0.0  ;;  %v5493_v20 = vld [vmem:[%s6522_s4 + $0x1] ss:$0 sm:$0xff] }
 0x11f   : > { %v5481_v46 = vmul.f32 %v5478_v6, %v682_v54 }
 0x121   : > { %6623 = vst [vmem:[#allocation42_spill] sm:$0xff] %v5481_v46 }
 0x122   : > { %v628_v37 = vpop.f32.mrf.mxu0 }
 0x123   : > { %v629_v52 = vadd.f32 %v5279_v58, %v628_v37 }
 0x125   : > { %v683_v44 = vmax.f32 %v629_v52, 0.0 }
 0x127   : > { %v5484_v45 = vmul.f32 %v5476_v14, %v683_v44 }
 0x128   : > { %v976_v42 = vpop.f32.mrf.mxu1 }
 0x129   : > { %6624 = vst [vmem:[#allocation43_spill] sm:$0xff] %v5484_v45  ;;  %v5488_v26 = vpack.c.bf16 %v5484_v45, %v5481_v46  ;;  %v977_v37 = vadd.f32 %v5493_v20, %v976_v42 }
 0x12a   : > { %v631_v22 = vpop.f32.mrf.mxu0 }
 0x12b   : > { %6625 = vst [vmem:[#allocation44_spill] sm:$0xff] %v5488_v26  ;;  %4464 = vmatmul.msk.bf16.gmra.mxu1 %vm528_vm0, %v5488_v26  ;;  %v632_v54 = vadd.f32 %v5279_v58, %v631_v22  ;;  %v1056_v55 = vmax.f32 %v977_v37, 0.0  ;;  %v2325_v22 = vpack.c.bf16 %v5314_v41, %v5314_v41 }
 0x12d   : > { %v684_v46 = vmax.f32 %v632_v54, 0.0 }
 0x12f   : > { %v5506_v26 = vmul.f32 %v5503_v49, %v684_v46 }
 0x130   : > { %v978_v44 = vpop.f32.mrf.mxu1 }
 0x131   : > { %v979_v52 = vadd.f32 %v5493_v20, %v978_v44  ;;  %6627 = vst [vmem:[#allocation46_spill] sm:$0xff] %v5506_v26 }
 0x132   : > { %v633_v14 = vpop.f32.mrf.mxu0 }
 0x133   : > { %v1057_v15 = vmax.f32 %v979_v52, 0.0  ;;  %v634_v32 = vadd.f32 %v5279_v58, %v633_v14  ;;  %v2580_v14 = vsel %vm2331_vm1, %v2325_v22, 0 }
 0x135   : > { %v1088_v57 = vpack.c.bf16 %v1057_v15, %v1056_v55  ;;  %v685_v62 = vmax.f32 %v634_v32, 0.0 }
 0x137   : > { %v877_v42 = vmul.f32 %v5501_v19, %v685_v62  ;;  %4480 = vmatmul.msk.bf16.vlgmr.msra.gmra.mxu2 %vm528_vm0, %v1088_v57 }
 0x138   : > { %v981_v37 = vpop.f32.mrf.mxu1 }
 0x139   : > { %v5513_v54 = vpack.c.bf16 %v877_v42, %v5506_v26  ;;  %v2321_v15 = vpack.c.bf16 %v877_v42, %v877_v42  ;;  %v982_v62 = vadd.f32 %v5493_v20, %v981_v37 }
 0x13a   : > { %v636_v32 = vpop.f32.mrf.mxu0 }
 0x13b   : > { %6628 = vst [vmem:[#allocation47_spill] sm:$0xff] %v5513_v54  ;;  %4465 = vmatmul.msk.bf16.gmra.mxu1 %vm528_vm0, %v5513_v54  ;;  %v2504_v55 = vsel %vm2331_vm1, %v2321_v15, 0  ;;  %v637_v57 = vadd.f32 %v5279_v58, %v636_v32  ;;  %v1058_v52 = vmax.f32 %v982_v62, 0.0  ;;  %v5523_v15 = vpop.permute.xlu2 %800 }
 0x13c   : > { %2513 = vmatpush.bf16.msrb.mxu0 %v2504_v55  ;;  %v5525_v55 = vpop.permute.xlu0 %805 }
 0x13d   : > { %v686_v42 = vmax.f32 %v637_v57, 0.0  ;;  %6629 = vst [vmem:[#allocation48_spill] sm:$0xff] %v5525_v55 }
 0x13f   : > { %v5528_v22 = vmul.f32 %v5523_v15, %v686_v42 }
 0x140   : > { %2589 = vmatpush.bf16.msra.mxu0 %v2580_v14  ;;  %v983_v41 = vpop.f32.mrf.mxu1  ;;  %v2326_v14 = vpack.c.bf16 %v5352_v43, %v5352_v43 }
 0x141   : > { %v984_v46 = vadd.f32 %v5493_v20, %v983_v41  ;;  %6630 = vst [vmem:[#allocation49_spill] sm:$0xff] %v5528_v22 }
 0x142   : > { %v638_v44 = vpop.f32.mrf.mxu0  ;;  %v2599_v41 = vsel %vm2331_vm1, %v2326_v14, 0 }
 0x143   : > { %v1059_v19 = vmax.f32 %v984_v46, 0.0  ;;  %v639_v26 = vadd.f32 %v5279_v58, %v638_v44 }
 0x145   : > { %v687_v54 = vmax.f32 %v639_v26, 0.0  ;;  %v1089_v30 = vpack.c.bf16 %v1059_v19, %v1058_v52 }
 0x147   : > { %v879_v37 = vmul.f32 %v5525_v55, %v687_v54  ;;  %4481 = vmatmul.msk.bf16.gmra.mxu2 %vm528_vm0, %v1089_v30 }
 0x148   : > { %v986_v32 = vpop.f32.mrf.mxu1 }
 0x149   : > { %v5535_v62 = vpack.c.bf16 %v879_v37, %v5528_v22  ;;  %v2322_v26 = vpack.c.bf16 %v879_v37, %v879_v37  ;;  %v987_v30 = vadd.f32 %v5493_v20, %v986_v32 }
 0x14a   : > { %v641_v19 = vpop.f32.mrf.mxu0 }
 0x14b   : > { %6631 = vst [vmem:[#allocation50_spill] sm:$0xff] %v5535_v62  ;;  %4466 = vmatmul.msk.bf16.gmra.mxu1 %vm528_vm0, %v5535_v62  ;;  %v2523_v57 = vsel %vm2331_vm1, %v2322_v26, 0  ;;  %v642_v54 = vadd.f32 %v5279_v58, %v641_v19  ;;  %v1060_v52 = vmax.f32 %v987_v30, 0.0  ;;  %v5545_v26 = vpop.permute.xlu2 %815 }
 0x14c   : > { %2532 = vmatpush.bf16.msrb.mxu1 %v2523_v57  ;;  %6632 = vst [vmem:[#allocation51_spill] sm:$0xff] %v5545_v26  ;;  %v5547_v57 = vpop.permute.xlu1 %810 }
 0x14d   : > { %v688_v42 = vmax.f32 %v642_v54, 0.0 }
 0x14f   : > { %v5550_v14 = vmul.f32 %v5547_v57, %v688_v42 }
 0x150   : > { %2608 = vmatpush.bf16.msra.mxu1 %v2599_v41  ;;  %v988_v46 = vpop.f32.mrf.mxu1 }
 0x151   : > { %v989_v43 = vadd.f32 %v5493_v20, %v988_v46  ;;  %6633 = vst [vmem:[#allocation52_spill] sm:$0xff] %v5550_v14 }
 0x152   : > { %v643_v44 = vpop.f32.mrf.mxu0 }
 0x153   : > { %v1061_v37 = vmax.f32 %v989_v43, 0.0  ;;  %v644_v55 = vadd.f32 %v5279_v58, %v643_v44 }
 0x154   : > { %v5564_v23 = vpop.permute.xlu1 %825 }
 0x155   : > { %v689_v62 = vmax.f32 %v644_v55, 0.0  ;;  %v1090_v22 = vpack.c.bf16 %v1061_v37, %v1060_v52  ;;  %6635 = vst [vmem:[#allocation54_spill] sm:$0xff] %v5564_v23 }
 0x157   : > { %v881_v32 = vmul.f32 %v5545_v26, %v689_v62  ;;  %4482 = vmatmul.msk.bf16.gmra.mxu2 %vm528_vm0, %v1090_v22 }
 0x158   : > { %v991_v19 = vpop.f32.mrf.mxu1 }
 0x159   : > { %v5555_v41 = vpack.c.bf16 %v881_v32, %v5550_v14  ;;  %v2323_v30 = vpack.c.bf16 %v881_v32, %v881_v32  ;;  %v992_v46 = vadd.f32 %v5493_v20, %v991_v19 }
 0x15a   : > { %v646_v54 = vpop.f32.mrf.mxu0 }
 0x15b   : > { %6634 = vst [vmem:[#allocation53_spill] sm:$0xff] %v5555_v41  ;;  %4467 = vmatmul.msk.bf16.gmra.mxu1 %vm528_vm0, %v5555_v41  ;;  %v2542_v55 = vsel %vm2331_vm1, %v2323_v30, 0  ;;  %v647_v43 = vadd.f32 %v5279_v58, %v646_v54  ;;  %v1062_v52 = vmax.f32 %v992_v46, 0.0  ;;  %v5566_v41 = vpop.permute.xlu0 %820 }
 0x15c   : > { %2551 = vmatpush.bf16.msra.mxu2 %v2542_v55  ;;  %6636 = vst [vmem:[#allocation55_spill] sm:$0xff] %v5566_v41 }
 0x15d   : > { %v690_v42 = vmax.f32 %v647_v43, 0.0 }
 0x15f   : > { %v5569_v30 = vmul.f32 %v5566_v41, %v690_v42 }
 0x160   : > { %v993_v44 = vpop.f32.mrf.mxu1 }
 0x161   : > { %v994_v62 = vadd.f32 %v5493_v20, %v993_v44  ;;  %6637 = vst [vmem:[#allocation56_spill] sm:$0xff] %v5569_v30 }
 0x162   : > { %v648_v22 = vpop.f32.mrf.mxu0 }
 0x163   : > { %v1063_v37 = vmax.f32 %v994_v62, 0.0  ;;  %v649_v32 = vadd.f32 %v5279_v58, %v648_v22 }
 0x165   : > { %v691_v26 = vmax.f32 %v649_v32, 0.0  ;;  %v1091_v14 = vpack.c.bf16 %v1063_v37, %v1062_v52  ;;  %v5585_v52 = vpop.f32.mrf.mxu2 }
 0x167   : > { %v5572_v19 = vmul.f32 %v5564_v23, %v691_v26  ;;  %4483 = vmatmul.msk.bf16.gmra.mxu2 %vm528_vm0, %v1091_v14 }
 0x168   : > { %v996_v54 = vpop.f32.mrf.mxu1 }
 0x169   : > { %6638 = vst [vmem:[#allocation57_spill] sm:$0xff] %v5572_v19  ;;  %v5577_v55 = vpack.c.bf16 %v5572_v19, %v5569_v30  ;;  %v997_v58 = vadd.f32 %v5493_v20, %v996_v54 }
 0x16b   : > { %6639 = vst [vmem:[#allocation58_spill] sm:$0xff] %v5577_v55  ;;  %4468 = vmatmul.msk.bf16.gmra.mxu1 %vm528_vm0, %v5577_v55  ;;  %v1064_v44 = vmax.f32 %v997_v58, 0.0 }
 0x170   : > { %v998_v46 = vpop.f32.mrf.mxu1 }
 0x171   : > { %v999_v43 = vadd.f32 %v5493_v20, %v998_v46  ;;  %v5589_v46 = vpop.f32.mrf.mxu2 }
 0x173   : > { %v1065_v62 = vmax.f32 %v999_v43, 0.0 }
 0x175   : > { %v1092_v22 = vpack.c.bf16 %v1065_v62, %v1064_v44 }
 0x177   : > { %4484 = vmatmul.msk.bf16.gmra.mxu2 %vm528_vm0, %v1092_v22 }
 0x178   : > { %v1001_v26 = vpop.f32.mrf.mxu1 }
 0x179   : > { %v1002_v14 = vadd.f32 %v5493_v20, %v1001_v26  ;;  %v5593_v26 = vpop.f32.mrf.mxu2 }
 0x17b   : > { %v1066_v32 = vmax.f32 %v1002_v14, 0.0 }
 0x180   : > { %v1003_v42 = vpop.f32.mrf.mxu1 }
 0x181   : > { %v1004_v37 = vadd.f32 %v5493_v20, %v1003_v42  ;;  %v5596_v42 = vpop.f32.mrf.mxu2 }
 0x183   : > { %v1067_v23 = vmax.f32 %v1004_v37, 0.0 }
 0x185   : > { %v1093_v55 = vpack.c.bf16 %v1067_v23, %v1066_v32 }
 0x187   : > { %4485 = vmatmul.msk.bf16.gmra.mxu2 %vm528_vm0, %v1093_v55 }
 0x188   : > { %v1006_v54 = vpop.f32.mrf.mxu1 }
 0x189   : > { %v1007_v58 = vadd.f32 %v5493_v20, %v1006_v54 }
 0x18b   : > { %v1068_v62 = vmax.f32 %v1007_v58, 0.0  ;;  %v5601_v58 = vpop.f32.mrf.mxu2 }
 0x190   : > { %v1008_v43 = vpop.f32.mrf.mxu1 }
 0x191   : > { %v1009_v44 = vadd.f32 %v5493_v20, %v1008_v43 }
 0x193   : > { %v1069_v22 = vmax.f32 %v1009_v44, 0.0 }
 0x195   : > { %v1094_v30 = vpack.c.bf16 %v1069_v22, %v1068_v62  ;;  %v5605_v22 = vpop.f32.mrf.mxu2 }
 0x197   : > { %4486 = vmatmul.msk.bf16.gmra.mxu2 %vm528_vm0, %v1094_v30 }
 0x198   : > { %v1011_v14 = vpop.f32.mrf.mxu1 }
 0x199   : > { %v1012_v23 = vadd.f32 %v5493_v20, %v1011_v14 }
 0x19b   : > { %v1070_v32 = vmax.f32 %v1012_v23, 0.0 }
 0x1a0   : > { %v1013_v55 = vpop.f32.mrf.mxu1 }
 0x1a1   : > { %v1014_v37 = vadd.f32 %v5493_v20, %v1013_v55 }
 0x1a3   : > { %v1071_v54 = vmax.f32 %v1014_v37, 0.0 }
 0x1a5   : > { %v1095_v19 = vpack.c.bf16 %v1071_v54, %v1070_v32 }
 0x1a7   : > { %4487 = vmatmul.msk.bf16.gmra.mxu2 %vm528_vm0, %v1095_v19  ;;  %v5612_v19 = vld [vmem:[%s6522_s4 + $0x2] ss:$0 sm:$0xff] }
 0x1a8   : > { %v1016_v43 = vpop.f32.mrf.mxu1 }
 0x1a9   : > { %v1017_v44 = vadd.f32 %v5493_v20, %v1016_v43 }
 0x1ab   : > { %v1072_v40 = vmax.f32 %v1017_v44, 0.0 }
 0x1b0   : > { %v1018_v62 = vpop.f32.mrf.mxu1 }
 0x1b1   : > { %v1019_v30 = vadd.f32 %v5493_v20, %v1018_v62 }
 0x1b3   : > { %v1073_v14 = vmax.f32 %v1019_v30, 0.0 }
 0x1b5   : > { %v1096_v45 = vpack.c.bf16 %v1073_v14, %v1072_v40 }
 0x1b7   : > { %4488 = vmatmul.msk.bf16.gmra.mxu2 %vm528_vm0, %v1096_v45 }
 0x1b8   : > { %v1021_v23 = vpop.f32.mrf.mxu1 }
 0x1b9   : > { %v1022_v37 = vadd.f32 %v5493_v20, %v1021_v23 }
 0x1ba   : > { %v1174_v55 = vpop.f32.mrf.mxu2 }
 0x1bb   : > { %v1074_v62 = vmax.f32 %v1022_v37, 0.0  ;;  %v1175_v40 = vadd.f32 %v5612_v19, %v1174_v55 }
 0x1bd   : > { %v1254_v14 = vmul.f32 %v1175_v40, %v5130_v4 }
 0x1c0   : > { %v1023_v32 = vpop.f32.mrf.mxu1 }
 0x1c1   : > { %v1024_v54 = vadd.f32 %v5493_v20, %v1023_v32 }
 0x1c2   : > { %v1176_v43 = vpop.f32.mrf.mxu2 }
 0x1c3   : > { %v1075_v0 = vmax.f32 %v1024_v54, 0.0  ;;  %v1177_v44 = vadd.f32 %v5612_v19, %v1176_v43 }
 0x1c5   : > { %v1097_v45 = vpack.c.bf16 %v1075_v0, %v1074_v62  ;;  %v1255_v30 = vmul.f32 %v1177_v44, %v5146_v9 }
 0x1c7   : > { %4489 = vmatmul.msk.bf16.gmra.mxu2 %vm528_vm0, %v1097_v45  ;;  %4496 = vmatpush.xpose.msk.msra.mxu3 %vm1398_vm2, %v1255_v30 }
 0x1c8   : > { %v1026_v23 = vpop.f32.mrf.mxu1 }
 0x1c9   : > { %v1027_v37 = vadd.f32 %v5493_v20, %v1026_v23 }
 0x1ca   : > { %v1179_v41 = vpop.f32.mrf.mxu2  ;;  %4497 = vmatmul.msk.f32.vlgmr.msra.gmra.mxu3 %vm1398_vm2, %v1254_v14 }
 0x1cb   : > { %v1076_v43 = vmax.f32 %v1027_v37, 0.0  ;;  %v1180_v62 = vadd.f32 %v5612_v19, %v1179_v41 }
 0x1cd   : > { %v1256_v4 = vmul.f32 %v1180_v62, %v5127_v3 }
 0x1d0   : > { %v1028_v32 = vpop.f32.mrf.mxu1 }
 0x1d1   : > { %v1029_v54 = vadd.f32 %v5493_v20, %v1028_v32 }
 0x1d2   : > { %v1181_v55 = vpop.f32.mrf.mxu2 }
 0x1d3   : > { %v1077_v0 = vmax.f32 %v1029_v54, 0.0  ;;  %v1182_v9 = vadd.f32 %v5612_v19, %v1181_v55 }
 0x1d5   : > { %v1098_v44 = vpack.c.bf16 %v1077_v0, %v1076_v43  ;;  %v1257_v45 = vmul.f32 %v1182_v9, %v5143_v8 }
 0x1d7   : > { %4490 = vmatmul.msk.bf16.gmra.mxu2 %vm528_vm0, %v1098_v44  ;;  %4498 = vmatpush.xpose.msk.msrb.mxu3 %vm1398_vm2, %v1257_v45 }
 0x1d8   : > { %v1031_v40 = vpop.f32.mrf.mxu1 }
 0x1d9   : > { %v1032_v14 = vadd.f32 %v5493_v20, %v1031_v40 }
 0x1da   : > { %v1184_v30 = vpop.f32.mrf.mxu2  ;;  %4499 = vmatmul.msk.f32.vlgmr.msrb.gmra.mxu3 %vm1398_vm2, %v1256_v4 }
 0x1db   : > { %v1078_v41 = vmax.f32 %v1032_v14, 0.0  ;;  %v1185_v55 = vadd.f32 %v5612_v19, %v1184_v30 }
 0x1dd   : > { %v1258_v3 = vmul.f32 %v1185_v55, %v5133_v5 }
 0x1e0   : > { %v1033_v23 = vpop.f32.mrf.mxu1 }
 0x1e1   : > { %v1034_v37 = vadd.f32 %v5493_v20, %v1033_v23 }
 0x1e2   : > { %v1186_v32 = vpop.f32.mrf.mxu2 }
 0x1e3   : > { %v1079_v54 = vmax.f32 %v1034_v37, 0.0  ;;  %v1187_v8 = vadd.f32 %v5612_v19, %v1186_v32 }
 0x1e5   : > { %v1099_v43 = vpack.c.bf16 %v1079_v54, %v1078_v41  ;;  %v1259_v0 = vmul.f32 %v1187_v8, %v5154_v10  ;;  %v1044_v54 = vadd.f32 %v5493_v20, %v5589_v46  ;;  %v1042_v8 = vadd.f32 %v5493_v20, %v5585_v52 }
 0x1e6   : > { %v1049_v52 = vadd.f32 %v5493_v20, %v5596_v42 }
 0x1e7   : > { %4491 = vmatmul.msk.bf16.gmra.mxu2 %vm528_vm0, %v1099_v43  ;;  %4500 = vmatpush.xpose.msk.msra.mxu3 %vm1398_vm2, %v1259_v0  ;;  %v1083_v55 = vmax.f32 %v1044_v54, 0.0  ;;  %v1082_v0 = vmax.f32 %v1042_v8, 0.0 }
 0x1e8   : > { %v1036_v9 = vpop.f32.mrf.mxu1 }
 0x1e9   : > { %v1037_v44 = vadd.f32 %v5493_v20, %v1036_v9  ;;  %v1101_v9 = vpack.c.bf16 %v1083_v55, %v1082_v0 }
 0x1ea   : > { %v1189_v62 = vpop.f32.mrf.mxu2  ;;  %4501 = vmatmul.msk.f32.vlgmr.msra.gmra.mxu3 %vm1398_vm2, %v1258_v3 }
 0x1eb   : > { %v1080_v30 = vmax.f32 %v1037_v44, 0.0  ;;  %v1190_v23 = vadd.f32 %v5612_v19, %v1189_v62  ;;  %v1047_v44 = vadd.f32 %v5493_v20, %v5593_v26  ;;  %v1054_v26 = vadd.f32 %v5493_v20, %v5605_v22 }
 0x1ed   : > { %v1260_v5 = vmul.f32 %v1190_v23, %v5163_v12  ;;  %v1052_v23 = vadd.f32 %v5493_v20, %v5601_v58 }
 0x1f0   : > { %v1038_v45 = vpop.f32.mrf.mxu1 }
 0x1f1   : > { %v1039_v4 = vadd.f32 %v5493_v20, %v1038_v45  ;;  %v1085_v45 = vmax.f32 %v1049_v52, 0.0 }
 0x1f2   : > { %v1191_v40 = vpop.f32.mrf.mxu2 }
 0x1f3   : > { %v1081_v14 = vmax.f32 %v1039_v4, 0.0  ;;  %v1192_v10 = vadd.f32 %v5612_v19, %v1191_v40  ;;  %v1084_v40 = vmax.f32 %v1047_v44, 0.0 }
 0x1f5   : > { %v1100_v37 = vpack.c.bf16 %v1081_v14, %v1080_v30  ;;  %v1261_v32 = vmul.f32 %v1192_v10, %v5160_v11  ;;  %v1102_v14 = vpack.c.bf16 %v1085_v45, %v1084_v40 }
 0x1f7   : > { %4492 = vmatmul.msk.bf16.gmra.mxu2 %vm528_vm0, %v1100_v37  ;;  %4502 = vmatpush.xpose.msk.msrb.mxu3 %vm1398_vm2, %v1261_v32  ;;  %v1087_v37 = vmax.f32 %v1054_v26, 0.0 }
 0x1fa   : > { %v1194_v41 = vpop.f32.mrf.mxu2  ;;  %4503 = vmatmul.msk.f32.vlgmr.msrb.gmra.mxu3 %vm1398_vm2, %v1260_v5  ;;  %v1086_v5 = vmax.f32 %v1052_v23, 0.0 }
 0x1fb   : > { %v1195_v3 = vadd.f32 %v5612_v19, %v1194_v41 }
 0x1fc   : > { %v1103_v54 = vpack.c.bf16 %v1087_v37, %v1086_v5 }
 0x1fd   : > { %v1262_v12 = vmul.f32 %v1195_v3, %v5166_v13 }
 0x202   : > { %v1196_v43 = vpop.f32.mrf.mxu2 }
 0x203   : > { %v1197_v11 = vadd.f32 %v5612_v19, %v1196_v43 }
 0x205   : > { %v1263_v62 = vmul.f32 %v1197_v11, %v5179_v17  ;;  %v4795_v11 = vld [vmem:[%s5151_s14] ss:$0 sm:$0xff] }
 0x207   : > { %4493 = vmatmul.msk.bf16.gmra.mxu2 %vm528_vm0, %v1101_v9  ;;  %4504 = vmatpush.xpose.msk.msra.mxu3 %vm1398_vm2, %v1263_v62  ;;  %v1350_v62 = vmul.f32 %v4795_v11, %v5263_v51 }
 0x20a   : > { %v1199_v46 = vpop.f32.mrf.mxu2  ;;  %4505 = vmatmul.msk.f32.vlgmr.msra.gmra.mxu3 %vm1398_vm2, %v1262_v12 }
 0x20b   : > { %v1200_v30 = vadd.f32 %v5612_v19, %v1199_v46  ;;  %v1366_v46 = vsub.f32 1.0, %v1350_v62 }
 0x20d   : > { %v1264_v13 = vmul.f32 %v1200_v30, %v5176_v16  ;;  %v1382_v52 = vmul.f32 -1e+20, %v1366_v46 }
 0x212   : > { %v1201_v4 = vpop.f32.mrf.mxu2 }
 0x213   : > { %v1202_v17 = vadd.f32 %v5612_v19, %v1201_v4  ;;  %v4784_v4 = vld [vmem:[%s5151_s14 + $0x1] ss:$0 sm:$0xff] }
 0x215   : > { %v1265_v10 = vmul.f32 %v1202_v17, %v5182_v18 }
 0x217   : > { %4494 = vmatmul.msk.bf16.gmra.mxu2 %vm528_vm0, %v1102_v14  ;;  %4506 = vmatpush.xpose.msk.msrb.mxu3 %vm1398_vm2, %v1265_v10 }
 0x21a   : > { %v1204_v42 = vpop.f32.mrf.mxu2  ;;  %4507 = vmatmul.msk.f32.vlgmr.msrb.gmra.mxu3 %vm1398_vm2, %v1264_v13 }
 0x21b   : > { %v1205_v41 = vadd.f32 %v5612_v19, %v1204_v42 }
 0x21d   : > { %v1266_v22 = vmul.f32 %v1205_v41, %v5190_v21 }
 0x222   : > { %v1206_v32 = vpop.f32.mrf.mxu2 }
 0x223   : > { %v1207_v18 = vadd.f32 %v5612_v19, %v1206_v32 }
 0x225   : > { %v1267_v16 = vmul.f32 %v1207_v18, %v5199_v25 }
 0x227   : > { %4495 = vmatmul.msk.bf16.gmra.mxu2 %vm528_vm0, %v1103_v54  ;;  %4508 = vmatpush.xpose.msk.msra.mxu3 %vm1398_vm2, %v1267_v16 }
 0x22a   : > { %v1209_v8 = vpop.f32.mrf.mxu2  ;;  %4509 = vmatmul.msk.f32.vlgmr.msra.gmra.mxu3 %vm1398_vm2, %v1266_v22 }
 0x22b   : > { %v1210_v55 = vadd.f32 %v5612_v19, %v1209_v8 }
 0x22d   : > { %v1268_v25 = vmul.f32 %v1210_v55, %v5207_v28 }
 0x232   : > { %v1211_v20 = vpop.f32.mrf.mxu2 }
 0x233   : > { %v1212_v58 = vadd.f32 %v5612_v19, %v1211_v20  ;;  %v4796_v20 = vld [vmem:[%s5151_s14 + $0x2] ss:$0 sm:$0xff] }
 0x235   : > { %v1269_v43 = vmul.f32 %v1212_v58, %v5204_v27 }
 0x237   : > { %4510 = vmatpush.xpose.msk.msrb.mxu3 %vm1398_vm2, %v1269_v43  ;;  %v1352_v43 = vmul.f32 %v4796_v20, %v5256_v48 }
 0x23a   : > { %v1214_v0 = vpop.f32.mrf.mxu2  ;;  %4511 = vmatmul.msk.f32.vlgmr.msrb.gmra.mxu3 %vm1398_vm2, %v1268_v25 }
 0x23b   : > { %v1215_v9 = vadd.f32 %v5612_v19, %v1214_v0 }
 0x23d   : > { %v1270_v27 = vmul.f32 %v1215_v9, %v5215_v31  ;;  %v1351_v31 = vmul.f32 %v4784_v4, %v5261_v50  ;;  %v4786_v4 = vld [vmem:[%s5151_s14 + $0x3] ss:$0 sm:$0xff] }
 0x23f   : > { %v1367_v23 = vsub.f32 1.0, %v1351_v31  ;;  %v1353_v31 = vmul.f32 %v4786_v4, %v5283_v60 }
 0x241   : > { %v1383_v41 = vmul.f32 -1e+20, %v1367_v23  ;;  %v1369_v23 = vsub.f32 1.0, %v1353_v31 }
 0x242   : > { %v1216_v21 = vpop.f32.mrf.mxu2 }
 0x243   : > { %v1217_v3 = vadd.f32 %v5612_v19, %v1216_v21 }
 0x245   : > { %v1271_v12 = vmul.f32 %v1217_v3, %v5219_v33  ;;  %v1368_v3 = vsub.f32 1.0, %v1352_v43 }
 0x247   : > { %4512 = vmatpush.xpose.msk.msra.mxu3 %vm1398_vm2, %v1271_v12 }
 0x24a   : > { %v1219_v28 = vpop.f32.mrf.mxu2  ;;  %4513 = vmatmul.msk.f32.vlgmr.msra.gmra.mxu3 %vm1398_vm2, %v1270_v27  ;;  %v1384_v27 = vmul.f32 -1e+20, %v1368_v3 }
 0x24b   : > { %v1220_v10 = vadd.f32 %v5612_v19, %v1219_v28 }
 0x24d   : > { %v1422_v44 = vpop.f32.mrf.mxu3  ;;  %v1272_v37 = vmul.f32 %v1220_v10, %v5227_v35 }
 0x24e   : > { %v5696_v45 = vadd.f32 %v1422_v44, %v1382_v52 }
 0x250   : > { %v1816_v40 = vsel %vm1815_vm3, %v5696_v45, -inf }
 0x251   : > { %2136 = vmax.xlane.f32.xlu2 %v1816_v40  ;;  %v1817_v17 = vrot.slane %v1816_v40, 4 }
 0x252   : > { %v1221_v33 = vpop.f32.mrf.mxu2 }
 0x253   : > { %v1818_v30 = vmax.f32 %v1816_v40, %v1817_v17  ;;  %v1222_v14 = vadd.f32 %v5612_v19, %v1221_v33 }
 0x255   : > { %v1819_v13 = vrot.slane %v1818_v30, 2  ;;  %v1273_v42 = vmul.f32 %v1222_v14, %v5224_v34 }
 0x257   : > { %v1820_v26 = vmax.f32 %v1818_v30, %v1819_v13  ;;  %4514 = vmatpush.xpose.msk.msrb.mxu3 %vm1398_vm2, %v1273_v42  ;;  %v4944_v13 = vld [vmem:[%s5119_s23 + $0xb8] sm:$0xff] }
 0x259   : > { %v1821_v32 = vrot.slane %v1820_v26, 1 }
 0x25a   : > { %v1224_v5 = vpop.f32.mrf.mxu2  ;;  %4515 = vmatmul.msk.f32.vlgmr.msrb.gmra.mxu3 %vm1398_vm2, %v1272_v37  ;;  %v4945_v37 = vld [vmem:[%s5119_s23 + $0xb0] sm:$0xff] }
 0x25b   : > { %v1822_v18 = vmax.f32 %v1820_v26, %v1821_v32  ;;  %v1225_v55 = vadd.f32 %v5612_v19, %v1224_v5 }
 0x25d   : > { %v1928_v54 = vsub.f32 %v5696_v45, %v1822_v18  ;;  %v1448_v16 = vpop.f32.mrf.mxu3  ;;  %v1274_v21 = vmul.f32 %v1225_v55, %v5230_v36 }
 0x25e   : > { %v5709_v22 = vadd.f32 %v1448_v16, %v1383_v41 }
 0x25f   : > { %v1944_v8 = vmul.f32 1.442695, %v1928_v54  ;;  %v1385_v54 = vmul.f32 -1e+20, %v1369_v23 }
 0x260   : > { %v1823_v34 = vsel %vm1815_vm3, %v5709_v22, -inf }
 0x261   : > { %4808 = vpow2.f32 %v1944_v8  ;;  %2138 = vmax.xlane.f32.xlu0 %v1823_v34  ;;  %v1824_v44 = vrot.slane %v1823_v34, 4  ;;  %v2327_v8 = vpack.c.bf16 %v5388_v63, %v5388_v63 }
 0x262   : > { %v1226_v58 = vpop.f32.mrf.mxu2 }
 0x263   : > { %v1227_v35 = vadd.f32 %v5612_v19, %v1226_v58  ;;  %v1825_v30 = vmax.f32 %v1823_v34, %v1824_v44  ;;  %v2618_v43 = vsel %vm2331_vm1, %v2327_v8, 0 }
 0x265   : > { %v1275_v25 = vmul.f32 %v1227_v35, %v5239_v39  ;;  %v1826_v26 = vrot.slane %v1825_v30, 2 }
 0x267   : > { %v4809_v0 = vpop.eup %4808  ;;  %4516 = vmatpush.xpose.msk.msra.mxu3 %vm1398_vm2, %v1275_v25  ;;  %v1827_v41 = vmax.f32 %v1825_v30, %v1826_v26 }
 0x268   : > { %v1976_v11 = vsel %vm1815_vm3, %v4809_v0, 0.0 }
 0x269   : > { %v1977_v9 = vrot.slane %v1976_v11, 4  ;;  %v1828_v35 = vrot.slane %v1827_v41, 1 }
 0x26a   : > { %v1229_v62 = vpop.f32.mrf.mxu2  ;;  %4517 = vmatmul.msk.f32.vlgmr.msra.gmra.mxu3 %vm1398_vm2, %v1274_v21 }
 0x26b   : > { %v1978_v12 = vadd.f32 %v1977_v9, %v1976_v11  ;;  %v1230_v10 = vadd.f32 %v5612_v19, %v1229_v62  ;;  %v4797_v11 = vld [vmem:[%s5151_s14 + $0x4] ss:$0 sm:$0xff]  ;;  %v1829_v63 = vmax.f32 %v1827_v41, %v1828_v35 }
 0x26c   : > { %v1354_v62 = vmul.f32 %v4797_v11, %v5286_v61 }
 0x26d   : > { %v1979_v46 = vrot.slane %v1978_v12, 2  ;;  %v1474_v28 = vpop.f32.mrf.mxu3  ;;  %v1276_v32 = vmul.f32 %v4945_v37, %v1230_v10 }
 0x26e   : > { %v5722_v52 = vadd.f32 %v1474_v28, %v1384_v27  ;;  %v1370_v4 = vsub.f32 1.0, %v1354_v62 }
 0x26f   : > { %v1980_v39 = vadd.f32 %v1979_v46, %v1978_v12  ;;  %v4946_v12 = vld [vmem:[%s5119_s23 + $0xc8] sm:$0xff]  ;;  %v1929_v46 = vsub.f32 %v5709_v22, %v1829_v63 }
 0x270   : > { %v1830_v40 = vsel %vm1815_vm3, %v5722_v52, -inf }
 0x271   : > { %v1981_v36 = vrot.slane %v1980_v39, 1  ;;  %2140 = vmax.xlane.f32.xlu1 %v1830_v40  ;;  %v1831_v55 = vrot.slane %v1830_v40, 4 }
 0x272   : > { %v1231_v17 = vpop.f32.mrf.mxu2 }
 0x273   : > { %v1982_v33 = vadd.f32 %v1981_v36, %v1980_v39  ;;  %v1232_v14 = vadd.f32 %v5612_v19, %v1231_v17  ;;  %v1832_v21 = vmax.f32 %v1830_v40, %v1831_v55  ;;  %v4947_v39 = vld [vmem:[%s5119_s23 + $0xc0] sm:$0xff]  ;;  %v1946_v40 = vmul.f32 1.442695, %v1929_v46  ;;  %v4949_v55 = vld [vmem:[%s5119_s23 + $0xd0] sm:$0xff] }
 0x275   : > { %4810 = vrcp.f32 %v1982_v33  ;;  %v1277_v42 = vmul.f32 %v4944_v13, %v1232_v14  ;;  %v1833_v28 = vrot.slane %v1832_v21, 2  ;;  %v1386_v33 = vmul.f32 -1e+20, %v1370_v4  ;;  %v4787_v13 = vld [vmem:[%s5151_s14 + $0x5] ss:$0 sm:$0xff] }
 0x276   : > { %4812 = vpow2.f32 %v1946_v40 }
 0x277   : > { %4518 = vmatpush.xpose.msk.msrb.mxu3 %vm1398_vm2, %v1277_v42  ;;  %v1834_v17 = vmax.f32 %v1832_v21, %v1833_v28  ;;  %v4798_v28 = vld [vmem:[%s5151_s14 + $0x6] ss:$0 sm:$0xff] }
 0x279   : > { %v1835_v31 = vrot.slane %v1834_v17, 1 }
 0x27a   : > { %v1234_v5 = vpop.f32.mrf.mxu2  ;;  %4519 = vmatmul.msk.f32.vlgmr.msrb.gmra.mxu3 %vm1398_vm2, %v1276_v32 }
 0x27b   : > { %v4811_v18 = vpop.eup %4810  ;;  %v1235_v9 = vadd.f32 %v5612_v19, %v1234_v5  ;;  %v1836_v23 = vmax.f32 %v1834_v17, %v1835_v31  ;;  %v1355_v5 = vmul.f32 %v4787_v13, %v5290_v7  ;;  %v4950_v31 = vld [vmem:[%s5119_s23 + $0xe8] sm:$0xff] }
 0x27c   : > { %v2104_v16 = vmul.f32 %v4811_v18, %v4809_v0  ;;  %v5759_v41 = vpop.eup %4812 }
 0x27d   : > { %v1500_v34 = vpop.f32.mrf.mxu3  ;;  %v1278_v44 = vmul.f32 %v4947_v39, %v1235_v9  ;;  %v1930_v8 = vsub.f32 %v5722_v52, %v1836_v23  ;;  %v1983_v35 = vsel %vm1815_vm3, %v5759_v41, 0.0 }
 0x27e   : > { %v5736_v20 = vadd.f32 %v1500_v34, %v1385_v54  ;;  %v2120_v58 = vpack.c.bf16 %v2104_v16, %v2104_v16  ;;  %v4948_v54 = vld [vmem:[%s5119_s23 + $0xd8] sm:$0xff]  ;;  %v1984_v11 = vrot.slane %v1983_v35, 4 }
 0x280   : > { %4528 = vmatmul.msk.bf16.vlgmr.msrb.gmra.mxu2 %vm1815_vm3, %v2120_v58  ;;  %v1837_v25 = vsel %vm1815_vm3, %v5736_v20, -inf  ;;  %v1371_v58 = vsub.f32 1.0, %v1355_v5  ;;  %v1985_v62 = vadd.f32 %v1984_v11, %v1983_v35 }
 0x281   : > { %2627 = vmatpush.bf16.msrb.mxu2 %v2618_v43  ;;  %2142 = vmax.xlane.f32.xlu2 %v1837_v25  ;;  %v1838_v10 = vrot.slane %v1837_v25, 4 }
 0x282   : > { %v1236_v0 = vpop.f32.mrf.mxu2  ;;  %v1387_v21 = vmul.f32 -1e+20, %v1371_v58 }
 0x283   : > { %v1237_v3 = vadd.f32 %v5612_v19, %v1236_v0  ;;  %v1839_v37 = vmax.f32 %v1837_v25, %v1838_v10  ;;  %v1948_v0 = vmul.f32 1.442695, %v1930_v8 }
 0x285   : > { %v1279_v27 = vmul.f32 %v4946_v12, %v1237_v3  ;;  %v1840_v34 = vrot.slane %v1839_v37, 2  ;;  %4814 = vpow2.f32 %v1948_v0 }
 0x287   : > { %4520 = vmatpush.xpose.msk.msra.mxu3 %vm1398_vm2, %v1279_v27  ;;  %v1841_v63 = vmax.f32 %v1839_v37, %v1840_v34 }
 0x289   : > { %v1842_v12 = vrot.slane %v1841_v63, 1 }
 0x28a   : > { %v1239_v36 = vpop.f32.mrf.mxu2  ;;  %4521 = vmatmul.msk.f32.vlgmr.msra.gmra.mxu3 %vm1398_vm2, %v1278_v44  ;;  %v1986_v44 = vrot.slane %v1985_v62, 2 }
 0x28b   : > { %v1240_v18 = vadd.f32 %v5612_v19, %v1239_v36  ;;  %v1843_v4 = vmax.f32 %v1841_v63, %v1842_v12  ;;  %v4790_v63 = vld [vmem:[%s5151_s14 + $0x7] ss:$0 sm:$0xff]  ;;  %v2313_v12 = vpack.c.bf16 %v5335_v1, %v5335_v1 }
 0x28c   : > { %v1987_v13 = vadd.f32 %v1986_v44, %v1985_v62  ;;  %v1357_v44 = vmul.f32 %v4790_v63, %v5363_v56 }
 0x28d   : > { %v1526_v30 = vpop.f32.mrf.mxu3  ;;  %v1280_v43 = vmul.f32 %v4949_v55, %v1240_v18 }
 0x28e   : > { %v5751_v14 = vadd.f32 %v1526_v30, %v1386_v33  ;;  %v1356_v33 = vmul.f32 %v4798_v28, %v5324_v47  ;;  %v5776_v30 = vpop.eup %4814  ;;  %v1988_v34 = vrot.slane %v1987_v13, 1 }
 0x28f   : > { %v1990_v37 = vsel %vm1815_vm3, %v5776_v30, 0.0 }
 0x290   : > { %v1844_v42 = vsel %vm1815_vm3, %v5751_v14, -inf  ;;  %v1372_v5 = vsub.f32 1.0, %v1356_v33  ;;  %v1989_v0 = vadd.f32 %v1988_v34, %v1987_v13  ;;  %v1373_v13 = vsub.f32 1.0, %v1357_v44 }
 0x291   : > { %2144 = vmax.xlane.f32.xlu0 %v1844_v42  ;;  %v1845_v27 = vrot.slane %v1844_v42, 4 }
 0x292   : > { %v1241_v26 = vpop.f32.mrf.mxu2  ;;  %v1388_v58 = vmul.f32 -1e+20, %v1372_v5 }
 0x293   : > { %v1242_v32 = vadd.f32 %v5612_v19, %v1241_v26  ;;  %v1846_v36 = vmax.f32 %v1844_v42, %v1845_v27  ;;  %v1931_v26 = vsub.f32 %v5736_v20, %v1843_v4  ;;  %v4951_v42 = vld [vmem:[%s5119_s23 + $0xe0] sm:$0xff] }
 0x295   : > { %v1281_v16 = vmul.f32 %v4948_v54, %v1242_v32  ;;  %v1847_v23 = vrot.slane %v1846_v36, 2  ;;  %v1991_v54 = vrot.slane %v1990_v37, 4 }
 0x297   : > { %4522 = vmatpush.xpose.msk.msrb.mxu3 %vm1398_vm2, %v1281_v16  ;;  %v1950_v16 = vmul.f32 1.442695, %v1931_v26  ;;  %v1848_v8 = vmax.f32 %v1846_v36, %v1847_v23 }
 0x299   : > { %4816 = vpow2.f32 %v1950_v16  ;;  %v1849_v11 = vrot.slane %v1848_v8, 1 }
 0x29a   : > { %v1244_v25 = vpop.f32.mrf.mxu2  ;;  %4523 = vmatmul.msk.f32.vlgmr.msrb.gmra.mxu3 %vm1398_vm2, %v1280_v43  ;;  %4818 = vrcp.f32 %v1989_v0 }
 0x29b   : > { %v1245_v17 = vadd.f32 %v5612_v19, %v1244_v25  ;;  %v1992_v25 = vadd.f32 %v1991_v54, %v1990_v37  ;;  %v1850_v28 = vmax.f32 %v1848_v8, %v1849_v11  ;;  %v1389_v54 = vmul.f32 -1e+20, %v1373_v13 }
 0x29d   : > { %v1552_v3 = vpop.f32.mrf.mxu3  ;;  %v1282_v32 = vmul.f32 %v4951_v42, %v1245_v17  ;;  %v1993_v27 = vrot.slane %v1992_v25, 2  ;;  %v1932_v1 = vsub.f32 %v5751_v14, %v1850_v28 }
 0x29e   : > { %v5768_v9 = vadd.f32 %v1552_v3, %v1387_v21 }
 0x29f   : > { %v5795_v36 = vpop.eup %4816  ;;  %v1952_v5 = vmul.f32 1.442695, %v1932_v1 }
 0x2a0   : > { %v1851_v46 = vsel %vm1815_vm3, %v5768_v9, -inf  ;;  %v1997_v26 = vsel %vm1815_vm3, %v5795_v36, 0.0  ;;  %v4819_v37 = vpop.eup %4818 }
 0x2a1   : > { %2146 = vmax.xlane.f32.xlu2 %v1851_v46  ;;  %v1852_v55 = vrot.slane %v1851_v46, 4  ;;  %v2105_v16 = vmul.f32 %v4819_v37, %v5759_v41  ;;  %4820 = vpow2.f32 %v1952_v5 }
 0x2a2   : > { %v1246_v39 = vpop.f32.mrf.mxu2 }
 0x2a3   : > { %v1247_v40 = vadd.f32 %v5612_v19, %v1246_v39  ;;  %v1853_v3 = vmax.f32 %v1851_v46, %v1852_v55  ;;  %v2314_v46 = vpack.c.bf16 %v5373_v24, %v5373_v24  ;;  %v2315_v55 = vpack.c.bf16 %v5406_v38, %v5406_v38 }
 0x2a4   : > { %v2121_v63 = vpack.c.bf16 %v2105_v16, %v2105_v16  ;;  %v4791_v16 = vld [vmem:[%s5151_s14 + $0x9] ss:$0 sm:$0xff] }
 0x2a5   : > { %v1283_v10 = vmul.f32 %v4950_v31, %v1247_v40  ;;  %v4952_v40 = vld [vmem:[%s5119_s23 + $0xf8] sm:$0xff]  ;;  %v1854_v33 = vrot.slane %v1853_v3, 2  ;;  %v1994_v31 = vadd.f32 %v1993_v27, %v1992_v25  ;;  %v2371_v24 = vsel %vm2331_vm1, %v2314_v46, 0 }
 0x2a6   : > { %v2390_v41 = vsel %vm2331_vm1, %v2315_v55, 0 }
 0x2a7   : > { %4524 = vmatpush.xpose.msk.msra.mxu3 %vm1398_vm2, %v1283_v10  ;;  %v2352_v10 = vsel %vm2331_vm1, %v2313_v12, 0  ;;  %v1855_v42 = vmax.f32 %v1853_v3, %v1854_v33  ;;  %v4799_v3 = vld [vmem:[%s5151_s14 + $0x8] ss:$0 sm:$0xff] }
 0x2a8   : > { %v1358_v38 = vmul.f32 %v4799_v3, %v5478_v6 }
 0x2aa   : > { %v1249_v18 = vpop.f32.mrf.mxu2  ;;  %4525 = vmatmul.msk.f32.vlgmr.msra.gmra.mxu3 %vm1398_vm2, %v1282_v32  ;;  %v1998_v32 = vrot.slane %v1997_v26, 4  ;;  %v1374_v46 = vsub.f32 1.0, %v1358_v38 }
 0x2ab   : > { %v1250_v4 = vadd.f32 %v5612_v19, %v1249_v18  ;;  %v1995_v18 = vrot.slane %v1994_v31, 1 }
 0x2ac   : > { %v1999_v25 = vadd.f32 %v1998_v32, %v1997_v26 }
 0x2ad   : > { %v1578_v35 = vpop.f32.mrf.mxu3  ;;  %v1996_v11 = vadd.f32 %v1995_v18, %v1994_v31 }
 0x2ae   : > { %v5785_v43 = vadd.f32 %v1578_v35, %v1388_v58  ;;  %v1856_v58 = vrot.slane %v1855_v42, 1  ;;  %v2000_v27 = vrot.slane %v1999_v25, 2 }
 0x2af   : > { %4822 = vrcp.f32 %v1996_v11 }
 0x2b0   : > { %v1858_v21 = vsel %vm1815_vm3, %v5785_v43, -inf  ;;  %v1857_v12 = vmax.f32 %v1855_v42, %v1856_v58 }
 0x2b1   : > { %2148 = vmax.xlane.f32.xlu0 %v1858_v21  ;;  %v1859_v8 = vrot.slane %v1858_v21, 4 }
 0x2b2   : > { %v1251_v62 = vpop.f32.mrf.mxu2 }
 0x2b3   : > { %v1252_v39 = vadd.f32 %v5612_v19, %v1251_v62  ;;  %v4953_v19 = vld [vmem:[%s5119_s23 + $0xf0] sm:$0xff]  ;;  %v1860_v62 = vmax.f32 %v1858_v21, %v1859_v8  ;;  %v2001_v21 = vadd.f32 %v2000_v27, %v1999_v25 }
 0x2b4   : > { %v1284_v23 = vmul.f32 %v4953_v19, %v1250_v4  ;;  %v1390_v19 = vmul.f32 -1e+20, %v1374_v46 }
 0x2b5   : > { %v1285_v17 = vmul.f32 %v4952_v40, %v1252_v39  ;;  %v5819_v39 = vpop.eup %4820  ;;  %v1861_v44 = vrot.slane %v1860_v62, 2  ;;  %v1933_v40 = vsub.f32 %v5768_v9, %v1857_v12  ;;  %v2002_v26 = vrot.slane %v2001_v21, 1 }
 0x2b6   : > { %v2004_v33 = vsel %vm1815_vm3, %v5819_v39, 0.0  ;;  %v4823_v31 = vpop.eup %4822 }
 0x2b7   : > { %4526 = vmatpush.xpose.msk.msrb.mxu3 %vm1398_vm2, %v1285_v17  ;;  %v1862_v1 = vmax.f32 %v1860_v62, %v1861_v44  ;;  %v2005_v13 = vrot.slane %v2004_v33, 4 }
 0x2b9   : > { %v1863_v37 = vrot.slane %v1862_v1, 1  ;;  %v2006_v5 = vadd.f32 %v2005_v13, %v2004_v33 }
 0x2ba   : > { %4527 = vmatmul.msk.f32.vlgmr.msrb.gmra.mxu3 %vm1398_vm2, %v1284_v23  ;;  %v2106_v23 = vmul.f32 %v4823_v31, %v5776_v30 }
 0x2bb   : > { %2361 = vmatpush.bf16.msra.mxu3 %v2352_v10  ;;  %v1954_v10 = vmul.f32 1.442695, %v1933_v40  ;;  %v1864_v58 = vmax.f32 %v1862_v1, %v1863_v37  ;;  %v2007_v55 = vrot.slane %v2006_v5, 2 }
 0x2bd   : > { %v1604_v34 = vpop.f32.mrf.mxu3  ;;  %v1934_v62 = vsub.f32 %v5785_v43, %v1864_v58 }
 0x2be   : > { %v5809_v35 = vadd.f32 %v1604_v34, %v1389_v54  ;;  %v2003_v54 = vadd.f32 %v2002_v26, %v2001_v21  ;;  %v2122_v34 = vpack.c.bf16 %v2106_v23, %v2106_v23 }
 0x2bf   : > { %2380 = vmatpush.bf16.msrb.mxu3 %v2371_v24  ;;  %v2316_v24 = vpack.c.bf16 %v5422_v59, %v5422_v59 }
 0x2c0   : > { %v1865_v0 = vsel %vm1815_vm3, %v5809_v35, -inf }
 0x2c1   : > { %2150 = vmax.xlane.f32.xlu0 %v1865_v0  ;;  %v1866_v18 = vrot.slane %v1865_v0, 4  ;;  %v2409_v59 = vsel %vm2331_vm1, %v2316_v24, 0  ;;  %v4800_v24 = vld [vmem:[%s5151_s14 + $0xa] ss:$0 sm:$0xff] }
 0x2c2   : > { %4529 = vmatmul.msk.bf16.vlgmr.msra.gmra.mxu3 %vm1815_vm3, %v2121_v63  ;;  %v1359_v63 = vmul.f32 %v4791_v16, %v5503_v49 }
 0x2c3   : > { %2399 = vmatpush.bf16.msra.mxu3 %v2390_v41  ;;  %v1867_v25 = vmax.f32 %v1865_v0, %v1866_v18  ;;  %v2008_v41 = vadd.f32 %v2007_v55, %v2006_v5  ;;  %v1956_v0 = vmul.f32 1.442695, %v1934_v62 }
 0x2c4   : > { %v2137_v28 = vpop.xlane.xlu2 %2136  ;;  %v1375_v44 = vsub.f32 1.0, %v1359_v63 }
 0x2c5   : > { %v2168_v4 = vsub.f32 %v5696_v45, %v2137_v28  ;;  %v1868_v28 = vrot.slane %v1867_v25, 2 }
 0x2c6   : > { %v1391_v33 = vmul.f32 -1e+20, %v1375_v44 }
 0x2c7   : > { %v2184_v17 = vmul.f32 1.442695, %v2168_v4  ;;  %v1869_v21 = vmax.f32 %v1867_v25, %v1868_v28 }
 0x2c9   : > { %4824 = vpow2.f32 %v2184_v17  ;;  %v2009_v17 = vrot.slane %v2008_v41, 1  ;;  %v1870_v26 = vrot.slane %v1869_v21, 1 }
 0x2ca   : > { %4826 = vpow2.f32 %v1954_v10  ;;  %v2317_v10 = vpack.c.bf16 %v5436_v29, %v5436_v29 }
 0x2cb   : > { %4828 = vrcp.f32 %v2003_v54  ;;  %v2010_v23 = vadd.f32 %v2009_v17, %v2008_v41  ;;  %v1871_v16 = vmax.f32 %v1869_v21, %v1870_v26 }
 0x2cc   : > { %v2428_v29 = vsel %vm2331_vm1, %v2317_v10, 0  ;;  %v2318_v10 = vpack.c.bf16 %v5450_v53, %v5450_v53 }
 0x2cd   : > { %v1630_v45 = vpop.f32.mrf.mxu3  ;;  %v1935_v62 = vsub.f32 %v5809_v35, %v1871_v16 }
 0x2ce   : > { %v5826_v42 = vadd.f32 %v1630_v45, %v1390_v19  ;;  %v2447_v53 = vsel %vm2331_vm1, %v2318_v10, 0 }
 0x2cf   : > { %v5830_v32 = vpop.eup %4824 }
 0x2d0   : > { %v1872_v8 = vsel %vm1815_vm3, %v5826_v42, -inf  ;;  %v2216_v30 = vsel %vm1815_vm3, %v5830_v32, 0.0  ;;  %v5839_v11 = vpop.eup %4826 }
 0x2d1   : > { %2152 = vmax.xlane.f32.xlu0 %v1872_v8  ;;  %2217 = vadd.xlane.f32.xlu2 %v2216_v30  ;;  %v2011_v27 = vsel %vm1815_vm3, %v5839_v11, 0.0  ;;  %v4829_v4 = vpop.eup %4828  ;;  %v1873_v19 = vrot.slane %v1872_v8, 4 }
 0x2d2   : > { %4530 = vmatmul.msk.bf16.vlgmr.msrb.gmra.mxu3 %vm1815_vm3, %v2122_v34  ;;  %v2012_v40 = vrot.slane %v2011_v27, 4  ;;  %v2107_v46 = vmul.f32 %v4829_v4, %v5795_v36 }
 0x2d3   : > { %2418 = vmatpush.bf16.msrb.mxu3 %v2409_v59  ;;  %v1874_v30 = vmax.f32 %v1872_v8, %v1873_v19  ;;  %v1360_v59 = vmul.f32 %v4800_v24, %v5523_v15 }
 0x2d4   : > { %v2139_v3 = vpop.xlane.xlu0 %2138  ;;  %v2123_v36 = vpack.c.bf16 %v2107_v46, %v2107_v46 }
 0x2d5   : > { %v2169_v12 = vsub.f32 %v5709_v22, %v2139_v3  ;;  %v2013_v22 = vadd.f32 %v2012_v40, %v2011_v27  ;;  %v1376_v28 = vsub.f32 1.0, %v1360_v59 }
 0x2d7   : > { %v2186_v38 = vmul.f32 1.442695, %v2169_v12  ;;  %v2014_v18 = vrot.slane %v2013_v22, 2  ;;  %v1875_v12 = vrot.slane %v1874_v30, 2 }
 0x2d9   : > { %4830 = vpow2.f32 %v2186_v38  ;;  %v2015_v63 = vadd.f32 %v2014_v18, %v2013_v22  ;;  %v1876_v40 = vmax.f32 %v1874_v30, %v1875_v12 }
 0x2da   : > { %4832 = vpow2.f32 %v1956_v0  ;;  %v1958_v0 = vmul.f32 1.442695, %v1935_v62 }
 0x2db   : > { %4834 = vrcp.f32 %v2010_v23  ;;  %v2016_v4 = vrot.slane %v2015_v63, 1  ;;  %v1877_v23 = vrot.slane %v1876_v40, 1 }
 0x2dd   : > { %v1656_v31 = vpop.f32.mrf.mxu3  ;;  %v2017_v19 = vadd.f32 %v2016_v4, %v2015_v63 }
 0x2de   : > { %v5847_v1 = vadd.f32 %v1656_v31, %v1391_v33 }
 0x2df   : > { %v5851_v13 = vpop.eup %4830 }
 0x2e0   : > { %v1879_v37 = vsel %vm1815_vm3, %v5847_v1, -inf  ;;  %v2219_v45 = vsel %vm1815_vm3, %v5851_v13, 0.0  ;;  %v5860_v54 = vpop.eup %4832 }
 0x2e1   : > { %v1880_v5 = vrot.slane %v1879_v37, 4  ;;  %2154 = vmax.xlane.f32.xlu0 %v1879_v37  ;;  %2220 = vadd.xlane.f32.xlu1 %v2219_v45  ;;  %v2018_v3 = vsel %vm1815_vm3, %v5860_v54, 0.0  ;;  %v4835_v8 = vpop.eup %4834  ;;  %v4792_v45 = vld [vmem:[%s5151_s14 + $0xb] ss:$0 sm:$0xff] }
 0x2e2   : > { %4531 = vmatmul.msk.bf16.vlgmr.msra.gmra.mxu3 %vm1815_vm3, %v2123_v36  ;;  %v2019_v44 = vrot.slane %v2018_v3, 4  ;;  %v2108_v17 = vmul.f32 %v4835_v8, %v5819_v39  ;;  %v1361_v30 = vmul.f32 %v4792_v45, %v5547_v57 }
 0x2e3   : > { %v1881_v34 = vmax.f32 %v1879_v37, %v1880_v5  ;;  %2437 = vmatpush.bf16.msra.mxu3 %v2428_v29  ;;  %v1878_v29 = vmax.f32 %v1876_v40, %v1877_v23  ;;  %v2319_v23 = vpack.c.bf16 %v5466_v2, %v5466_v2 }
 0x2e4   : > { %v2141_v58 = vpop.xlane.xlu1 %2140  ;;  %v2020_v31 = vadd.f32 %v2019_v44, %v2018_v3  ;;  %v2124_v24 = vpack.c.bf16 %v2108_v17, %v2108_v17 }
 0x2e5   : > { %v1882_v55 = vrot.slane %v1881_v34, 2  ;;  %v2170_v25 = vsub.f32 %v5722_v52, %v2141_v58  ;;  %v1392_v52 = vmul.f32 -1e+20, %v1376_v28  ;;  %v1936_v3 = vsub.f32 %v5826_v42, %v1878_v29 }
 0x2e6   : > { %v2021_v18 = vrot.slane %v2020_v31, 2  ;;  %v2466_v2 = vsel %vm2331_vm1, %v2319_v23, 0 }
 0x2e7   : > { %v1883_v41 = vmax.f32 %v1881_v34, %v1882_v55  ;;  %v2188_v27 = vmul.f32 1.442695, %v2170_v25 }
 0x2e8   : > { %v2022_v25 = vadd.f32 %v2021_v18, %v2020_v31  ;;  %v4801_v18 = vld [vmem:[%s5151_s14 + $0xc] ss:$0 sm:$0xff] }
 0x2e9   : > { %v1884_v38 = vrot.slane %v1883_v41, 1  ;;  %4836 = vpow2.f32 %v2188_v27 }
 0x2ea   : > { %4838 = vpow2.f32 %v1958_v0  ;;  %v2023_v4 = vrot.slane %v2022_v25, 1  ;;  %v1960_v0 = vmul.f32 1.442695, %v1936_v3 }
 0x2eb   : > { %v1885_v21 = vmax.f32 %v1883_v41, %v1884_v38  ;;  %v1377_v41 = vsub.f32 1.0, %v1361_v30 }
 0x2ec   : > { %v2024_v10 = vadd.f32 %v2023_v4, %v2022_v25  ;;  %v6640_v25 = vld [vmem:[#allocation55_spill] sm:$0xff] }
 0x2ed   : > { %v1937_v33 = vsub.f32 %v5847_v1, %v1885_v21  ;;  %v1682_v46 = vpop.f32.mrf.mxu3  ;;  %v1362_v3 = vmul.f32 %v4801_v18, %v6640_v25 }
 0x2ee   : > { %v5869_v22 = vadd.f32 %v1682_v46, %v1392_v52  ;;  %v1393_v52 = vmul.f32 -1e+20, %v1377_v41 }
 0x2ef   : > { %v5873_v26 = vpop.eup %4836  ;;  %v1962_v37 = vmul.f32 1.442695, %v1937_v33 }
 0x2f0   : > { %v1886_v36 = vsel %vm1815_vm3, %v5869_v22, -inf  ;;  %v2222_v39 = vsel %vm1815_vm3, %v5873_v26, 0.0  ;;  %v5883_v58 = vpop.eup %4838 }
 0x2f1   : > { %4840 = vpow2.f32 %v1962_v37  ;;  %v1887_v5 = vrot.slane %v1886_v36, 4  ;;  %2156 = vmax.xlane.f32.xlu0 %v1886_v36  ;;  %2223 = vadd.xlane.f32.xlu1 %v2222_v39  ;;  %v2025_v27 = vsel %vm1815_vm3, %v5883_v58, 0.0 }
 0x2f2   : > { %4532 = vmatmul.msk.bf16.vlgmr.msrb.gmra.mxu3 %vm1815_vm3, %v2124_v24  ;;  %4842 = vrcp.f32 %v2017_v19 }
 0x2f3   : > { %v1888_v16 = vmax.f32 %v1886_v36, %v1887_v5  ;;  %2456 = vmatpush.bf16.msrb.mxu3 %v2447_v53 }
 0x2f4   : > { %v2143_v34 = vpop.xlane.xlu2 %2142 }
 0x2f5   : > { %v1889_v59 = vrot.slane %v1888_v16, 2  ;;  %v2171_v55 = vsub.f32 %v5736_v20, %v2143_v34  ;;  %v2026_v20 = vrot.slane %v2025_v27, 4 }
 0x2f7   : > { %v5886_v63 = vpop.eup %4840  ;;  %v1890_v62 = vmax.f32 %v1888_v16, %v1889_v59  ;;  %v2190_v12 = vmul.f32 1.442695, %v2171_v55  ;;  %v2027_v45 = vadd.f32 %v2026_v20, %v2025_v27  ;;  %v1378_v20 = vsub.f32 1.0, %v1362_v3 }
 0x2f8   : > { %v2039_v28 = vsel %vm1815_vm3, %v5886_v63, 0.0  ;;  %v4843_v8 = vpop.eup %4842 }
 0x2f9   : > { %v2040_v38 = vrot.slane %v2039_v28, 4  ;;  %v1891_v44 = vrot.slane %v1890_v62, 1  ;;  %4844 = vpow2.f32 %v2190_v12  ;;  %v2109_v17 = vmul.f32 %v4843_v8, %v5839_v11 }
 0x2fa   : > { %4846 = vpow2.f32 %v1960_v0  ;;  %v2028_v16 = vrot.slane %v2027_v45, 2 }
 0x2fb   : > { %v2041_v40 = vadd.f32 %v2040_v38, %v2039_v28  ;;  %v1892_v21 = vmax.f32 %v1890_v62, %v1891_v44  ;;  %v2125_v5 = vpack.c.bf16 %v2109_v17, %v2109_v17 }
 0x2fc   : > { %v2029_v28 = vadd.f32 %v2028_v16, %v2027_v45  ;;  %v1394_v45 = vmul.f32 -1e+20, %v1378_v20 }
 0x2fd   : > { %v2042_v33 = vrot.slane %v2041_v40, 2  ;;  %v1938_v46 = vsub.f32 %v5869_v22, %v1892_v21  ;;  %v1708_v31 = vpop.f32.mrf.mxu3 }
 0x2fe   : > { %v5895_v19 = vadd.f32 %v1708_v31, %v1393_v52  ;;  %v2030_v17 = vrot.slane %v2029_v28, 1 }
 0x2ff   : > { %v5899_v37 = vpop.eup %4844  ;;  %v2043_v36 = vadd.f32 %v2042_v33, %v2041_v40  ;;  %v1964_v39 = vmul.f32 1.442695, %v1938_v46 }
 0x300   : > { %v1893_v24 = vsel %vm1815_vm3, %v5895_v19, -inf  ;;  %v2225_v11 = vsel %vm1815_vm3, %v5899_v37, 0.0  ;;  %v5911_v62 = vpop.eup %4846 }
 0x301   : > { %4848 = vpow2.f32 %v1964_v39  ;;  %v1894_v53 = vrot.slane %v1893_v24, 4  ;;  %2158 = vmax.xlane.f32.xlu1 %v1893_v24  ;;  %2226 = vadd.xlane.f32.xlu2 %v2225_v11  ;;  %v2044_v29 = vrot.slane %v2043_v36, 1  ;;  %v2032_v44 = vsel %vm1815_vm3, %v5911_v62, 0.0 }
 0x302   : > { %4533 = vmatmul.msk.bf16.vlgmr.msra.gmra.mxu3 %vm1815_vm3, %v2125_v5  ;;  %4850 = vrcp.f32 %v2024_v10  ;;  %v6641_v10 = vld [vmem:[#allocation17_spill] sm:$0xff] }
 0x303   : > { %v1895_v30 = vmax.f32 %v1893_v24, %v1894_v53  ;;  %2475 = vmatpush.bf16.msra.mxu3 %v2466_v2  ;;  %v5908_v34 = vpop.f32.mrf.mxu2  ;;  %v2045_v59 = vadd.f32 %v2044_v29, %v2043_v36  ;;  %v2634_v23 = vpack.c.bf16 %v6641_v10, %v6641_v10  ;;  %v6642_v29 = vld [vmem:[#allocation43_spill] sm:$0xff] }
 0x304   : > { %v2145_v55 = vpop.xlane.xlu0 %2144  ;;  %v2320_v2 = vpack.c.bf16 %v6642_v29, %v6642_v29 }
 0x305   : > { %v1896_v12 = vrot.slane %v1895_v30, 2  ;;  %v2172_v41 = vsub.f32 %v5751_v14, %v2145_v55  ;;  %4852 = vrcp.f32 %v2045_v59  ;;  %v2033_v14 = vrot.slane %v2032_v44, 4 }
 0x307   : > { %v5914_v27 = vpop.eup %4848  ;;  %v1897_v8 = vmax.f32 %v1895_v30, %v1896_v12  ;;  %v2192_v38 = vmul.f32 1.442695, %v2172_v41  ;;  %v2031_v30 = vadd.f32 %v2030_v17, %v2029_v28  ;;  %v2034_v59 = vadd.f32 %v2033_v14, %v2032_v44  ;;  %v4789_v12 = vld [vmem:[%s5151_s14 + $0xd] ss:$0 sm:$0xff] }
 0x308   : > { %v2046_v4 = vsel %vm1815_vm3, %v5914_v27, 0.0  ;;  %v4851_v0 = vpop.eup %4850  ;;  %v2485_v44 = vsel %vm2331_vm1, %v2320_v2, 0  ;;  %v6644_v2 = vld [vmem:[#allocation24_spill] sm:$0xff] }
 0x309   : > { %v2047_v40 = vrot.slane %v2046_v4, 4  ;;  %v1898_v21 = vrot.slane %v1897_v8, 1  ;;  %4854 = vpow2.f32 %v2192_v38  ;;  %v2110_v39 = vmul.f32 %v4851_v0, %v5860_v54 }
 0x30a   : > { %v2704_v54 = vsel %vm2331_vm1, %v2634_v23, 0 }
 0x30b   : > { %v4853_v52 = vpop.eup %4852  ;;  %v2048_v33 = vadd.f32 %v2047_v40, %v2046_v4  ;;  %v1899_v46 = vmax.f32 %v1897_v8, %v1898_v21  ;;  %v2346_v31 = vpop.f32.mrf.mxu2  ;;  %v2126_v8 = vpack.c.bf16 %v2110_v39, %v2110_v39  ;;  %v2035_v4 = vrot.slane %v2034_v59, 2  ;;  %v6643_v40 = vld [vmem:[#allocation14_spill] sm:$0xff] }
 0x30c   : > { %v2113_v36 = vmul.f32 %v4853_v52, %v5886_v63  ;;  %v1363_v21 = vmul.f32 %v4789_v12, %v6643_v40 }
 0x30d   : > { %v2049_v24 = vrot.slane %v2048_v33, 2  ;;  %v1939_v11 = vsub.f32 %v5895_v19, %v1899_v46  ;;  %v1734_v5 = vpop.f32.mrf.mxu3 }
 0x30e   : > { %v5925_v18 = vadd.f32 %v1734_v5, %v1394_v45  ;;  %v2129_v53 = vpack.c.bf16 %v2113_v36, %v2113_v36  ;;  %v1379_v10 = vsub.f32 1.0, %v1363_v21 }
 0x30f   : > { %v5929_v16 = vpop.eup %4854  ;;  %v2050_v55 = vadd.f32 %v2049_v24, %v2048_v33  ;;  %v1966_v3 = vmul.f32 1.442695, %v1939_v11  ;;  %v2036_v33 = vadd.f32 %v2035_v4, %v2034_v59 }
 0x310   : > { %4537 = vmatmul.msk.bf16.vlgmr.msrb.gmra.mxu0 %vm1815_vm3, %v2129_v53  ;;  %v1900_v63 = vsel %vm1815_vm3, %v5925_v18, -inf  ;;  %v2228_v41 = vsel %vm1815_vm3, %v5929_v16, 0.0 }
 0x311   : > { %4856 = vpow2.f32 %v1966_v3  ;;  %2713 = vmatpush.bf16.msrb.mxu0 %v2704_v54  ;;  %v1901_v38 = vrot.slane %v1900_v63, 4  ;;  %2160 = vmax.xlane.f32.xlu0 %v1900_v63  ;;  %v2051_v28 = vrot.slane %v2050_v55, 1  ;;  %v2037_v11 = vrot.slane %v2036_v33, 1 }
 0x312   : > { %2229 = vadd.xlane.f32.xlu1 %v2228_v41  ;;  %4534 = vmatmul.msk.bf16.vlgmr.msrb.gmra.mxu3 %vm1815_vm3, %v2126_v8  ;;  %4858 = vrcp.f32 %v2031_v30  ;;  %v2635_v30 = vpack.c.bf16 %v6644_v2, %v6644_v2  ;;  %v6645_v8 = vld [vmem:[#allocation57_spill] sm:$0xff] }
 0x313   : > { %v1902_v20 = vmax.f32 %v1900_v63, %v1901_v38  ;;  %2494 = vmatpush.bf16.msrb.mxu3 %v2485_v44  ;;  %v2052_v0 = vadd.f32 %v2051_v28, %v2050_v55  ;;  %v1395_v55 = vmul.f32 -1e+20, %v1379_v10  ;;  %v2324_v38 = vpack.c.bf16 %v6645_v8, %v6645_v8  ;;  %v6646_v10 = vld [vmem:[#allocation20_spill] sm:$0xff] }
 0x314   : > { %v2147_v52 = vpop.xlane.xlu2 %2146  ;;  %v2038_v28 = vadd.f32 %v2037_v11, %v2036_v33 }
 0x315   : > { %v1903_v17 = vrot.slane %v1902_v20, 2  ;;  %4860 = vrcp.f32 %v2052_v0  ;;  %v2173_v31 = vsub.f32 %v5768_v9, %v2147_v52  ;;  %v4802_v0 = vld [vmem:[%s5151_s14 + $0xe] ss:$0 sm:$0xff] }
 0x317   : > { %v5941_v14 = vpop.eup %4856  ;;  %v1904_v46 = vmax.f32 %v1902_v20, %v1903_v17  ;;  %v2194_v29 = vmul.f32 1.442695, %v2173_v31  ;;  %v2561_v17 = vsel %vm2331_vm1, %v2324_v38, 0 }
 0x318   : > { %v2053_v23 = vsel %vm1815_vm3, %v5941_v14, 0.0  ;;  %v4859_v45 = vpop.eup %4858 }
 0x319   : > { %v2054_v36 = vrot.slane %v2053_v23, 4  ;;  %v1905_v39 = vrot.slane %v1904_v46, 1  ;;  %v2111_v9 = vmul.f32 %v4859_v45, %v5883_v58  ;;  %4862 = vpow2.f32 %v2194_v29 }
 0x31b   : > { %v4861_v24 = vpop.eup %4860  ;;  %v2055_v5 = vadd.f32 %v2054_v36, %v2053_v23  ;;  %v1906_v53 = vmax.f32 %v1904_v46, %v1905_v39  ;;  %v2127_v20 = vpack.c.bf16 %v2111_v9, %v2111_v9  ;;  %v1364_v23 = vmul.f32 %v4802_v0, %v6646_v10 }
 0x31c   : > { %v2114_v59 = vmul.f32 %v4861_v24, %v5914_v27  ;;  %v2739_v27 = vsel %vm2331_vm1, %v2635_v30, 0 }
 0x31d   : > { %v2056_v3 = vrot.slane %v2055_v5, 2  ;;  %v1940_v12 = vsub.f32 %v5925_v18, %v1906_v53  ;;  %v1760_v54 = vpop.f32.mrf.mxu3  ;;  %v1380_v2 = vsub.f32 1.0, %v1364_v23 }
 0x31e   : > { %v5951_v63 = vadd.f32 %v1760_v54, %v1395_v55  ;;  %v2130_v41 = vpack.c.bf16 %v2114_v59, %v2114_v59  ;;  %v6647_v54 = vld [vmem:[#allocation30_spill] sm:$0xff] }
 0x31f   : > { %v2057_v44 = vadd.f32 %v2056_v3, %v2055_v5  ;;  %v1968_v4 = vmul.f32 1.442695, %v1940_v12  ;;  %v5963_v45 = vpop.eup %4862 }
 0x320   : > { %4538 = vmatmul.msk.bf16.vlgmr.msrb.gmra.mxu1 %vm1815_vm3, %v2130_v41  ;;  %v1907_v58 = vsel %vm1815_vm3, %v5951_v63, -inf  ;;  %v2231_v29 = vsel %vm1815_vm3, %v5963_v45, 0.0  ;;  %v1396_v41 = vmul.f32 -1e+20, %v1380_v2 }
 0x321   : > { %v2058_v21 = vrot.slane %v2057_v44, 1  ;;  %4864 = vpow2.f32 %v1968_v4  ;;  %2748 = vmatpush.bf16.msrb.mxu1 %v2739_v27  ;;  %v1908_v52 = vrot.slane %v1907_v58, 4  ;;  %2162 = vmax.xlane.f32.xlu1 %v1907_v58  ;;  %v6648_v27 = vld [vmem:[#allocation10_spill] sm:$0xff] }
 0x322   : > { %4535 = vmatmul.msk.bf16.vlgmr.msra.gmra.mxu3 %vm1815_vm3, %v2127_v20  ;;  %4866 = vrcp.f32 %v2038_v28 }
 0x323   : > { %v2059_v33 = vadd.f32 %v2058_v21, %v2057_v44  ;;  %v1909_v46 = vmax.f32 %v1907_v58, %v1908_v52  ;;  %2570 = vmatpush.bf16.msra.mxu3 %v2561_v17  ;;  %v2633_v58 = vpack.c.bf16 %v6648_v27, %v6648_v27 }
 0x324   : > { %v2149_v31 = vpop.xlane.xlu0 %2148 }
 0x325   : > { %4868 = vrcp.f32 %v2059_v33  ;;  %v1910_v36 = vrot.slane %v1909_v46, 2  ;;  %v2174_v39 = vsub.f32 %v5785_v43, %v2149_v31  ;;  %v2636_v43 = vpack.c.bf16 %v6647_v54, %v6647_v54  ;;  %v4788_v33 = vld [vmem:[%s5151_s14 + $0xf] ss:$0 sm:$0xff]  ;;  %s4261_s14 = scalar_lea.hbm %s6525_s7, %s5109_s15  ;;  %s4974_s15 = scalar_lea.hbm %s6525_s7, 32 }
 0x326   : > { %s4264_s19 = sshll.u32 %s4261_s14, 4  ;;  %s4265_s19 = int_to_ptr.hbm [resolvable:$true] %s4264_s19 }
 0x327   : > { %v4865_v24 = vpop.eup %4864  ;;  %v1911_v11 = vmax.f32 %v1909_v46, %v1910_v36  ;;  %v2196_v5 = vmul.f32 1.442695, %v2174_v39  ;;  %v2669_v39 = vsel %vm2331_vm1, %v2633_v58, 0  ;;  %s4968_s21 = sshra.s32 %s4265_s19, 4  ;;  %s4969_s21 = int_to_ptr.hbm [resolvable:$true] %s4968_s21 }
 0x328   : > { %v2060_v53 = vsel %vm1815_vm3, %v4865_v24, 0.0  ;;  %v4867_v30 = vpop.eup %4866  ;;  %s4970_s22 = scalar_lea.hbm %s4969_s21, 16  ;;  %p4975_p0 = scmp.lt.s32.totalorder %s4969_s21, %s6525_s7 }
 0x329   : > { %v2061_v55 = vrot.slane %v2060_v53, 4  ;;  %v1912_v59 = vrot.slane %v1911_v11, 1  ;;  %4870 = vpow2.f32 %v2196_v5  ;;  %2232 = vadd.xlane.f32.xlu1 %v2231_v29  ;;  %v2112_v38 = vmul.f32 %v4867_v30, %v5911_v62  ;;  %p4971_p11 = scmp.ne.s32.totalorder %s4969_s21, %s4970_s22  ;;  %p4976_p1 = scmp.lt.s32.totalorder %s4974_s15, %s4970_s22 }
 0x32a   : > { %v2774_v62 = vsel %vm2331_vm1, %v2636_v43, 0 }
 0x32b   : > { %v4869_v9 = vpop.eup %4868  ;;  %v2062_v3 = vadd.f32 %v2061_v55, %v2060_v53  ;;  %v1913_v12 = vmax.f32 %v1911_v11, %v1912_v59  ;;  %v2128_v31 = vpack.c.bf16 %v2112_v38, %v2112_v38  ;;  %v6649_v53 = vld [vmem:[#allocation27_spill] sm:$0xff]  ;;  %p4972_p12 = pnand %p4971_p11, %p5096_p5  ;;  %p4977_p2 = por %p4976_p1, %p4975_p0 }
 0x32c   : > { %v2115_v8 = vmul.f32 %v4869_v9, %v5941_v14  ;;  %v1365_v29 = vmul.f32 %v4788_v33, %v6649_v53 }
 0x32d   : > { %v2063_v28 = vrot.slane %v2062_v3, 2  ;;  %v1941_v44 = vsub.f32 %v5951_v63, %v1913_v12  ;;  %v1786_v4 = vpop.f32.mrf.mxu3  ;;  %p4973_p13 = pneg %p4972_p12 }
 0x32e   : > { %v5976_v20 = vadd.f32 %v1786_v4, %v1396_v41  ;;  %v2131_v0 = vpack.c.bf16 %v2115_v8, %v2115_v8 }
 0x32f   : > { %v5978_v21 = vpop.eup %4870  ;;  %v2064_v52 = vadd.f32 %v2063_v28, %v2062_v3  ;;  %v1970_v17 = vmul.f32 1.442695, %v1941_v44  ;;  %v1381_v3 = vsub.f32 1.0, %v1365_v29  ;;  %p4978_p3 = pnand %p4977_p2, %p4973_p13 }
 0x330   : > { %v5983_v14 = vsel %vm1815_vm3, %v5976_v20, -inf  ;;  %4539 = vmatmul.msk.bf16.vlgmr.msra.gmra.mxu2 %vm1815_vm3, %v2131_v0  ;;  %v2234_v46 = vsel %vm1815_vm3, %v5978_v21, 0.0 }
 0x331   : > { %v2065_v23 = vrot.slane %v2064_v52, 1  ;;  %4872 = vpow2.f32 %v1970_v17  ;;  %v1915_v36 = vrot.slane %v5983_v14, 4  ;;  %2783 = vmatpush.bf16.msra.mxu2 %v2774_v62  ;;  %2235 = vadd.xlane.f32.xlu0 %v2234_v46  ;;  %v1397_v44 = vmul.f32 -1e+20, %v1381_v3 }
 0x332   : > { %4536 = vmatmul.msk.bf16.vlgmr.msrb.gmra.mxu3 %vm1815_vm3, %v2128_v31 }
 0x333   : > { %v2066_v11 = vadd.f32 %v2065_v23, %v2064_v52  ;;  %v1916_v5 = vmax.f32 %v5983_v14, %v1915_v36  ;;  %2678 = vmatpush.bf16.msrb.mxu3 %v2669_v39  ;;  %v6650_v52 = vld [vmem:[#allocation32_spill] sm:$0xff] }
 0x334   : > { %v2151_v2 = vpop.xlane.xlu0 %2150  ;;  %v2637_v17 = vpack.c.bf16 %v6650_v52, %v6650_v52 }
 0x335   : > { %4874 = vrcp.f32 %v2066_v11  ;;  %v1917_v30 = vrot.slane %v1916_v5, 2  ;;  %v2175_v9 = vsub.f32 %v5809_v35, %v2151_v2 }
 0x337   : > { %v4873_v55 = vpop.eup %4872  ;;  %v1918_v59 = vmax.f32 %v1916_v5, %v1917_v30  ;;  %v2198_v28 = vmul.f32 1.442695, %v2175_v9 }
 0x338   : > { %v2067_v12 = vsel %vm1815_vm3, %v4873_v55, 0.0 }
 0x339   : > { %v2068_v54 = vrot.slane %v2067_v12, 4  ;;  %v1919_v43 = vrot.slane %v1918_v59, 1  ;;  %4876 = vpow2.f32 %v2198_v28 }
 0x33b   : > { %v4875_v41 = vpop.eup %4874  ;;  %v2069_v8 = vadd.f32 %v2068_v54, %v2067_v12  ;;  %v1920_v38 = vmax.f32 %v1918_v59, %v1919_v43 }
 0x33c   : > { %v2116_v4 = vmul.f32 %v4875_v41, %v4865_v24  ;;  %v2809_v24 = vsel %vm2331_vm1, %v2637_v17, 0 }
 0x33d   : > { %v2070_v27 = vrot.slane %v2069_v8, 2  ;;  %v1942_v58 = vsub.f32 %v5976_v20, %v1920_v38  ;;  %v1812_v0 = vpop.f32.mrf.mxu3 }
 0x33e   : > { %v5999_v33 = vadd.f32 %v1812_v0, %v1397_v44  ;;  %v2132_v31 = vpack.c.bf16 %v2116_v4, %v2116_v4  ;;  %v6651_v4 = vld [vmem:[#allocation34_spill] sm:$0xff] }
 0x33f   : > { %v2071_v35 = vadd.f32 %v2070_v27, %v2069_v8  ;;  %v1972_v62 = vmul.f32 1.442695, %v1942_v58  ;;  %v6005_v29 = vpop.eup %4876 }
 0x340   : > { %v1921_v46 = vsel %vm1815_vm3, %v5999_v33, -inf  ;;  %v2237_v43 = vsel %vm1815_vm3, %v6005_v29, 0.0 }
 0x341   : > { %v2072_v23 = vrot.slane %v2071_v35, 1  ;;  %4878 = vpow2.f32 %v1972_v62  ;;  %v1922_v36 = vrot.slane %v1921_v46, 4  ;;  %2166 = vmax.xlane.f32.xlu0 %v1921_v46 }
 0x342   : > { %4540 = vmatmul.msk.bf16.vlgmr.msra.gmra.mxu3 %vm1815_vm3, %v2132_v31 }
 0x343   : > { %v2073_v39 = vadd.f32 %v2072_v23, %v2071_v35  ;;  %v1923_v11 = vmax.f32 %v1921_v46, %v1922_v36  ;;  %2818 = vmatpush.bf16.msra.mxu3 %v2809_v24 }
 0x344   : > { %v2153_v5 = vpop.xlane.xlu0 %2152 }
 0x345   : > { %4880 = vrcp.f32 %v2073_v39  ;;  %v1924_v2 = vrot.slane %v1923_v11, 2  ;;  %v2176_v30 = vsub.f32 %v5826_v42, %v2153_v5  ;;  %v6008_v59 = vpop.f32.mrf.mxu3  ;;  %v2638_v42 = vpack.c.bf16 %v6651_v4, %v6651_v4 }
 0x347   : > { %v4879_v9 = vpop.eup %4878  ;;  %v1925_v3 = vmax.f32 %v1923_v11, %v1924_v2  ;;  %v2200_v12 = vmul.f32 1.442695, %v2176_v30  ;;  %v2844_v31 = vsel %vm2331_vm1, %v2638_v42, 0 }
 0x348   : > { %v2074_v54 = vsel %vm1815_vm3, %v4879_v9, 0.0 }
 0x349   : > { %v2075_v41 = vrot.slane %v2074_v54, 4  ;;  %v1926_v8 = vrot.slane %v1925_v3, 1  ;;  %4882 = vpow2.f32 %v2200_v12  ;;  %2238 = vadd.xlane.f32.xlu0 %v2237_v43  ;;  %v6652_v43 = vld [vmem:[#allocation36_spill] sm:$0xff] }
 0x34b   : > { %v4881_v38 = vpop.eup %4880  ;;  %v2076_v28 = vadd.f32 %v2075_v41, %v2074_v54  ;;  %v1927_v44 = vmax.f32 %v1925_v3, %v1926_v8  ;;  %v2639_v41 = vpack.c.bf16 %v6652_v43, %v6652_v43 }
 0x34c   : > { %v2117_v27 = vmul.f32 %v4881_v38, %v4873_v55 }
 0x34d   : > { %v2077_v58 = vrot.slane %v2076_v28, 2  ;;  %v1943_v0 = vsub.f32 %v5999_v33, %v1927_v44  ;;  %v2365_v52 = vpop.f32.mrf.mxu3  ;;  %v2879_v42 = vsel %vm2331_vm1, %v2639_v41, 0 }
 0x34e   : > { %v2133_v17 = vpack.c.bf16 %v2117_v27, %v2117_v27 }
 0x34f   : > { %v6016_v35 = vpop.eup %4882  ;;  %v2078_v62 = vadd.f32 %v2077_v58, %v2076_v28  ;;  %v1974_v46 = vmul.f32 1.442695, %v1943_v0 }
 0x350   : > { %4541 = vmatmul.msk.bf16.vlgmr.msra.gmra.mxu0 %vm1815_vm3, %v2133_v17  ;;  %v2240_v23 = vsel %vm1815_vm3, %v6016_v35, 0.0  ;;  %v2218_v17 = vpop.xlane.xlu2 %2217 }
 0x351   : > { %v2079_v36 = vrot.slane %v2078_v62, 1  ;;  %4884 = vpow2.f32 %v1974_v46  ;;  %2853 = vmatpush.bf16.msra.mxu0 %v2844_v31  ;;  %2241 = vadd.xlane.f32.xlu2 %v2240_v23  ;;  %v6653_v46 = vld [vmem:[#allocation39_spill] sm:$0xff] }
 0x352   : > { %v2640_v31 = vpack.c.bf16 %v6653_v46, %v6653_v46 }
 0x353   : > { %v2080_v55 = vadd.f32 %v2079_v36, %v2078_v62 }
 0x354   : > { %v2155_v24 = vpop.xlane.xlu0 %2154 }
 0x355   : > { %4886 = vrcp.f32 %v2080_v55  ;;  %v2177_v39 = vsub.f32 %v5847_v1, %v2155_v24  ;;  %v6023_v11 = vpop.f32.mrf.mxu3 }
 0x357   : > { %v4885_v5 = vpop.eup %4884  ;;  %v2202_v2 = vmul.f32 1.442695, %v2177_v39 }
 0x358   : > { %v2081_v30 = vsel %vm1815_vm3, %v4885_v5, 0.0 }
 0x359   : > { %v2082_v3 = vrot.slane %v2081_v30, 4  ;;  %4888 = vpow2.f32 %v2202_v2  ;;  %v2914_v2 = vsel %vm2331_vm1, %v2640_v31, 0 }
 0x35b   : > { %v4887_v12 = vpop.eup %4886  ;;  %v2083_v54 = vadd.f32 %v2082_v3, %v2081_v30 }
 0x35c   : > { %v2118_v8 = vmul.f32 %v4887_v12, %v4879_v9  ;;  %v2221_v9 = vpop.xlane.xlu1 %2220 }
 0x35d   : > { %v2084_v38 = vrot.slane %v2083_v54, 2  ;;  %v2384_v28 = vpop.f32.mrf.mxu3 }
 0x35e   : > { %v2134_v44 = vpack.c.bf16 %v2118_v8, %v2118_v8 }
 0x35f   : > { %v6028_v4 = vpop.eup %4888  ;;  %v2085_v1 = vadd.f32 %v2084_v38, %v2083_v54 }
 0x360   : > { %4542 = vmatmul.msk.bf16.vlgmr.msra.gmra.mxu1 %vm1815_vm3, %v2134_v44  ;;  %v2243_v27 = vsel %vm1815_vm3, %v6028_v4, 0.0 }
 0x361   : > { %v2086_v58 = vrot.slane %v2085_v1, 1  ;;  %2888 = vmatpush.bf16.msra.mxu1 %v2879_v42  ;;  %2244 = vadd.xlane.f32.xlu0 %v2243_v27 }
 0x363   : > { %v2087_v0 = vadd.f32 %v2086_v58, %v2085_v1 }
 0x364   : > { %v2224_v55 = vpop.xlane.xlu1 %2223 }
 0x365   : > { %4890 = vrcp.f32 %v2087_v0  ;;  %v6034_v52 = vpop.f32.mrf.mxu3 }
 0x366   : > { %4892 = vrcp.f32 %v2218_v17 }
 0x367   : > { %4894 = vrcp.f32 %v2221_v9 }
 0x368   : > { %4896 = vrcp.f32 %v2224_v55 }
 0x36b   : > { %v4891_v62 = vpop.eup %4890 }
 0x36c   : > { %v2119_v23 = vmul.f32 %v4891_v62, %v4885_v5  ;;  %v4893_v39 = vpop.eup %4892 }
 0x36d   : > { %v2403_v36 = vpop.f32.mrf.mxu3  ;;  %v4895_v30 = vpop.eup %4894  ;;  %v2280_v3 = vmul.f32 %v4893_v39, %v5830_v32 }
 0x36e   : > { %v2135_v24 = vpack.c.bf16 %v2119_v23, %v2119_v23  ;;  %v2281_v12 = vmul.f32 %v4895_v30, %v5851_v13  ;;  %v4897_v5 = vpop.eup %4896 }
 0x36f   : > { %v2296_v41 = vpack.c.bf16 %v2280_v3, %v2280_v3  ;;  %v2282_v38 = vmul.f32 %v4897_v5, %v5873_v26 }
 0x370   : > { %4543 = vmatmul.msk.bf16.vlgmr.msrb.gmra.mxu2 %vm1815_vm3, %v2135_v24  ;;  %v2297_v8 = vpack.c.bf16 %v2281_v12, %v2281_v12 }
 0x371   : > { %2923 = vmatpush.bf16.msrb.mxu2 %v2914_v2  ;;  %v2298_v42 = vpack.c.bf16 %v2282_v38, %v2282_v38 }
 0x374   : > { %v2227_v54 = vpop.xlane.xlu2 %2226  ;;  %v2159_v32 = vpop.xlane.xlu1 %2158 }
 0x375   : > { %4898 = vrcp.f32 %v2227_v54  ;;  %v6042_v43 = vpop.f32.mrf.mxu3 }
 0x37a   : > { %4763 = vxpose.binary.xlu2.c.b16.start.end [1/2] (short) (narrow) %v2297_v8, %v2296_v41, 16  ;;  %v6062_v41 = vpop.xlane.xlu0 %2156 }
 0x37b   : > { %v4899_v28 = vpop.eup %4898 }
 0x37c   : > { %v2283_v44 = vmul.f32 %v4899_v28, %v5899_v37 }
 0x37d   : > { %v2422_v1 = vpop.f32.mrf.mxu3 }
 0x37e   : > { %v2299_v27 = vpack.c.bf16 %v2283_v44, %v2283_v44 }
 0x380   : > { %4766 = vxpose.binary.xlu1.c.b16.start.end [1/2] (short) (narrow) %v2299_v27, %v2298_v42, 16 }
 0x384   : > { %v2161_v28 = vpop.xlane.xlu0 %2160 }
 0x385   : > { %v6046_v58 = vpop.f32.mrf.mxu3  ;;  %v2230_v13 = vpop.xlane.xlu1 %2229  ;;  %v2180_v42 = vsub.f32 %v5925_v18, %v2161_v28 }
 0x386   : > { %4900 = vrcp.f32 %v2230_v13 }
 0x387   : > { %v2208_v27 = vmul.f32 1.442695, %v2180_v42 }
 0x38c   : > { %v4901_v23 = vpop.eup %4900 }
 0x38d   : > { %v2441_v0 = vpop.f32.mrf.mxu3  ;;  %v6048_v9 = vpop.f32.mrf.mxu0  ;;  %v2284_v36 = vmul.f32 %v4901_v23, %v5929_v16 }
 0x38f   : > { %v2300_v30 = vpack.c.bf16 %v2284_v36, %v2284_v36 }
 0x394   : > { %v2163_v17 = vpop.xlane.xlu1 %2162 }
 0x395   : > { %v6050_v62 = vpop.f32.mrf.mxu3  ;;  %v2517_v46 = vpop.f32.mrf.mxu0 }
 0x39c   : > { %v2233_v26 = vpop.xlane.xlu1 %2232 }
 0x39d   : > { %4902 = vrcp.f32 %v2233_v26  ;;  %v2460_v31 = vpop.f32.mrf.mxu3  ;;  %v6052_v37 = vpop.f32.mrf.mxu1  ;;  %v2179_v26 = vsub.f32 %v5895_v19, %v2159_v32 }
 0x39e   : > { %4904 = vpow2.f32 %v2208_v27 }
 0x39f   : > { %v2206_v36 = vmul.f32 1.442695, %v2179_v26 }
 0x3a3   : > { %v4903_v55 = vpop.eup %4902 }
 0x3a4   : > { %v2285_v24 = vmul.f32 %v4903_v55, %v5963_v45  ;;  %v2236_v44 = vpop.xlane.xlu0 %2235  ;;  %v6071_v23 = vpop.eup %4904 }
 0x3a5   : > { %v6056_v39 = vpop.f32.mrf.mxu3  ;;  %v2536_v2 = vpop.f32.mrf.mxu1 }
 0x3a6   : > { %v2301_v3 = vpack.c.bf16 %v2285_v24, %v2285_v24  ;;  %v2252_v24 = vsel %vm1815_vm3, %v6071_v23, 0.0 }
 0x3a8   : > { %4769 = vxpose.binary.xlu0.c.b16.start.end [1/2] (short) (narrow) %v2301_v3, %v2300_v30, 16 }
 0x3ad   : > { %v2479_v12 = vpop.f32.mrf.mxu3 }
 0x3b3   : > { %v6058_v54 = vpop.f32.mrf.mxu2 }
 0x3b4   : > { %v2167_v13 = vpop.xlane.xlu0 %2166 }
 0x3b5   : > { %v6060_v5 = vpop.f32.mrf.mxu3  ;;  %v2183_v46 = vsub.f32 %v5999_v33, %v2167_v13 }
 0x3b7   : > { %v2214_v31 = vmul.f32 1.442695, %v2183_v46 }
 0x3b9   : > { %4906 = vpow2.f32 %v2214_v31  ;;  %v6654_v31 = vld [vmem:[#allocation42_spill] sm:$0xff] }
 0x3ba   : > { %4908 = vpow2.f32 %v2206_v36 }
 0x3bb   : > { %v2555_v8 = vpop.f32.mrf.mxu2  ;;  %4910 = vrcp.f32 %v2236_v44  ;;  %v2641_v44 = vpack.c.bf16 %v6654_v31, %v6654_v31  ;;  %v6658_v31 = vld [vmem:[#allocation56_spill] sm:$0xff] }
 0x3bc   : > { %v2239_v12 = vpop.xlane.xlu0 %2238  ;;  %v2181_v8 = vsub.f32 %v5951_v63, %v2163_v17 }
 0x3bd   : > { %v2498_v38 = vpop.f32.mrf.mxu3  ;;  %4912 = vrcp.f32 %v2239_v12 }
 0x3bf   : > { %v6077_v18 = vpop.eup %4906 }
 0x3c0   : > { %v6079_v30 = vpop.eup %4908  ;;  %v2261_v19 = vsel %vm1815_vm3, %v6077_v18, 0.0 }
 0x3c1   : > { %v2249_v33 = vsel %vm1815_vm3, %v6079_v30, 0.0  ;;  %v4911_v38 = vpop.eup %4910 }
 0x3c2   : > { %v2286_v42 = vmul.f32 %v4911_v38, %v5978_v21  ;;  %v2949_v21 = vsel %vm2331_vm1, %v2641_v44, 0  ;;  %v2645_v44 = vpack.c.bf16 %v6658_v31, %v6658_v31 }
 0x3c3   : > { %v4913_v28 = vpop.eup %4912 }
 0x3c4   : > { %v2287_v27 = vmul.f32 %v4913_v28, %v6005_v29  ;;  %v2302_v13 = vpack.c.bf16 %v2286_v42, %v2286_v42  ;;  %v2242_v46 = vpop.xlane.xlu2 %2241  ;;  %v6655_v29 = vld [vmem:[#allocation46_spill] sm:$0xff] }
 0x3c5   : > { %v6064_v16 = vpop.f32.mrf.mxu3  ;;  %v2642_v36 = vpack.c.bf16 %v6655_v29, %v6655_v29 }
 0x3cd   : > { %v2574_v45 = vpop.f32.mrf.mxu3  ;;  %v6066_v1 = vpop.f32.mrf.mxu0 }
 0x3ce   : > { %v2210_v45 = vmul.f32 1.442695, %v2181_v8  ;;  %v6657_v8 = vld [vmem:[#allocation52_spill] sm:$0xff] }
 0x3cf   : > { %v2644_v38 = vpack.c.bf16 %v6657_v8, %v6657_v8  ;;  %v2178_v8 = vsub.f32 %v5869_v22, %v6062_v41 }
 0x3d0   : > { %4914 = vpow2.f32 %v2210_v45 }
 0x3d1   : > { %4916 = vrcp.f32 %v2242_v46  ;;  %v3054_v45 = vsel %vm2331_vm1, %v2644_v38, 0  ;;  %v3089_v46 = vsel %vm2331_vm1, %v2645_v44, 0  ;;  %v2204_v38 = vmul.f32 1.442695, %v2178_v8 }
 0x3d5   : > { %v2593_v0 = vpop.f32.mrf.mxu0 }
 0x3d6   : > { %v2303_v0 = vpack.c.bf16 %v2287_v27, %v2287_v27  ;;  %v6090_v26 = vpop.eup %4914 }
 0x3d7   : > { %v2255_v63 = vsel %vm1815_vm3, %v6090_v26, 0.0  ;;  %v4917_v42 = vpop.eup %4916 }
 0x3d8   : > { %v2288_v27 = vmul.f32 %v4917_v42, %v6016_v35 }
 0x3dd   : > { %v6073_v55 = vpop.f32.mrf.mxu1 }
 0x3e0   : > { %2253 = vadd.xlane.f32.xlu1 %v2252_v24 }
 0x3e5   : > { %v2612_v2 = vpop.f32.mrf.mxu1 }
 0x3e6   : > { %v2984_v2 = vsel %vm2331_vm1, %v2642_v36, 0 }
 0x3e8   : > { %2262 = vadd.xlane.f32.xlu1 %v2261_v19  ;;  %v6656_v19 = vld [vmem:[#allocation49_spill] sm:$0xff] }
 0x3eb   : > { %2250 = vadd.xlane.f32.xlu2 %v2249_v33  ;;  %v2643_v33 = vpack.c.bf16 %v6656_v19, %v6656_v19 }
 0x3ed   : > { %v3019_v12 = vsel %vm2331_vm1, %v2643_v33, 0 }
 0x3f3   : > { %v6085_v32 = vpop.f32.mrf.mxu2 }
 0x3fb   : > { %v2631_v3 = vpop.f32.mrf.mxu2 }
 0x414   : > { %4772 = vxpose.binary.xlu2.c.b16.start.end [1/2] (short) (narrow) %v2302_v13, %v2303_v0, 16  ;;  %v2304_v13 = vpack.c.bf16 %v2288_v27, %v2288_v27  ;;  %v2245_v0 = vpop.xlane.xlu0 %2244 }
 0x415   : > { %4918 = vrcp.f32 %v2245_v0 }
 0x419   : > { %2256 = vadd.xlane.f32.xlu0 %v2255_v63 }
 0x41b   : > { %v4764_v17 = vpop.trf.xlu2 }
 0x41c   : > { %4544 = vmatmul.msk.bf16.vlgmr.msrb.gmra.mxu3 %vm1815_vm3, %v4764_v17  ;;  %v6659_v17 = vld [vmem:[#allocation15_spill] sm:$0xff] }
 0x41d   : > { %2958 = vmatpush.bf16.msrb.mxu3 %v2949_v21  ;;  %v2646_v21 = vpack.c.bf16 %v6659_v17, %v6659_v17 }
 0x41f   : > { %v3124_v35 = vsel %vm2331_vm1, %v2646_v21, 0 }
 0x423   : > { %v4765_v24 = vpop.trf.xlu2 }
 0x424   : > { %4545 = vmatmul.msk.bf16.vlgmr.msrb.gmra.mxu0 %vm1815_vm3, %v4765_v24  ;;  %v4919_v24 = vpop.eup %4918 }
 0x425   : > { %2993 = vmatpush.bf16.msrb.mxu0 %v2984_v2  ;;  %v2289_v2 = vmul.f32 %v4919_v24, %v6028_v4 }
 0x42c   : > { %v4767_v3 = vpop.trf.xlu1 }
 0x42d   : > { %4546 = vmatmul.msk.bf16.vlgmr.msrb.gmra.mxu1 %vm1815_vm3, %v4767_v3  ;;  %v2305_v3 = vpack.c.bf16 %v2289_v2, %v2289_v2 }
 0x42e   : > { %3028 = vmatpush.bf16.msrb.mxu1 %v3019_v12 }
 0x434   : > { %v4768_v28 = vpop.trf.xlu1 }
 0x435   : > { %4547 = vmatmul.msk.bf16.vlgmr.msra.gmra.mxu2 %vm1815_vm3, %v4768_v28 }
 0x436   : > { %3063 = vmatpush.bf16.msra.mxu2 %v3054_v45 }
 0x442   : > { %2929 = vxpose.xlu0.c.b16.start.end [1/1] (short) (narrow) %v2304_v13, 16 }
 0x454   : > { %v4770_v63 = vpop.trf.xlu0 }
 0x455   : > { %4548 = vmatmul.msk.bf16.vlgmr.msra.gmra.mxu3 %vm1815_vm3, %v4770_v63 }
 0x456   : > { %3098 = vmatpush.bf16.msra.mxu3 %v3089_v46  ;;  %v6661_v46 = vld [vmem:[#allocation22_spill] sm:$0xff] }
 0x457   : > { %v2647_v17 = vpack.c.bf16 %v6661_v46, %v6661_v46 }
 0x45c   : > { %v4771_v29 = vpop.trf.xlu0 }
 0x45d   : > { %4549 = vmatmul.msk.bf16.vlgmr.msra.gmra.mxu0 %vm1815_vm3, %v4771_v29  ;;  %v3159_v29 = vsel %vm2331_vm1, %v2647_v17, 0 }
 0x45e   : > { %3133 = vmatpush.bf16.msra.mxu0 %v3124_v35  ;;  %v2251_v36 = vpop.xlane.xlu2 %2250 }
 0x45f   : > { %4920 = vrcp.f32 %v2251_v36 }
 0x460   : > { %4922 = vpow2.f32 %v2204_v38 }
 0x465   : > { %v4921_v19 = vpop.eup %4920 }
 0x466   : > { %v2291_v33 = vmul.f32 %v4921_v19, %v6079_v30  ;;  %v4923_v28 = vpop.eup %4922  ;;  %v6660_v30 = vld [vmem:[#allocation28_spill] sm:$0xff] }
 0x467   : > { %v2246_v45 = vsel %vm1815_vm3, %v4923_v28, 0.0  ;;  %v2648_v31 = vpack.c.bf16 %v6660_v30, %v6660_v30 }
 0x468   : > { %v2307_v12 = vpack.c.bf16 %v2291_v33, %v2291_v33 }
 0x469   : > { %v3194_v22 = vsel %vm2331_vm1, %v2648_v31, 0 }
 0x46a   : > { %4775 = vxpose.binary.xlu1.c.b16.start.end [1/2] (short) (narrow) %v2305_v3, %v2307_v12, 16  ;;  %v2254_v12 = vpop.xlane.xlu1 %2253 }
 0x46b   : > { %4924 = vrcp.f32 %v2254_v12 }
 0x471   : > { %v4925_v38 = vpop.eup %4924 }
 0x485   : > { %2247 = vadd.xlane.f32.xlu2 %v2246_v45  ;;  %v2292_v45 = vmul.f32 %v4925_v38, %v6071_v23 }
 0x487   : > { %v2308_v31 = vpack.c.bf16 %v2292_v45, %v2292_v45  ;;  %v4684_v45 = vld [vmem:[%s6521_s3 + $0x48] sm:$0xff] }
 0x48c   : > { %v2257_v33 = vpop.xlane.xlu0 %2256 }
 0x49f   : > { %v6124_v42 = vpop.f32.mrf.mxu3 }
 0x4a1   : > { %v6126_v27 = vpop.f32.mrf.mxu0 }
 0x4a7   : > { %v2682_v4 = vpop.f32.mrf.mxu3 }
 0x4a9   : > { %v2717_v13 = vpop.f32.mrf.mxu0 }
 0x4aa   : > { %v6128_v0 = vpop.f32.mrf.mxu1 }
 0x4b2   : > { %v2752_v44 = vpop.f32.mrf.mxu1 }
 0x4b5   : > { %v4773_v63 = vpop.trf.xlu2 }
 0x4b6   : > { %4551 = vmatmul.msk.bf16.vlgmr.msrb.gmra.mxu2 %vm1815_vm3, %v4773_v63 }
 0x4b7   : > { %3203 = vmatpush.bf16.msrb.mxu2 %v3194_v22 }
 0x4b8   : > { %v6134_v41 = vpop.f32.mrf.mxu2 }
 0x4bd   : > { %v4774_v21 = vpop.trf.xlu2 }
 0x4be   : > { %4550 = vmatmul.msk.bf16.vlgmr.msra.gmra.mxu1 %vm1815_vm3, %v4774_v21 }
 0x4bf   : > { %3168 = vmatpush.bf16.msra.mxu1 %v3159_v29 }
 0x4c0   : > { %v2787_v35 = vpop.f32.mrf.mxu2 }
 0x4ca   : > { %2164 = vmax.xlane.f32.xlu1 %v5983_v14  ;;  %v2263_v14 = vpop.xlane.xlu1 %2262 }
 0x4d8   : > { %v6141_v36 = vpop.f32.mrf.mxu3 }
 0x4da   : > { %v6143_v24 = vpop.f32.mrf.mxu0 }
 0x4e0   : > { %v2822_v2 = vpop.f32.mrf.mxu3 }
 0x4e2   : > { %v2857_v19 = vpop.f32.mrf.mxu0 }
 0x4ee   : > { %v2937_v3 = vpop.trf.xlu0 }
 0x4ef   : > { %4552 = vmatmul.msk.bf16.vlgmr.msrb.gmra.mxu3 %vm1815_vm3, %v2937_v3 }
 0x4f0   : > { %4716 = vmatpush.bf16.msrb.mxu3 %v4684_v45 }
 0x4f8   : > { %v2248_v8 = vpop.xlane.xlu2 %2247 }
 0x4f9   : > { %4926 = vrcp.f32 %v2248_v8 }
 0x4fa   : > { %4928 = vrcp.f32 %v2263_v14 }
 0x4fb   : > { %4930 = vrcp.f32 %v2257_v33 }
 0x4ff   : > { %v4927_v4 = vpop.eup %4926 }
 0x500   : > { %v2290_v13 = vmul.f32 %v4927_v4, %v4923_v28  ;;  %v4929_v44 = vpop.eup %4928 }
 0x501   : > { %v4931_v63 = vpop.eup %4930  ;;  %v2295_v22 = vmul.f32 %v4929_v44, %v6077_v18  ;;  %v4682_v44 = vld [vmem:[%s6521_s3 + $0x38] sm:$0xff] }
 0x502   : > { %v2306_v30 = vpack.c.bf16 %v2290_v13, %v2290_v13  ;;  %v2293_v46 = vmul.f32 %v4931_v63, %v6090_v26  ;;  %v4683_v13 = vld [vmem:[%s6521_s3 + $0x40] sm:$0xff]  ;;  %v4681_v63 = vld [vmem:[%s6521_s3 + $0x30] sm:$0xff] }
 0x503   : > { %v2311_v21 = vpack.c.bf16 %v2295_v22, %v2295_v22  ;;  %4717 = vmatpush.bf16.msrb.mxu3 %v4683_v13 }
 0x504   : > { %4778 = vxpose.binary.xlu0.c.b16.start.end [1/2] (short) (narrow) %v2306_v30, %v2308_v31, 16  ;;  %v2309_v17 = vpack.c.bf16 %v2293_v46, %v2293_v46  ;;  %v3211_v46 = vpack.c.bf16 %v6128_v0, %v6023_v11  ;;  %v3210_v11 = vpack.c.bf16 %v6126_v27, %v6008_v59 }
 0x505   : > { %v3213_v0 = vpack.c.bf16 %v6141_v36, %v6042_v43 }
 0x514   : > { %4781 = vxpose.binary.xlu0.c.b16.start.end [1/2] (short) (narrow) %v2309_v17, %v2311_v21, 16 }
 0x516   : > { %v4776_v29 = vpop.trf.xlu1 }
 0x517   : > { %4555 = vmatmul.msk.bf16.vlgmr.msra.gmra.mxu2 %vm1815_vm3, %v4776_v29  ;;  %v3209_v29 = vpack.c.bf16 %v6124_v42, %v5908_v34  ;;  %v6663_v34 = vld [vmem:[#allocation19_spill] sm:$0xff] }
 0x518   : > { %3291 = vmatpush.bf16.msra.mxu2 %v4684_v45 }
 0x51c   : > { %3292 = vmatpush.bf16.msra.mxu2 %v4683_v13 }
 0x51e   : > { %v4777_v23 = vpop.trf.xlu1 }
 0x51f   : > { %4553 = vmatmul.msk.bf16.vlgmr.msrb.gmra.mxu0 %vm1815_vm3, %v4777_v23  ;;  %v3212_v23 = vpack.c.bf16 %v6134_v41, %v6034_v52  ;;  %v3214_v52 = vpack.c.bf16 %v6143_v24, %v6046_v58  ;;  %v6664_v41 = vld [vmem:[#allocation25_spill] sm:$0xff] }
 0x520   : > { %3392 = vmatpush.bf16.msrb.mxu0 %v4682_v44  ;;  %v6666_v24 = vld [vmem:[#allocation33_spill] sm:$0xff] }
 0x524   : > { %3393 = vmatpush.bf16.msrb.mxu0 %v4681_v63  ;;  %v6672_v63 = vld [vmem:[#allocation50_spill] sm:$0xff] }
 0x539   : > { %v2925_v28 = vpop.f32.mrf.mxu2 }
 0x53a   : > { %v3216_v58 = vpack.c.bf16 %v2925_v28, %v6056_v39 }
 0x53b   : > { %v2890_v35 = vpop.f32.mrf.mxu1 }
 0x53c   : > { %v3215_v43 = vpack.c.bf16 %v2890_v35, %v6050_v62  ;;  %v6667_v62 = vld [vmem:[#allocation35_spill] sm:$0xff] }
 0x53d   : > { %v2165_v33 = vpop.xlane.xlu1 %2164 }
 0x53e   : > { %v2182_v12 = vsub.f32 %v5976_v20, %v2165_v33 }
 0x540   : > { %v2212_v18 = vmul.f32 1.442695, %v2182_v12 }
 0x541   : > { %v2927_v2 = vpop.f32.mrf.mxu2 }
 0x542   : > { %4932 = vpow2.f32 %v2212_v18  ;;  %v6662_v2 = vld [vmem:[#allocation12_spill] sm:$0xff] }
 0x543   : > { %v2892_v19 = vpop.f32.mrf.mxu1 }
 0x544   : > { %v6665_v19 = vld [vmem:[#allocation31_spill] sm:$0xff] }
 0x548   : > { %v4933_v26 = vpop.eup %4932 }
 0x549   : > { %v2258_v38 = vsel %vm1815_vm3, %v4933_v26, 0.0 }
 0x572   : > { %v2960_v3 = vpop.f32.mrf.mxu3 }
 0x573   : > { %v3217_v33 = vpack.c.bf16 %v2960_v3, %v6060_v5 }
 0x57a   : > { %v2962_v8 = vpop.f32.mrf.mxu3 }
 0x57b   : > { %v6668_v8 = vld [vmem:[#allocation37_spill] sm:$0xff] }
 0x585   : > { %2259 = vadd.xlane.f32.xlu0 %v2258_v38  ;;  %v6669_v38 = vld [vmem:[#allocation40_spill] sm:$0xff] }
 0x59a   : > { %v6156_v4 = vpop.f32.mrf.mxu2 }
 0x59b   : > { %v3220_v13 = vpack.c.bf16 %v6156_v4, %v6058_v54 }
 0x59c   : > { %v2995_v20 = vpop.f32.mrf.mxu0 }
 0x59d   : > { %v3218_v35 = vpack.c.bf16 %v2995_v20, %v6048_v9  ;;  %v6670_v20 = vld [vmem:[#allocation44_spill] sm:$0xff] }
 0x5a2   : > { %v3067_v14 = vpop.f32.mrf.mxu2 }
 0x5a4   : > { %v2997_v30 = vpop.f32.mrf.mxu0 }
 0x5a5   : > { %v6671_v30 = vld [vmem:[#allocation47_spill] sm:$0xff] }
 0x5b0   : > { %v4779_v31 = vpop.trf.xlu0 }
 0x5b1   : > { %4556 = vmatmul.msk.bf16.vlgmr.msra.gmra.mxu3 %vm1815_vm3, %v4779_v31 }
 0x5b8   : > { %v4780_v22 = vpop.trf.xlu0 }
 0x5b9   : > { %4554 = vmatmul.msk.bf16.vlgmr.msrb.gmra.mxu1 %vm1815_vm3, %v4780_v22  ;;  %v6673_v22 = vld [vmem:[#allocation53_spill] sm:$0xff] }
 0x5c0   : > { %v4782_v17 = vpop.trf.xlu0 }
 0x5c1   : > { %4559 = vmatmul.msk.bf16.vlgmr.msrb.gmra.mxu2 %vm1815_vm3, %v4782_v17  ;;  %4570 = vmatmul.msk.bf16.vlgmr.msrb.gmra.mxu3 %vm528_vm0, %v3211_v46 }
 0x5c8   : > { %v4783_v21 = vpop.trf.xlu0 }
 0x5c9   : > { %4557 = vmatmul.msk.bf16.vlgmr.msra.gmra.mxu0 %vm1815_vm3, %v4783_v21 }
 0x5d1   : > { %4568 = vmatmul.msk.bf16.vlgmr.msra.gmra.mxu2 %vm528_vm0, %v3209_v29  ;;  %4571 = vmatmul.msk.bf16.gmra.mxu3 %vm528_vm0, %v3212_v23  ;;  %v6674_v23 = vld [vmem:[#allocation58_spill] sm:$0xff] }
 0x5d9   : > { %4592 = vmatmul.msk.bf16.vlgmr.msrb.gmra.mxu0 %vm528_vm0, %v6662_v2 }
 0x5e1   : > { %4569 = vmatmul.msk.bf16.gmra.mxu2 %vm528_vm0, %v3210_v11  ;;  %4572 = vmatmul.msk.bf16.gmra.mxu3 %vm528_vm0, %v3213_v0 }
 0x5e9   : > { %4593 = vmatmul.msk.bf16.gmra.mxu0 %vm528_vm0, %v6663_v34 }
 0x5f1   : > { %4573 = vmatmul.msk.bf16.gmra.mxu3 %vm528_vm0, %v3214_v52 }
 0x5f8   : > { %v2260_v42 = vpop.xlane.xlu0 %2259 }
 0x5f9   : > { %4934 = vrcp.f32 %v2260_v42  ;;  %4594 = vmatmul.msk.bf16.gmra.mxu0 %vm528_vm0, %v6664_v41  ;;  %v6675_v41 = vld [vmem:[#allocation16_spill] sm:$0xff] }
 0x5ff   : > { %v4935_v59 = vpop.eup %4934 }
 0x600   : > { %v2294_v27 = vmul.f32 %v4935_v59, %v4933_v26 }
 0x601   : > { %4574 = vmatmul.msk.bf16.gmra.mxu3 %vm528_vm0, %v3215_v43  ;;  %v6246_v43 = vld [vmem:[%s6522_s4 + $0x3] ss:$0 sm:$0xff] }
 0x602   : > { %v2310_v36 = vpack.c.bf16 %v2294_v27, %v2294_v27 }
 0x604   : > { %3139 = vxpose.xlu2.c.b16.start.end [1/1] (short) (narrow) %v2310_v36, 16 }
 0x609   : > { %4595 = vmatmul.msk.bf16.gmra.mxu0 %vm528_vm0, %v6665_v19 }
 0x611   : > { %4575 = vmatmul.msk.bf16.gmra.mxu3 %vm528_vm0, %v3216_v58 }
 0x619   : > { %4596 = vmatmul.msk.bf16.gmra.mxu0 %vm528_vm0, %v6666_v24 }
 0x621   : > { %4576 = vmatmul.msk.bf16.gmra.mxu3 %vm528_vm0, %v3217_v33 }
 0x629   : > { %4597 = vmatmul.msk.bf16.gmra.mxu0 %vm528_vm0, %v6667_v62 }
 0x631   : > { %4577 = vmatmul.msk.bf16.gmra.mxu3 %vm528_vm0, %v3218_v35 }
 0x634   : > { %v3100_v12 = vpop.f32.mrf.mxu3 }
 0x636   : > { %v3030_v18 = vpop.f32.mrf.mxu1 }
 0x637   : > { %v3219_v26 = vpack.c.bf16 %v3030_v18, %v6052_v37  ;;  %v3221_v37 = vpack.c.bf16 %v3100_v12, %v6064_v16  ;;  %v4686_v16 = vld [vmem:[%s6521_s3 + $0x58] sm:$0xff] }
 0x638   : > { %3623 = vmatpush.bf16.msrb.mxu1 %v4686_v16 }
 0x639   : > { %4598 = vmatmul.msk.bf16.gmra.mxu0 %vm528_vm0, %v6668_v8 }
 0x63c   : > { %v3102_v39 = vpop.f32.mrf.mxu3 }
 0x63e   : > { %v3032_v28 = vpop.f32.mrf.mxu1 }
 0x63f   : > { %v6676_v28 = vld [vmem:[#allocation23_spill] sm:$0xff] }
 0x641   : > { %4578 = vmatmul.msk.bf16.gmra.mxu3 %vm528_vm0, %v3219_v26 }
 0x644   : > { %v6213_v5 = vpop.f32.mrf.mxu2  ;;  %v3304_v17 = vpop.f32.mrf.mxu3 }
 0x646   : > { %v3135_v3 = vpop.f32.mrf.mxu0 }
 0x647   : > { %v3222_v31 = vpack.c.bf16 %v3135_v3, %v6066_v1  ;;  %v4685_v1 = vld [vmem:[%s6521_s3 + $0x50] sm:$0xff] }
 0x648   : > { %3624 = vmatpush.bf16.msrb.mxu1 %v4685_v1 }
 0x649   : > { %4599 = vmatmul.msk.bf16.gmra.mxu0 %vm528_vm0, %v6669_v38 }
 0x64c   : > { %v3207_v9 = vpop.f32.mrf.mxu2  ;;  %v3306_v2 = vpop.f32.mrf.mxu3 }
 0x64e   : > { %v3137_v45 = vpop.f32.mrf.mxu0 }
 0x651   : > { %4579 = vmatmul.msk.bf16.gmra.mxu3 %vm528_vm0, %v3220_v13 }
 0x654   : > { %v3294_v21 = vpop.f32.mrf.mxu2  ;;  %v3309_v34 = vpop.f32.mrf.mxu3 }
 0x656   : > { %v3395_v14 = vpop.f32.mrf.mxu0 }
 0x657   : > { %v3396_v59 = vadd.f32 %v3395_v14, %v3294_v21 }
 0x659   : > { %4600 = vmatmul.msk.bf16.gmra.mxu0 %vm528_vm0, %v6670_v20  ;;  %v3476_v58 = vadd.f32 %v6246_v43, %v3396_v59 }
 0x65b   : > { %v3508_v62 = vmax.f32 %v3476_v58, 0.0 }
 0x65c   : > { %v3296_v11 = vpop.f32.mrf.mxu2  ;;  %v3311_v24 = vpop.f32.mrf.mxu3 }
 0x65e   : > { %v3397_v44 = vpop.f32.mrf.mxu0 }
 0x65f   : > { %v3398_v42 = vadd.f32 %v3397_v44, %v3296_v11 }
 0x661   : > { %4580 = vmatmul.msk.bf16.gmra.mxu3 %vm528_vm0, %v3221_v37  ;;  %v3477_v27 = vadd.f32 %v6246_v43, %v3398_v42 }
 0x663   : > { %v3509_v33 = vmax.f32 %v3477_v27, 0.0 }
 0x664   : > { %v3299_v36 = vpop.f32.mrf.mxu2  ;;  %v3314_v39 = vpop.f32.mrf.mxu3 }
 0x665   : > { %v3540_v35 = vpack.c.bf16 %v3509_v33, %v3508_v62 }
 0x666   : > { %v3400_v54 = vpop.f32.mrf.mxu0 }
 0x667   : > { %v3401_v26 = vadd.f32 %v3400_v54, %v3299_v36 }
 0x669   : > { %4601 = vmatmul.msk.bf16.gmra.mxu0 %vm528_vm0, %v6671_v30  ;;  %v3478_v38 = vadd.f32 %v6246_v43, %v3401_v26  ;;  %v6677_v30 = vld [vmem:[#allocation29_spill] sm:$0xff] }
 0x66b   : > { %v3510_v13 = vmax.f32 %v3478_v38, 0.0 }
 0x66c   : > { %v3301_v12 = vpop.f32.mrf.mxu2  ;;  %v3316_v20 = vpop.f32.mrf.mxu3 }
 0x66e   : > { %v3402_v4 = vpop.f32.mrf.mxu0 }
 0x66f   : > { %v3403_v8 = vadd.f32 %v3402_v4, %v3301_v12 }
 0x671   : > { %4581 = vmatmul.msk.bf16.gmra.mxu3 %vm528_vm0, %v3222_v31  ;;  %v3479_v3 = vadd.f32 %v6246_v43, %v3403_v8 }
 0x673   : > { %v3511_v9 = vmax.f32 %v3479_v3, 0.0 }
 0x674   : > { %v3319_v54 = vpop.f32.mrf.mxu3 }
 0x675   : > { %v3541_v37 = vpack.c.bf16 %v3511_v9, %v3510_v13 }
 0x676   : > { %v3405_v46 = vpop.f32.mrf.mxu0 }
 0x677   : > { %v3406_v31 = vadd.f32 %v3405_v46, %v3304_v17 }
 0x679   : > { %4602 = vmatmul.msk.bf16.gmra.mxu0 %vm528_vm0, %v6672_v63  ;;  %v3480_v4 = vadd.f32 %v6246_v43, %v3406_v31 }
 0x67b   : > { %v3512_v16 = vmax.f32 %v3480_v4, 0.0 }
 0x67e   : > { %v3407_v29 = vpop.f32.mrf.mxu0 }
 0x67f   : > { %v3408_v14 = vadd.f32 %v3407_v29, %v3306_v2 }
 0x681   : > { %v3481_v63 = vadd.f32 %v6246_v43, %v3408_v14 }
 0x686   : > { %v3410_v0 = vpop.f32.mrf.mxu0 }
 0x689   : > { %4603 = vmatmul.msk.bf16.gmra.mxu0 %vm528_vm0, %v6673_v22  ;;  %v3513_v22 = vmax.f32 %v3481_v63, 0.0 }
 0x68b   : > { %v3542_v1 = vpack.c.bf16 %v3513_v22, %v3512_v16 }
 0x68e   : > { %v3412_v19 = vpop.f32.mrf.mxu0 }
 0x68f   : > { %v3413_v11 = vadd.f32 %v3412_v19, %v3311_v24 }
 0x691   : > { %v3483_v29 = vadd.f32 %v6246_v43, %v3413_v11 }
 0x693   : > { %v3515_v17 = vmax.f32 %v3483_v29, 0.0 }
 0x696   : > { %v3415_v18 = vpop.f32.mrf.mxu0 }
 0x697   : > { %v3416_v58 = vadd.f32 %v3415_v18, %v3314_v39 }
 0x699   : > { %4604 = vmatmul.msk.bf16.gmra.mxu0 %vm528_vm0, %v6674_v23  ;;  %v3321_v23 = vpop.f32.mrf.mxu3  ;;  %v3484_v19 = vadd.f32 %v6246_v43, %v3416_v58 }
 0x69e   : > { %v3417_v45 = vpop.f32.mrf.mxu0 }
 0x69f   : > { %v3418_v27 = vadd.f32 %v3417_v45, %v3316_v20 }
 0x6a1   : > { %v3324_v42 = vpop.f32.mrf.mxu3  ;;  %v3485_v62 = vadd.f32 %v6246_v43, %v3418_v27 }
 0x6a5   : > { %v3147_v52 = vpop.trf.xlu2 }
 0x6a6   : > { %4558 = vmatmul.msk.bf16.vlgmr.msra.gmra.mxu1 %vm1815_vm3, %v3147_v52  ;;  %v3420_v44 = vpop.f32.mrf.mxu0  ;;  %v3411_v52 = vadd.f32 %v3410_v0, %v3309_v34  ;;  %v3517_v0 = vmax.f32 %v3485_v62, 0.0  ;;  %v3516_v34 = vmax.f32 %v3484_v19, 0.0 }
 0x6a8   : > { %v3482_v2 = vadd.f32 %v6246_v43, %v3411_v52 }
 0x6a9   : > { %4605 = vmatmul.msk.bf16.gmra.mxu0 %vm528_vm0, %v6675_v41  ;;  %v3326_v33 = vpop.f32.mrf.mxu3 }
 0x6aa   : > { %v3514_v41 = vmax.f32 %v3482_v2, 0.0 }
 0x6ac   : > { %v3543_v59 = vpack.c.bf16 %v3515_v17, %v3514_v41 }
 0x6ae   : > { %v3422_v21 = vpop.f32.mrf.mxu0 }
 0x6af   : > { %v3423_v8 = vadd.f32 %v3422_v21, %v3321_v23 }
 0x6b1   : > { %v3329_v12 = vpop.f32.mrf.mxu3  ;;  %v3487_v26 = vadd.f32 %v6246_v43, %v3423_v8 }
 0x6b3   : > { %v3519_v39 = vmax.f32 %v3487_v26, 0.0 }
 0x6b6   : > { %4616 = vmatmul.msk.bf16.vlgmr.msrb.gmra.mxu1 %vm528_vm0, %v3540_v35  ;;  %v3425_v46 = vpop.f32.mrf.mxu0  ;;  %v3544_v35 = vpack.c.bf16 %v3517_v0, %v3516_v34  ;;  %v6283_v34 = vld [vmem:[%s6522_s4 + $0x4] ss:$0 sm:$0xff] }
 0x6b7   : > { %v3426_v14 = vadd.f32 %v3425_v46, %v3324_v42 }
 0x6b9   : > { %4606 = vmatmul.msk.bf16.gmra.mxu0 %vm528_vm0, %v6676_v28  ;;  %v3421_v28 = vadd.f32 %v3420_v44, %v3319_v54  ;;  %v3331_v18 = vpop.f32.mrf.mxu3  ;;  %v3488_v31 = vadd.f32 %v6246_v43, %v3426_v14 }
 0x6bb   : > { %v3486_v38 = vadd.f32 %v6246_v43, %v3421_v28  ;;  %v3520_v54 = vmax.f32 %v3488_v31, 0.0 }
 0x6bd   : > { %v3518_v9 = vmax.f32 %v3486_v38, 0.0 }
 0x6be   : > { %v3427_v36 = vpop.f32.mrf.mxu0 }
 0x6bf   : > { %v3545_v45 = vpack.c.bf16 %v3519_v39, %v3518_v9  ;;  %v3428_v20 = vadd.f32 %v3427_v36, %v3326_v33 }
 0x6c6   : > { %4617 = vmatmul.msk.bf16.gmra.mxu1 %vm528_vm0, %v3541_v37  ;;  %v3430_v24 = vpop.f32.mrf.mxu0  ;;  %v3334_v37 = vpop.f32.mrf.mxu3 }
 0x6c9   : > { %4607 = vmatmul.msk.bf16.gmra.mxu0 %vm528_vm0, %v6677_v30  ;;  %v3489_v30 = vadd.f32 %v6246_v43, %v3428_v20 }
 0x6cb   : > { %v3521_v44 = vmax.f32 %v3489_v30, 0.0 }
 0x6cd   : > { %v3546_v22 = vpack.c.bf16 %v3521_v44, %v3520_v54 }
 0x6ce   : > { %v3432_v3 = vpop.f32.mrf.mxu0  ;;  %v3336_v4 = vpop.f32.mrf.mxu3 }
 0x6cf   : > { %v3433_v16 = vadd.f32 %v3432_v3, %v3331_v18 }
 0x6d1   : > { %v3491_v23 = vadd.f32 %v6246_v43, %v3433_v16 }
 0x6d3   : > { %v3523_v29 = vmax.f32 %v3491_v23, 0.0 }
 0x6d6   : > { %4618 = vmatmul.msk.bf16.gmra.mxu1 %vm528_vm0, %v3542_v1  ;;  %v3435_v13 = vpop.f32.mrf.mxu0  ;;  %v3431_v1 = vadd.f32 %v3430_v24, %v3329_v12  ;;  %v3339_v11 = vpop.f32.mrf.mxu3  ;;  %v3224_v12 = vpack.c.bf16 %v6213_v5, %v6085_v32 }
 0x6d7   : > { %v3436_v36 = vadd.f32 %v3435_v13, %v3334_v37  ;;  %v6678_v37 = vld [vmem:[#allocation7_spill] sm:$0xff] }
 0x6d8   : > { %v3490_v52 = vadd.f32 %v6246_v43, %v3431_v1 }
 0x6d9   : > { %v3492_v62 = vadd.f32 %v6246_v43, %v3436_v36 }
 0x6da   : > { %v3522_v2 = vmax.f32 %v3490_v52, 0.0 }
 0x6db   : > { %v3524_v24 = vmax.f32 %v3492_v62, 0.0 }
 0x6dc   : > { %v3547_v17 = vpack.c.bf16 %v3523_v29, %v3522_v2 }
 0x6de   : > { %v3437_v63 = vpop.f32.mrf.mxu0 }
 0x6df   : > { %v3438_v27 = vadd.f32 %v3437_v63, %v3336_v4 }
 0x6e1   : > { %v3493_v33 = vadd.f32 %v6246_v43, %v3438_v27 }
 0x6e3   : > { %v3525_v0 = vmax.f32 %v3493_v33, 0.0 }
 0x6e5   : > { %v3548_v8 = vpack.c.bf16 %v3525_v0, %v3524_v24  ;;  %v6679_v0 = vld [vmem:[#allocation6_spill] sm:$0xff] }
 0x6e6   : > { %4619 = vmatmul.msk.bf16.gmra.mxu1 %vm528_vm0, %v3543_v59  ;;  %v3440_v21 = vpop.f32.mrf.mxu0  ;;  %v3341_v59 = vpop.f32.mrf.mxu3 }
 0x6e7   : > { %v3441_v39 = vadd.f32 %v3440_v21, %v3339_v11 }
 0x6e9   : > { %v3494_v5 = vadd.f32 %v6246_v43, %v3441_v39 }
 0x6eb   : > { %v3526_v44 = vmax.f32 %v3494_v5, 0.0 }
 0x6ee   : > { %v3442_v41 = vpop.f32.mrf.mxu0 }
 0x6ef   : > { %v3443_v3 = vadd.f32 %v3442_v41, %v3341_v59 }
 0x6f1   : > { %v3495_v20 = vadd.f32 %v6246_v43, %v3443_v3 }
 0x6f3   : > { %v3527_v30 = vmax.f32 %v3495_v20, 0.0 }
 0x6f5   : > { %v3549_v16 = vpack.c.bf16 %v3527_v30, %v3526_v44 }
 0x6f6   : > { %4620 = vmatmul.msk.bf16.gmra.mxu1 %vm528_vm0, %v3544_v35  ;;  %v3445_v19 = vpop.f32.mrf.mxu0 }
 0x6fe   : > { %v3447_v18 = vpop.f32.mrf.mxu0 }
 0x706   : > { %4621 = vmatmul.msk.bf16.gmra.mxu1 %vm528_vm0, %v3545_v45  ;;  %v3450_v63 = vpop.f32.mrf.mxu0 }
 0x70e   : > { %v3452_v33 = vpop.f32.mrf.mxu0 }
 0x716   : > { %4622 = vmatmul.msk.bf16.gmra.mxu1 %vm528_vm0, %v3546_v22 }
 0x723   : > { %v3170_v46 = vpop.f32.mrf.mxu1 }
 0x724   : > { %v3223_v42 = vpack.c.bf16 %v3170_v46, %v6073_v55  ;;  %v3344_v55 = vpop.f32.mrf.mxu3 }
 0x726   : > { %4582 = vmatmul.msk.bf16.gmra.mxu3 %vm528_vm0, %v3223_v42  ;;  %4623 = vmatmul.msk.bf16.gmra.mxu1 %vm528_vm0, %v3547_v17  ;;  %v3446_v17 = vadd.f32 %v3445_v19, %v3344_v55 }
 0x72b   : > { %v3172_v58 = vpop.f32.mrf.mxu1 }
 0x72c   : > { %v3346_v9 = vpop.f32.mrf.mxu3 }
 0x72d   : > { %v3448_v29 = vadd.f32 %v3447_v18, %v3346_v9 }
 0x72f   : > { %v3497_v36 = vadd.f32 %v6246_v43, %v3448_v29 }
 0x733   : > { %v3626_v35 = vpop.f32.mrf.mxu1 }
 0x734   : > { %v3627_v28 = vadd.f32 %v6283_v34, %v3626_v35  ;;  %v3349_v21 = vpop.f32.mrf.mxu3 }
 0x736   : > { %v3706_v26 = vmul.f32 %v3627_v28, %v5263_v51  ;;  %4583 = vmatmul.msk.bf16.gmra.mxu3 %vm528_vm0, %v3224_v12  ;;  %4624 = vmatmul.msk.bf16.gmra.mxu1 %vm528_vm0, %v3548_v8 }
 0x738   : > { %v3738_v38 = vsel %vm528_vm0, %v3706_v26, 0.0  ;;  %v3529_v26 = vmax.f32 %v3497_v36, 0.0 }
 0x739   : > { %v3739_v45 = vrot.slane %v3738_v38, 4 }
 0x73b   : > { %v3628_v13 = vpop.f32.mrf.mxu1  ;;  %v3740_v14 = vadd.f32 %v3739_v45, %v3738_v38 }
 0x73c   : > { %v3629_v32 = vadd.f32 %v6283_v34, %v3628_v13  ;;  %v3351_v35 = vpop.f32.mrf.mxu3 }
 0x73d   : > { %v3741_v54 = vrot.slane %v3740_v14, 2 }
 0x73e   : > { %v3707_v51 = vmul.f32 %v3629_v32, %v6678_v37 }
 0x73f   : > { %v3742_v11 = vadd.f32 %v3741_v54, %v3740_v14  ;;  %v3455_v14 = vpop.f32.mrf.mxu0 }
 0x740   : > { %v3850_v31 = vsel %vm528_vm0, %v3707_v51, 0.0 }
 0x741   : > { %v3851_v4 = vrot.slane %v3850_v31, 4  ;;  %v3743_v42 = vrot.slane %v3742_v11, 1 }
 0x743   : > { %v3631_v22 = vpop.f32.mrf.mxu1  ;;  %v3852_v52 = vadd.f32 %v3851_v4, %v3850_v31  ;;  %v3744_v12 = vadd.f32 %v3743_v42, %v3742_v11  ;;  %v3453_v4 = vadd.f32 %v3452_v33, %v3351_v35 }
 0x744   : > { %v3632_v1 = vadd.f32 %v6283_v34, %v3631_v22 }
 0x745   : > { %v3853_v41 = vrot.slane %v3852_v52, 2  ;;  %v3962_v18 = vpack.c.bf16 %v3744_v12, %v3744_v12 }
 0x746   : > { %v3708_v23 = vmul.f32 %v3632_v1, %v5261_v50  ;;  %4625 = vmatmul.msk.bf16.gmra.mxu1 %vm528_vm0, %v3549_v16  ;;  %v3496_v50 = vadd.f32 %v6246_v43, %v3446_v17  ;;  %v3354_v16 = vpop.f32.mrf.mxu3  ;;  %v3499_v17 = vadd.f32 %v6246_v43, %v3453_v4 }
 0x747   : > { %v3854_v8 = vadd.f32 %v3853_v41, %v3852_v52  ;;  %v4093_v30 = vunpack.c.l.b16 %v3962_v18  ;;  %v3451_v52 = vadd.f32 %v3450_v63, %v3349_v21 }
 0x748   : > { %v3745_v2 = vsel %vm528_vm0, %v3708_v23, 0.0  ;;  %v3528_v38 = vmax.f32 %v3496_v50, 0.0  ;;  %v3531_v33 = vmax.f32 %v3499_v17, 0.0 }
 0x749   : > { %v3746_v46 = vrot.slane %v3745_v2, 4  ;;  %v3855_v39 = vrot.slane %v3854_v8, 1 }
 0x74a   : > { %v3550_v20 = vpack.c.bf16 %v3529_v26, %v3528_v38  ;;  %v6680_v38 = vld [vmem:[#allocation5_spill] sm:$0xff] }
 0x74b   : > { %v3747_v59 = vadd.f32 %v3746_v46, %v3745_v2  ;;  %v3633_v27 = vpop.f32.mrf.mxu1  ;;  %v3856_v31 = vadd.f32 %v3855_v39, %v3854_v8 }
 0x74c   : > { %v3634_v58 = vadd.f32 %v6283_v34, %v3633_v27 }
 0x74d   : > { %v3748_v62 = vrot.slane %v3747_v59, 2  ;;  %v3978_v29 = vpack.c.bf16 %v3856_v31, %v3856_v31 }
 0x74e   : > { %v3709_v24 = vmul.f32 %v3634_v58, %v6679_v0  ;;  %v3356_v21 = vpop.f32.mrf.mxu3 }
 0x74f   : > { %v3749_v28 = vadd.f32 %v3748_v62, %v3747_v59  ;;  %v3498_v59 = vadd.f32 %v6246_v43, %v3451_v52  ;;  %v4010_v27 = vunpack.c.l.b16 %v3978_v29  ;;  %v3457_v62 = vpop.f32.mrf.mxu0 }
 0x750   : > { %v3857_v19 = vsel %vm528_vm0, %v3709_v24, 0.0 }
 0x751   : > { %v3750_v55 = vrot.slane %v3749_v28, 1  ;;  %v3858_v3 = vrot.slane %v3857_v19, 4  ;;  %v3530_v63 = vmax.f32 %v3498_v59, 0.0 }
 0x753   : > { %v3751_v9 = vadd.f32 %v3750_v55, %v3749_v28  ;;  %v3859_v45 = vadd.f32 %v3858_v3, %v3857_v19  ;;  %v3636_v13 = vpop.f32.mrf.mxu1  ;;  %v3551_v12 = vpack.c.bf16 %v3531_v33, %v3530_v63  ;;  %v3458_v3 = vadd.f32 %v3457_v62, %v3356_v21 }
 0x754   : > { %v3637_v32 = vadd.f32 %v6283_v34, %v3636_v13  ;;  %v3456_v13 = vadd.f32 %v3455_v14, %v3354_v16 }
 0x755   : > { %v3963_v5 = vpack.c.bf16 %v3751_v9, %v3751_v9  ;;  %v3860_v37 = vrot.slane %v3859_v45, 2 }
 0x756   : > { %v3710_v51 = vmul.f32 %v3637_v32, %v5256_v48  ;;  %4626 = vmatmul.msk.bf16.gmra.mxu1 %vm528_vm0, %v3550_v20 }
 0x757   : > { %v4094_v44 = vunpack.c.l.b16 %v3963_v5  ;;  %v3861_v54 = vadd.f32 %v3860_v37, %v3859_v45  ;;  %v3460_v20 = vpop.f32.mrf.mxu0  ;;  %v3501_v37 = vadd.f32 %v6246_v43, %v3458_v3 }
 0x758   : > { %v3752_v22 = vsel %vm528_vm0, %v3710_v51, 0.0 }
 0x759   : > { %v4109_v1 = vsel %vm4026_vm4, %v4094_v44, %v4093_v30  ;;  %v3862_v23 = vrot.slane %v3861_v54, 1  ;;  %v3753_v11 = vrot.slane %v3752_v22, 4  ;;  %v3359_v30 = vpop.f32.mrf.mxu3  ;;  %v3500_v44 = vadd.f32 %v6246_v43, %v3456_v13 }
 0x75b   : > { %v3863_v2 = vadd.f32 %v3862_v23, %v3861_v54  ;;  %v3754_v46 = vadd.f32 %v3753_v11, %v3752_v22  ;;  %v3638_v48 = vpop.f32.mrf.mxu1  ;;  %v6681_v54 = vld [vmem:[#allocation8_spill] sm:$0xff]  ;;  %v3532_v52 = vmax.f32 %v3500_v44, 0.0 }
 0x75c   : > { %v3639_v8 = vadd.f32 %v6283_v34, %v3638_v48 }
 0x75d   : > { %v3979_v42 = vpack.c.bf16 %v3863_v2, %v3863_v2  ;;  %v3755_v41 = vrot.slane %v3754_v46, 2 }
 0x75e   : > { %v3711_v18 = vmul.f32 %v3639_v8, %v6680_v38  ;;  %v6682_v38 = vld [vmem:[#allocation9_spill] sm:$0xff] }
 0x75f   : > { %v4011_v36 = vunpack.c.l.b16 %v3979_v42  ;;  %v3756_v58 = vadd.f32 %v3755_v41, %v3754_v46  ;;  %v3462_v41 = vpop.f32.mrf.mxu0 }
 0x760   : > { %v3864_v51 = vsel %vm528_vm0, %v3711_v18, 0.0 }
 0x761   : > { %v6314_v50 = vsel %vm4026_vm4, %v4011_v36, %v4010_v27  ;;  %v3757_v0 = vrot.slane %v3756_v58, 1  ;;  %v3865_v22 = vrot.slane %v3864_v51, 4  ;;  %v3361_v36 = vpop.f32.mrf.mxu3 }
 0x762   : > { %v3463_v62 = vadd.f32 %v3462_v41, %v3361_v36 }
 0x763   : > { %v3758_v24 = vadd.f32 %v3757_v0, %v3756_v58  ;;  %v3641_v35 = vpop.f32.mrf.mxu1  ;;  %v3866_v29 = vadd.f32 %v3865_v22, %v3864_v51 }
 0x764   : > { %v3642_v28 = vadd.f32 %v6283_v34, %v3641_v35  ;;  %v3461_v35 = vadd.f32 %v3460_v20, %v3359_v30 }
 0x765   : > { %v3964_v26 = vpack.c.bf16 %v3758_v24, %v3758_v24  ;;  %v3867_v58 = vrot.slane %v3866_v29, 2 }
 0x766   : > { %v3712_v19 = vmul.f32 %v3642_v28, %v5283_v60  ;;  %4627 = vmatmul.msk.bf16.gmra.mxu1 %vm528_vm0, %v3551_v12  ;;  %v3502_v3 = vadd.f32 %v6246_v43, %v3461_v35 }
 0x767   : > { %v4095_v55 = vunpack.c.l.b16 %v3964_v26  ;;  %v3868_v12 = vadd.f32 %v3867_v58, %v3866_v29  ;;  %v3503_v26 = vadd.f32 %v6246_v43, %v3463_v62 }
 0x768   : > { %v3759_v39 = vsel %vm528_vm0, %v3712_v19, 0.0 }
 0x769   : > { %v4110_v9 = vsel %vm4028_vm5, %v4095_v55, %v4109_v1  ;;  %v3760_v45 = vrot.slane %v3759_v39, 4  ;;  %v3533_v1 = vmax.f32 %v3501_v37, 0.0  ;;  %v3535_v13 = vmax.f32 %v3503_v26, 0.0 }
 0x76a   : > { %v3534_v37 = vmax.f32 %v3502_v3, 0.0 }
 0x76b   : > { %v3761_v32 = vadd.f32 %v3760_v45, %v3759_v39  ;;  %v3643_v5 = vpop.f32.mrf.mxu1  ;;  %v3552_v48 = vpack.c.bf16 %v3533_v1, %v3532_v52  ;;  %v3869_v39 = vrot.slane %v3868_v12, 1 }
 0x76c   : > { %v3644_v60 = vadd.f32 %v6283_v34, %v3643_v5  ;;  %v3553_v44 = vpack.c.bf16 %v3535_v13, %v3534_v37 }
 0x76d   : > { %v3762_v31 = vrot.slane %v3761_v32, 2  ;;  %v3870_v51 = vadd.f32 %v3869_v39, %v3868_v12 }
 0x76e   : > { %v3713_v4 = vmul.f32 %v3644_v60, %v6681_v54 }
 0x76f   : > { %v3763_v23 = vadd.f32 %v3762_v31, %v3761_v32 }
 0x770   : > { %v3871_v14 = vsel %vm528_vm0, %v3713_v4, 0.0 }
 0x771   : > { %v3764_v16 = vrot.slane %v3763_v23, 1  ;;  %v3872_v11 = vrot.slane %v3871_v14, 4 }
 0x773   : > { %v3765_v2 = vadd.f32 %v3764_v16, %v3763_v23  ;;  %v3646_v46 = vpop.f32.mrf.mxu1  ;;  %v3873_v17 = vadd.f32 %v3872_v11, %v3871_v14  ;;  %v3980_v14 = vpack.c.bf16 %v3870_v51, %v3870_v51 }
 0x774   : > { %v3647_v42 = vadd.f32 %v6283_v34, %v3646_v46 }
 0x775   : > { %v3965_v59 = vpack.c.bf16 %v3765_v2, %v3765_v2  ;;  %v3874_v0 = vrot.slane %v3873_v17, 2 }
 0x776   : > { %v3714_v27 = vmul.f32 %v3647_v42, %v5286_v61  ;;  %4628 = vmatmul.msk.bf16.gmra.mxu1 %vm528_vm0, %v3552_v48 }
 0x777   : > { %v4096_v33 = vunpack.c.l.b16 %v3965_v59  ;;  %v3875_v19 = vadd.f32 %v3874_v0, %v3873_v17  ;;  %v4012_v17 = vunpack.c.l.b16 %v3980_v14  ;;  %v3465_v14 = vpop.f32.mrf.mxu0 }
 0x778   : > { %v3766_v63 = vsel %vm528_vm0, %v3714_v27, 0.0 }
 0x779   : > { %v4111_v21 = vsel %vm4030_vm6, %v4096_v33, %v4110_v9  ;;  %v3767_v24 = vrot.slane %v3766_v63, 4  ;;  %v3876_v32 = vrot.slane %v3875_v19, 1  ;;  %v6683_v33 = vld [vmem:[#allocation11_spill] sm:$0xff]  ;;  %v4029_v0 = vsel %vm4028_vm5, %v4012_v17, %v6314_v50 }
 0x77b   : > { %v3768_v8 = vadd.f32 %v3767_v24, %v3766_v63  ;;  %v3648_v28 = vpop.f32.mrf.mxu1  ;;  %v3877_v54 = vadd.f32 %v3876_v32, %v3875_v19 }
 0x77c   : > { %v3649_v61 = vadd.f32 %v6283_v34, %v3648_v28 }
 0x77d   : > { %v3769_v55 = vrot.slane %v3768_v8, 2  ;;  %v3981_v52 = vpack.c.bf16 %v3877_v54, %v3877_v54 }
 0x77e   : > { %v3715_v18 = vmul.f32 %v3649_v61, %v6682_v38 }
 0x77f   : > { %v3770_v45 = vadd.f32 %v3769_v55, %v3768_v8  ;;  %v4013_v27 = vunpack.c.l.b16 %v3981_v52 }
 0x780   : > { %v3878_v9 = vsel %vm528_vm0, %v3715_v18, 0.0 }
 0x781   : > { %v3771_v20 = vrot.slane %v3770_v45, 1  ;;  %v3879_v5 = vrot.slane %v3878_v9, 4 }
 0x783   : > { %v3772_v60 = vadd.f32 %v3771_v20, %v3770_v45  ;;  %v3880_v30 = vadd.f32 %v3879_v5, %v3878_v9  ;;  %v3651_v31 = vpop.f32.mrf.mxu1 }
 0x784   : > { %v3652_v4 = vadd.f32 %v6283_v34, %v3651_v31  ;;  %v6684_v31 = vld [vmem:[#allocation18_spill] sm:$0xff] }
 0x785   : > { %v3966_v22 = vpack.c.bf16 %v3772_v60, %v3772_v60  ;;  %v3881_v23 = vrot.slane %v3880_v30, 2 }
 0x786   : > { %v3716_v1 = vmul.f32 %v3652_v4, %v5290_v7  ;;  %4629 = vmatmul.msk.bf16.gmra.mxu1 %vm528_vm0, %v3553_v44 }
 0x787   : > { %v4097_v16 = vunpack.c.l.b16 %v3966_v22  ;;  %v3882_v11 = vadd.f32 %v3881_v23, %v3880_v30 }
 0x788   : > { %v3773_v29 = vsel %vm528_vm0, %v3716_v1, 0.0 }
 0x789   : > { %v4112_v2 = vsel %vm4032_vm7, %v4097_v16, %v4111_v21  ;;  %v3883_v46 = vrot.slane %v3882_v11, 1  ;;  %v3774_v48 = vrot.slane %v3773_v29, 4  ;;  %v4031_v21 = vsel %vm4030_vm6, %v4013_v27, %v4029_v0 }
 0x78b   : > { %v3884_v42 = vadd.f32 %v3883_v46, %v3882_v11  ;;  %v3775_v41 = vadd.f32 %v3774_v48, %v3773_v29  ;;  %v3653_v59 = vpop.f32.mrf.mxu1 }
 0x78c   : > { %v3654_v36 = vadd.f32 %v6283_v34, %v3653_v59 }
 0x78d   : > { %v3982_v7 = vpack.c.bf16 %v3884_v42, %v3884_v42  ;;  %v3776_v58 = vrot.slane %v3775_v41, 2 }
 0x78e   : > { %v3717_v62 = vmul.f32 %v3654_v36, %v6683_v33 }
 0x78f   : > { %v4014_v63 = vunpack.c.l.b16 %v3982_v7  ;;  %v3777_v24 = vadd.f32 %v3776_v58, %v3775_v41 }
 0x790   : > { %v3885_v35 = vsel %vm528_vm0, %v3717_v62, 0.0 }
 0x791   : > { %v4033_v12 = vsel %vm4032_vm7, %v4014_v63, %v4031_v21  ;;  %v3778_v8 = vrot.slane %v3777_v24, 1  ;;  %v3886_v28 = vrot.slane %v3885_v35, 4  ;;  %v3467_v63 = vpop.f32.mrf.mxu0 }
 0x793   : > { %v3779_v26 = vadd.f32 %v3778_v8, %v3777_v24  ;;  %v3887_v19 = vadd.f32 %v3886_v28, %v3885_v35  ;;  %v3656_v61 = vpop.f32.mrf.mxu1 }
 0x794   : > { %v3657_v55 = vadd.f32 %v6283_v34, %v3656_v61 }
 0x795   : > { %v3967_v3 = vpack.c.bf16 %v3779_v26, %v3779_v26  ;;  %v3888_v38 = vrot.slane %v3887_v19, 2 }
 0x796   : > { %v3718_v50 = vmul.f32 %v3657_v55, %v5324_v47 }
 0x797   : > { %v4098_v18 = vunpack.c.l.b16 %v3967_v3  ;;  %v3889_v39 = vadd.f32 %v3888_v38, %v3887_v19 }
 0x798   : > { %v3780_v45 = vsel %vm528_vm0, %v3718_v50, 0.0 }
 0x799   : > { %v4113_v13 = vsel %vm4034_vm8, %v4098_v18, %v4112_v2  ;;  %v3890_v32 = vrot.slane %v3889_v39, 1  ;;  %v3781_v9 = vrot.slane %v3780_v45, 4 }
 0x79b   : > { %v3891_v20 = vadd.f32 %v3890_v32, %v3889_v39  ;;  %v3782_v5 = vadd.f32 %v3781_v9, %v3780_v45  ;;  %v3658_v37 = vpop.f32.mrf.mxu1 }
 0x79c   : > { %v3659_v51 = vadd.f32 %v6283_v34, %v3658_v37 }
 0x79d   : > { %v3983_v60 = vpack.c.bf16 %v3891_v20, %v3891_v20  ;;  %v3783_v30 = vrot.slane %v3782_v5, 2 }
 0x79e   : > { %v3719_v44 = vmul.f32 %v3659_v51, %v6684_v31 }
 0x79f   : > { %v4015_v54 = vunpack.c.l.b16 %v3983_v60  ;;  %v3784_v4 = vadd.f32 %v3783_v30, %v3782_v5  ;;  %v3470_v60 = vpop.f32.mrf.mxu0 }
 0x7a0   : > { %v3892_v47 = vsel %vm528_vm0, %v3719_v44, 0.0 }
 0x7a1   : > { %v4035_v22 = vsel %vm4034_vm8, %v4015_v54, %v4033_v12  ;;  %v3785_v23 = vrot.slane %v3784_v4, 1  ;;  %v3893_v1 = vrot.slane %v3892_v47, 4  ;;  %v6685_v12 = vld [vmem:[#allocation38_spill] sm:$0xff] }
 0x7a3   : > { %v3786_v16 = vadd.f32 %v3785_v23, %v3784_v4  ;;  %v3894_v11 = vadd.f32 %v3893_v1, %v3892_v47  ;;  %v3661_v52 = vpop.f32.mrf.mxu1 }
 0x7a4   : > { %v3662_v29 = vadd.f32 %v6283_v34, %v3661_v52  ;;  %v6686_v52 = vld [vmem:[#allocation41_spill] sm:$0xff] }
 0x7a5   : > { %v3968_v2 = vpack.c.bf16 %v3786_v16, %v3786_v16  ;;  %v3895_v46 = vrot.slane %v3894_v11, 2 }
 0x7a6   : > { %v3720_v48 = vmul.f32 %v3662_v29, %v5363_v56 }
 0x7a7   : > { %v4099_v17 = vunpack.c.l.b16 %v3968_v2  ;;  %v3896_v42 = vadd.f32 %v3895_v46, %v3894_v11 }
 0x7a8   : > { %v3787_v41 = vsel %vm528_vm0, %v3720_v48, 0.0 }
 0x7a9   : > { %v4114_v59 = vsel %vm4036_vm9, %v4099_v17, %v4113_v13  ;;  %v3897_v27 = vrot.slane %v3896_v42, 1  ;;  %v3788_v36 = vrot.slane %v3787_v41, 4  ;;  %v3364_v7 = vpop.f32.mrf.mxu3  ;;  %v3472_v17 = vpop.f32.mrf.mxu0 }
 0x7aa   : > { %v3466_v35 = vadd.f32 %v3465_v14, %v3364_v7 }
 0x7ab   : > { %v3898_v58 = vadd.f32 %v3897_v27, %v3896_v42  ;;  %v3789_v33 = vadd.f32 %v3788_v36, %v3787_v41  ;;  %v3663_v62 = vpop.f32.mrf.mxu1 }
 0x7ac   : > { %v3664_v0 = vadd.f32 %v6283_v34, %v3663_v62  ;;  %v3504_v38 = vadd.f32 %v6246_v43, %v3466_v35 }
 0x7ad   : > { %v3984_v24 = vpack.c.bf16 %v3898_v58, %v3898_v58  ;;  %v3790_v21 = vrot.slane %v3789_v33, 2 }
 0x7ae   : > { %v3721_v56 = vmul.f32 %v3664_v0, %v6685_v12  ;;  %v3536_v5 = vmax.f32 %v3504_v38, 0.0 }
 0x7af   : > { %v4016_v8 = vunpack.c.l.b16 %v3984_v24  ;;  %v3791_v28 = vadd.f32 %v3790_v21, %v3789_v33 }
 0x7b0   : > { %v3899_v26 = vsel %vm528_vm0, %v3721_v56, 0.0 }
 0x7b1   : > { %v4037_v19 = vsel %vm4036_vm9, %v4016_v8, %v4035_v22  ;;  %v3792_v61 = vrot.slane %v3791_v28, 1  ;;  %v3900_v55 = vrot.slane %v3899_v26, 4  ;;  %v3366_v3 = vpop.f32.mrf.mxu3 }
 0x7b2   : > { %v3468_v50 = vadd.f32 %v3467_v63, %v3366_v3  ;;  %v6687_v3 = vld [vmem:[#allocation45_spill] sm:$0xff] }
 0x7b3   : > { %v3793_v18 = vadd.f32 %v3792_v61, %v3791_v28  ;;  %v3901_v39 = vadd.f32 %v3900_v55, %v3899_v26  ;;  %v3666_v45 = vpop.f32.mrf.mxu1 }
 0x7b4   : > { %v3505_v13 = vadd.f32 %v6246_v43, %v3468_v50  ;;  %v3667_v32 = vadd.f32 %v6283_v34, %v3666_v45 }
 0x7b5   : > { %v3969_v9 = vpack.c.bf16 %v3793_v18, %v3793_v18  ;;  %v3902_v20 = vrot.slane %v3901_v39, 2 }
 0x7b6   : > { %v3537_v37 = vmax.f32 %v3505_v13, 0.0  ;;  %v3722_v51 = vmul.f32 %v3667_v32, %v5478_v6 }
 0x7b7   : > { %v4100_v30 = vunpack.c.l.b16 %v3969_v9  ;;  %v3903_v31 = vadd.f32 %v3902_v20, %v3901_v39 }
 0x7b8   : > { %v3554_v44 = vpack.c.bf16 %v3537_v37, %v3536_v5  ;;  %v3794_v54 = vsel %vm528_vm0, %v3722_v51, 0.0 }
 0x7b9   : > { %v6373_v4 = vsel %vm4038_vm10, %v4100_v30, %v4114_v59  ;;  %v3904_v47 = vrot.slane %v3903_v31, 1  ;;  %v3369_v22 = vpop.f32.mrf.mxu3  ;;  %v3795_v1 = vrot.slane %v3794_v54, 4 }
 0x7ba   : > { %4630 = vmatmul.msk.bf16.gmra.mxu1 %vm528_vm0, %v3554_v44  ;;  %v3471_v6 = vadd.f32 %v3470_v60, %v3369_v22 }
 0x7bb   : > { %v3905_v23 = vadd.f32 %v3904_v47, %v3903_v31  ;;  %v3668_v14 = vpop.f32.mrf.mxu1  ;;  %v3796_v46 = vadd.f32 %v3795_v1, %v3794_v54 }
 0x7bc   : > { %v3669_v16 = vadd.f32 %v6283_v34, %v3668_v14  ;;  %v3506_v59 = vadd.f32 %v6246_v43, %v3471_v6 }
 0x7bd   : > { %v3985_v11 = vpack.c.bf16 %v3905_v23, %v3905_v23  ;;  %v3797_v36 = vrot.slane %v3796_v46, 2 }
 0x7be   : > { %v3723_v29 = vmul.f32 %v3669_v16, %v6686_v52  ;;  %v3538_v0 = vmax.f32 %v3506_v59, 0.0 }
 0x7bf   : > { %v4017_v2 = vunpack.c.l.b16 %v3985_v11  ;;  %v3798_v21 = vadd.f32 %v3797_v36, %v3796_v46 }
 0x7c0   : > { %v3906_v48 = vsel %vm528_vm0, %v3723_v29, 0.0 }
 0x7c1   : > { %v6380_v42 = vsel %vm4038_vm10, %v4017_v2, %v4037_v19  ;;  %v3371_v41 = vpop.f32.mrf.mxu3  ;;  %v3907_v7 = vrot.slane %v3906_v48, 4  ;;  %v3799_v28 = vrot.slane %v3798_v21, 1 }
 0x7c2   : > { %v3473_v27 = vadd.f32 %v3472_v17, %v3371_v41  ;;  %v6688_v17 = vld [vmem:[#allocation48_spill] sm:$0xff] }
 0x7c3   : > { %v3671_v58 = vpop.f32.mrf.mxu1  ;;  %v3908_v35 = vadd.f32 %v3907_v7, %v3906_v48  ;;  %v3800_v50 = vadd.f32 %v3799_v28, %v3798_v21 }
 0x7c4   : > { %v3507_v33 = vadd.f32 %v6246_v43, %v3473_v27  ;;  %v3672_v62 = vadd.f32 %v6283_v34, %v3671_v58 }
 0x7c5   : > { %v3909_v26 = vrot.slane %v3908_v35, 2  ;;  %v3970_v32 = vpack.c.bf16 %v3800_v50, %v3800_v50 }
 0x7c6   : > { %v3539_v63 = vmax.f32 %v3507_v33, 0.0  ;;  %v3724_v24 = vmul.f32 %v3672_v62, %v5503_v49 }
 0x7c7   : > { %v3910_v18 = vadd.f32 %v3909_v26, %v3908_v35  ;;  %v4101_v44 = vunpack.c.l.b16 %v3970_v32 }
 0x7c8   : > { %v3555_v12 = vpack.c.bf16 %v3539_v63, %v3538_v0  ;;  %v3801_v56 = vsel %vm528_vm0, %v3724_v24, 0.0 }
 0x7c9   : > { %v3802_v8 = vrot.slane %v3801_v56, 4  ;;  %v3911_v9 = vrot.slane %v3910_v18, 1 }
 0x7ca   : > { %4631 = vmatmul.msk.bf16.gmra.mxu1 %vm528_vm0, %v3555_v12 }
 0x7cb   : > { %v3803_v19 = vadd.f32 %v3802_v8, %v3801_v56  ;;  %v3673_v61 = vpop.f32.mrf.mxu1  ;;  %v3912_v54 = vadd.f32 %v3911_v9, %v3910_v18 }
 0x7cc   : > { %v3674_v43 = vadd.f32 %v6283_v34, %v3673_v61 }
 0x7cd   : > { %v3804_v55 = vrot.slane %v3803_v19, 2  ;;  %v3986_v11 = vpack.c.bf16 %v3912_v54, %v3912_v54 }
 0x7ce   : > { %v3725_v38 = vmul.f32 %v3674_v43, %v6687_v3 }
 0x7cf   : > { %v3805_v49 = vadd.f32 %v3804_v55, %v3803_v19  ;;  %v4018_v41 = vunpack.c.l.b16 %v3986_v11 }
 0x7d0   : > { %v3913_v39 = vsel %vm528_vm0, %v3725_v38, 0.0 }
 0x7d1   : > { %v3806_v45 = vrot.slane %v3805_v49, 1  ;;  %v3914_v13 = vrot.slane %v3913_v39, 4 }
 0x7d3   : > { %v3807_v20 = vadd.f32 %v3806_v45, %v3805_v49  ;;  %v3915_v5 = vadd.f32 %v3914_v13, %v3913_v39  ;;  %v3676_v37 = vpop.f32.mrf.mxu1 }
 0x7d4   : > { %v3677_v51 = vadd.f32 %v6283_v34, %v3676_v37 }
 0x7d5   : > { %v3971_v60 = vpack.c.bf16 %v3807_v20, %v3807_v20  ;;  %v3916_v30 = vrot.slane %v3915_v5, 2 }
 0x7d6   : > { %v3726_v31 = vmul.f32 %v3677_v51, %v5523_v15 }
 0x7d7   : > { %v4102_v47 = vunpack.c.l.b16 %v3971_v60  ;;  %v3917_v22 = vadd.f32 %v3916_v30, %v3915_v5 }
 0x7d8   : > { %v3808_v23 = vsel %vm528_vm0, %v3726_v31, 0.0 }
 0x7d9   : > { %v4116_v1 = vsel %vm4026_vm4, %v4102_v47, %v4101_v44  ;;  %v3918_v14 = vrot.slane %v3917_v22, 1  ;;  %v3809_v16 = vrot.slane %v3808_v23, 4 }
 0x7db   : > { %v3919_v6 = vadd.f32 %v3918_v14, %v3917_v22  ;;  %v3810_v52 = vadd.f32 %v3809_v16, %v3808_v23  ;;  %v3678_v29 = vpop.f32.mrf.mxu1 }
 0x7dc   : > { %v3679_v2 = vadd.f32 %v6283_v34, %v3678_v29 }
 0x7dd   : > { %v3987_v46 = vpack.c.bf16 %v3919_v6, %v3919_v6  ;;  %v3811_v48 = vrot.slane %v3810_v52, 2 }
 0x7de   : > { %v3727_v15 = vmul.f32 %v3679_v2, %v6688_v17 }
 0x7df   : > { %v4019_v59 = vunpack.c.l.b16 %v3987_v46  ;;  %v3812_v27 = vadd.f32 %v3811_v48, %v3810_v52 }
 0x7e0   : > { %v3920_v36 = vsel %vm528_vm0, %v3727_v15, 0.0  ;;  %v6689_v15 = vld [vmem:[#allocation51_spill] sm:$0xff] }
 0x7e1   : > { %v4040_v7 = vsel %vm4026_vm4, %v4019_v59, %v4018_v41  ;;  %v3813_v58 = vrot.slane %v3812_v27, 1  ;;  %v3921_v33 = vrot.slane %v3920_v36, 4 }
 0x7e3   : > { %v3814_v62 = vadd.f32 %v3813_v58, %v3812_v27  ;;  %v3922_v0 = vadd.f32 %v3921_v33, %v3920_v36  ;;  %v3681_v63 = vpop.f32.mrf.mxu1  ;;  %v6690_v27 = vld [vmem:[#allocation54_spill] sm:$0xff]  ;;  %v6691_v58 = vld [vmem:[#allocation13_spill] sm:$0xff] }
 0x7e4   : > { %v3682_v24 = vadd.f32 %v6283_v34, %v3681_v63  ;;  %v4690_v63 = vld [vmem:[%s6521_s3 + $0x78] sm:$0xff] }
 0x7e5   : > { %v3972_v21 = vpack.c.bf16 %v3814_v62, %v3814_v62  ;;  %v3923_v35 = vrot.slane %v3922_v0, 2  ;;  %4069 = vmatpush.bf16.msrb.mxu2 %v4690_v63 }
 0x7e6   : > { %v3728_v12 = vmul.f32 %v3682_v24, %v5547_v57 }
 0x7e7   : > { %v4103_v56 = vunpack.c.l.b16 %v3972_v21  ;;  %v3924_v8 = vadd.f32 %v3923_v35, %v3922_v0 }
 0x7e8   : > { %v3815_v28 = vsel %vm528_vm0, %v3728_v12, 0.0 }
 0x7e9   : > { %v4117_v26 = vsel %vm4028_vm5, %v4103_v56, %v4116_v1  ;;  %v3925_v19 = vrot.slane %v3924_v8, 1  ;;  %v3816_v61 = vrot.slane %v3815_v28, 4 }
 0x7eb   : > { %v3926_v43 = vadd.f32 %v3925_v19, %v3924_v8  ;;  %v3817_v55 = vadd.f32 %v3816_v61, %v3815_v28  ;;  %v3683_v3 = vpop.f32.mrf.mxu1 }
 0x7ec   : > { %v3684_v52 = vadd.f32 %v6283_v34, %v3683_v3 }
 0x7ed   : > { %v3988_v38 = vpack.c.bf16 %v3926_v43, %v3926_v43  ;;  %v3818_v50 = vrot.slane %v3817_v55, 2 }
 0x7ee   : > { %v3729_v41 = vmul.f32 %v3684_v52, %v6689_v15  ;;  %v6693_v15 = vld [vmem:[#allocation26_spill] sm:$0xff] }
 0x7ef   : > { %v4020_v18 = vunpack.c.l.b16 %v3988_v38  ;;  %v3819_v49 = vadd.f32 %v3818_v50, %v3817_v55  ;;  %v4689_v38 = vld [vmem:[%s6521_s3 + $0x70] sm:$0xff] }
 0x7f0   : > { %v3927_v0 = vsel %vm528_vm0, %v3729_v41, 0.0  ;;  %4070 = vmatpush.bf16.msrb.mxu2 %v4689_v38 }
 0x7f1   : > { %v6404_v39 = vsel %vm4028_vm5, %v4020_v18, %v4040_v7  ;;  %v3820_v45 = vrot.slane %v3819_v49, 1  ;;  %v3928_v8 = vrot.slane %v3927_v0, 4 }
 0x7f3   : > { %v3821_v57 = vadd.f32 %v3820_v45, %v3819_v49  ;;  %v3686_v13 = vpop.f32.mrf.mxu1  ;;  %v3929_v50 = vadd.f32 %v3928_v8, %v3927_v0 }
 0x7f4   : > { %v3687_v32 = vadd.f32 %v6283_v34, %v3686_v13 }
 0x7f5   : > { %v3973_v9 = vpack.c.bf16 %v3821_v57, %v3821_v57 }
 0x7f6   : > { %v3730_v20 = vmul.f32 %v3687_v32, %v6640_v25 }
 0x7f7   : > { %v4104_v5 = vunpack.c.l.b16 %v3973_v9 }
 0x7f8   : > { %v3822_v37 = vsel %vm528_vm0, %v3730_v20, 0.0 }
 0x7f9   : > { %v4118_v51 = vsel %vm4030_vm6, %v4104_v5, %v4117_v26  ;;  %v3823_v60 = vrot.slane %v3822_v37, 4  ;;  %v6692_v26 = vld [vmem:[#allocation21_spill] sm:$0xff]  ;;  %v4688_v5 = vld [vmem:[%s6521_s3 + $0x68] sm:$0xff] }
 0x7fa   : > { %4145 = vmatpush.bf16.msra.mxu2 %v4688_v5 }
 0x7fb   : > { %v3824_v30 = vadd.f32 %v3823_v60, %v3822_v37  ;;  %v3688_v14 = vpop.f32.mrf.mxu1  ;;  %v3930_v37 = vrot.slane %v3929_v50, 2 }
 0x7fc   : > { %v3689_v29 = vadd.f32 %v6283_v34, %v3688_v14 }
 0x7fd   : > { %v3825_v31 = vrot.slane %v3824_v30, 2 }
 0x7fe   : > { %v3731_v36 = vmul.f32 %v3689_v29, %v6690_v27 }
 0x7ff   : > { %v3826_v44 = vadd.f32 %v3825_v31, %v3824_v30  ;;  %v4687_v30 = vld [vmem:[%s6521_s3 + $0x60] sm:$0xff] }
 0x800   : > { %v3934_v24 = vsel %vm528_vm0, %v3731_v36, 0.0  ;;  %4146 = vmatpush.bf16.msra.mxu2 %v4687_v30 }
 0x801   : > { %v3827_v54 = vrot.slane %v3826_v44, 1  ;;  %v3935_v28 = vrot.slane %v3934_v24, 4 }
 0x803   : > { %v3828_v47 = vadd.f32 %v3827_v54, %v3826_v44  ;;  %v3691_v16 = vpop.f32.mrf.mxu1  ;;  %v3936_v49 = vadd.f32 %v3935_v28, %v3934_v24 }
 0x804   : > { %v3692_v25 = vadd.f32 %v6283_v34, %v3691_v16 }
 0x805   : > { %v3974_v22 = vpack.c.bf16 %v3828_v47, %v3828_v47 }
 0x806   : > { %v3732_v6 = vmul.f32 %v3692_v25, %v6643_v40 }
 0x807   : > { %v4105_v23 = vunpack.c.l.b16 %v3974_v22 }
 0x808   : > { %v3829_v46 = vsel %vm528_vm0, %v3732_v6, 0.0 }
 0x809   : > { %v6411_v1 = vsel %vm4032_vm7, %v4105_v23, %v4118_v51  ;;  %v3830_v7 = vrot.slane %v3829_v46, 4  ;;  %v3937_v51 = vrot.slane %v3936_v49, 2  ;;  %v3931_v23 = vadd.f32 %v3930_v37, %v3929_v50 }
 0x80b   : > { %v3693_v11 = vpop.f32.mrf.mxu1  ;;  %v3831_v21 = vadd.f32 %v3830_v7, %v3829_v46  ;;  %v3938_v16 = vadd.f32 %v3937_v51, %v3936_v49  ;;  %v3932_v46 = vrot.slane %v3931_v23, 1 }
 0x80c   : > { %v3694_v48 = vadd.f32 %v6283_v34, %v3693_v11 }
 0x80d   : > { %v3832_v61 = vrot.slane %v3831_v21, 2 }
 0x80e   : > { %v3733_v40 = vmul.f32 %v3694_v48, %v6691_v58 }
 0x80f   : > { %v3833_v45 = vadd.f32 %v3832_v61, %v3831_v21 }
 0x811   : > { %v3834_v31 = vrot.slane %v3833_v45, 1 }
 0x813   : > { %v3835_v11 = vadd.f32 %v3834_v31, %v3833_v45 }
 0x837   : > { %v3696_v2 = vpop.f32.mrf.mxu1 }
 0x838   : > { %v3697_v17 = vadd.f32 %v6283_v34, %v3696_v2 }
 0x83a   : > { %v3734_v59 = vmul.f32 %v3697_v17, %v6646_v10  ;;  %v3941_v10 = vsel %vm528_vm0, %v3733_v40, 0.0  ;;  %v3939_v17 = vrot.slane %v3938_v16, 1 }
 0x83b   : > { %v3942_v43 = vrot.slane %v3941_v10, 4 }
 0x83c   : > { %v3836_v33 = vsel %vm528_vm0, %v3734_v59, 0.0  ;;  %v3975_v59 = vpack.c.bf16 %v3835_v11, %v3835_v11  ;;  %v3940_v63 = vadd.f32 %v3939_v17, %v3938_v16 }
 0x83d   : > { %v3837_v62 = vrot.slane %v3836_v33, 4  ;;  %v3943_v57 = vadd.f32 %v3942_v43, %v3941_v10 }
 0x83e   : > { %v4106_v24 = vunpack.c.l.b16 %v3975_v59  ;;  %v4807_v59 = vld [vmem:[%s6524_s6] ss:$0 sm:$0xff] }
 0x83f   : > { %v3698_v35 = vpop.f32.mrf.mxu1  ;;  %v3838_v12 = vadd.f32 %v3837_v62, %v3836_v33  ;;  %v3944_v44 = vrot.slane %v3943_v57, 2  ;;  %v3933_v33 = vadd.f32 %v3932_v46, %v3931_v23  ;;  %v4806_v46 = vld [vmem:[%s6522_s4 + $0x6] ss:$0 sm:$0xff] }
 0x840   : > { %v3699_v56 = vadd.f32 %v6283_v34, %v3698_v35 }
 0x841   : > { %v3839_v55 = vrot.slane %v3838_v12, 2  ;;  %v3945_v25 = vadd.f32 %v3944_v44, %v3943_v57 }
 0x842   : > { %v3735_v19 = vmul.f32 %v3699_v56, %v6692_v26  ;;  %v3989_v56 = vpack.c.bf16 %v3933_v33, %v3933_v33  ;;  %v3990_v26 = vpack.c.bf16 %v3940_v63, %v3940_v63 }
 0x843   : > { %v3840_v32 = vadd.f32 %v3839_v55, %v3838_v12  ;;  %v3946_v27 = vrot.slane %v3945_v25, 1 }
 0x844   : > { %v3948_v3 = vsel %vm528_vm0, %v3735_v19, 0.0  ;;  %v4120_v19 = vsel %vm4034_vm8, %v4106_v24, %v6411_v1  ;;  %v4021_v50 = vunpack.c.l.b16 %v3989_v56  ;;  %v4022_v45 = vunpack.c.l.b16 %v3990_v26 }
 0x845   : > { %v3949_v18 = vrot.slane %v3948_v3, 4  ;;  %v3841_v54 = vrot.slane %v3840_v32, 1  ;;  %v3947_v21 = vadd.f32 %v3946_v27, %v3945_v25 }
 0x847   : > { %v3701_v13 = vpop.f32.mrf.mxu1  ;;  %v3950_v9 = vadd.f32 %v3949_v18, %v3948_v3  ;;  %v3991_v61 = vpack.c.bf16 %v3947_v21, %v3947_v21 }
 0x848   : > { %v3702_v20 = vadd.f32 %v6283_v34, %v3701_v13 }
 0x849   : > { %v3951_v47 = vrot.slane %v3950_v9, 2  ;;  %v4023_v13 = vunpack.c.l.b16 %v3991_v61 }
 0x84a   : > { %v3736_v60 = vmul.f32 %v3702_v20, %v6649_v53  ;;  %v3842_v53 = vadd.f32 %v3841_v54, %v3840_v32  ;;  %v4042_v20 = vsel %vm4030_vm6, %v4021_v50, %v6404_v39  ;;  %v4691_v39 = vld [vmem:[%s6521_s3 + $0x80] sm:$0xff] }
 0x84b   : > { %v3952_v29 = vadd.f32 %v3951_v47, %v3950_v9  ;;  %v4043_v5 = vsel %vm4032_vm7, %v4022_v45, %v4042_v20 }
 0x84c   : > { %v3843_v22 = vsel %vm528_vm0, %v3736_v60, 0.0  ;;  %v3976_v7 = vpack.c.bf16 %v3842_v53, %v3842_v53  ;;  %v4044_v37 = vsel %vm4034_vm8, %v4023_v13, %v4043_v5  ;;  %v4710_v53 = vld [vmem:[%s6523_s5 + $0x8] sm:$0xff] }
 0x84d   : > { %v3844_v14 = vrot.slane %v3843_v22, 4  ;;  %v3953_v58 = vrot.slane %v3952_v29, 1 }
 0x84e   : > { %v4107_v10 = vunpack.c.l.b16 %v3976_v7 }
 0x84f   : > { %v3845_v6 = vadd.f32 %v3844_v14, %v3843_v22  ;;  %v3703_v52 = vpop.f32.mrf.mxu1  ;;  %v3954_v12 = vadd.f32 %v3953_v58, %v3952_v29  ;;  %v4709_v29 = vld [vmem:[%s6523_s5] sm:$0xff] }
 0x850   : > { %v3704_v2 = vadd.f32 %v6283_v34, %v3703_v52  ;;  %v4121_v3 = vsel %vm4036_vm9, %v4107_v10, %v4120_v19 }
 0x851   : > { %v3846_v48 = vrot.slane %v3845_v6, 2  ;;  %v3992_v38 = vpack.c.bf16 %v3954_v12, %v3954_v12 }
 0x852   : > { %v3737_v41 = vmul.f32 %v3704_v2, %v6693_v15 }
 0x853   : > { %v3847_v36 = vadd.f32 %v3846_v48, %v3845_v6  ;;  %v4024_v9 = vunpack.c.l.b16 %v3992_v38 }
 0x854   : > { %v3955_v40 = vsel %vm528_vm0, %v3737_v41, 0.0 }
 0x855   : > { %v3848_v62 = vrot.slane %v3847_v36, 1  ;;  %v3956_v0 = vrot.slane %v3955_v40, 4  ;;  %v4045_v60 = vsel %vm4036_vm9, %v4024_v9, %v4044_v37 }
 0x857   : > { %v3849_v35 = vadd.f32 %v3848_v62, %v3847_v36  ;;  %v3957_v34 = vadd.f32 %v3956_v0, %v3955_v40 }
 0x859   : > { %v3977_v8 = vpack.c.bf16 %v3849_v35, %v3849_v35  ;;  %v3958_v28 = vrot.slane %v3957_v34, 2 }
 0x85b   : > { %v4108_v43 = vunpack.c.l.b16 %v3977_v8  ;;  %v3959_v55 = vadd.f32 %v3958_v28, %v3957_v34 }
 0x85d   : > { %v4122_v18 = vsel %vm4038_vm10, %v4108_v43, %v4121_v3  ;;  %v3960_v49 = vrot.slane %v3959_v55, 1 }
 0x85e   : > { %v4123_v57 = vpack.c.b16 %v4122_v18, %v6373_v4  ;;  %v4692_v4 = vld [vmem:[%s6521_s3 + $0x88] sm:$0xff] }
 0x85f   : > { %v3961_v32 = vadd.f32 %v3960_v49, %v3959_v55 }
 0x861   : > { %v3993_v1 = vpack.c.bf16 %v3961_v32, %v3961_v32 }
 0x863   : > { %v4025_v51 = vunpack.c.l.b16 %v3993_v1 }
 0x865   : > { %v4046_v30 = vsel %vm4038_vm10, %v4025_v51, %v4045_v60 }
 0x866   : > { %v4047_v31 = vpack.c.b16 %v4046_v30, %v6380_v42  ;;  %v4805_v42 = vld [vmem:[%s6522_s4 + $0x5] ss:$0 sm:$0xff] }
 0x868   : > { %4640 = vmatmul.msk.bf16.vlgmr.msrb.gmra.mxu2 %vm528_vm0, %v4047_v31 }
 0x869   : > { %4181 = vmatpush.bf16.msrb.mxu2 %v4692_v4 }
 0x86d   : > { %4182 = vmatpush.bf16.msrb.mxu2 %v4691_v39 }
 0x878   : > { %4649 = vmatmul.msk.bf16.vlgmr.msra.gmra.mxu2 %vm528_vm0, %v4123_v57 }
 0x879   : > { %4219 = vmatpush.bf16.msra.mxu2 %v4710_v53 }
 0x87d   : > { %4220 = vmatpush.bf16.msra.mxu2 %v4709_v29 }
 0x8eb   : > { %v4072_v44 = vpop.f32.mrf.mxu2 }
 0x8f3   : > { %v4074_v54 = vpop.f32.mrf.mxu2 }
 0x8fb   : > { %v4148_v47 = vpop.f32.mrf.mxu2 }
 0x8fc   : > { %v4149_v22 = vadd.f32 %v4148_v47, %v4072_v44 }
 0x8fe   : > { %v4154_v14 = vadd.f32 %v4805_v42, %v4149_v22 }
 0x900   : > { %v4156_v25 = vmax.f32 %v4154_v14, 0.0 }
 0x903   : > { %v4150_v23 = vpop.f32.mrf.mxu2 }
 0x904   : > { %v4151_v16 = vadd.f32 %v4150_v23, %v4074_v54 }
 0x906   : > { %v4155_v11 = vadd.f32 %v4805_v42, %v4151_v16 }
 0x908   : > { %v4157_v6 = vmax.f32 %v4155_v11, 0.0 }
 0x90a   : > { %v4158_v52 = vpack.c.bf16 %v4157_v6, %v4156_v25 }
 0x90c   : > { %4658 = vmatmul.msk.bf16.vlgmr.msrb.gmra.mxu2 %vm528_vm0, %v4158_v52 }
 0x98f   : > { %v4184_v2 = vpop.f32.mrf.mxu2 }
 0x990   : > { %v4185_v17 = vadd.f32 %v4806_v46, %v4184_v2 }
 0x997   : > { %v4186_v48 = vpop.f32.mrf.mxu2 }
 0x998   : > { %v4187_v15 = vadd.f32 %v4806_v46, %v4186_v48 }
 0x99a   : > { %v4193_v41 = vpack.c.bf16 %v4187_v15, %v4185_v17 }
 0x99c   : > { %4667 = vmatmul.msk.bf16.vlgmr.msra.gmra.mxu2 %vm528_vm0, %v4193_v41 }
 0xa1f   : > { %v4222_v27 = vpop.f32.mrf.mxu2 }
 0xa20   : > { %v4223_v36 = vadd.f32 %v4807_v59, %v4222_v27 }
 0xa22   : > { %4227 = vmax.xlane.f32.xlu1 %v4223_v36 }
 0xa27   : > { %v4224_v7 = vpop.f32.mrf.mxu2 }
 0xa28   : > { %v4225_v58 = vadd.f32 %v4807_v59, %v4224_v7 }
 0xa2a   : > { %4229 = vmax.xlane.f32.xlu1 %v4225_v58 }
 0xa95   : > { %v4228_v40 = vpop.xlane.xlu1 %4227 }
 0xa96   : > { %v4231_v33 = vsub.f32 %v4223_v36, %v4228_v40 }
 0xa98   : > { %v4233_v62 = vmul.f32 1.442695, %v4231_v33 }
 0xa9a   : > { %4936 = vpow2.f32 %v4233_v62 }
 0xa9d   : > { %v4230_v0 = vpop.xlane.xlu1 %4229 }
 0xa9e   : > { %v4232_v63 = vsub.f32 %v4225_v58, %v4230_v0 }
 0xaa0   : > { %v4937_v24 = vpop.eup %4936  ;;  %v4235_v21 = vmul.f32 1.442695, %v4232_v63 }
 0xaa1   : > { %4237 = vadd.xlane.f32.xlu1 %v4937_v24 }
 0xaa2   : > { %4938 = vpow2.f32 %v4235_v21 }
 0xaa8   : > { %v4939_v35 = vpop.eup %4938 }
 0xaa9   : > { %4239 = vadd.xlane.f32.xlu2 %v4939_v35 }
 0xb14   : > { %v4238_v34 = vpop.xlane.xlu1 %4237 }
 0xb15   : > { %4940 = vlog2.f32 %v4238_v34 }
 0xb1b   : > { %v4941_v10 = vpop.eup %4940 }
 0xb1c   : > { %v4242_v12 = vmul.f32 0.6931472, %v4941_v10  ;;  %v4240_v56 = vpop.xlane.xlu2 %4239 }
 0xb1d   : > { %4942 = vlog2.f32 %v4240_v56 }
 0xb1e   : > { %v4245_v8 = vsub.f32 %v4231_v33, %v4242_v12 }
 0xb20   : > { %4247 = vst [vmem:[%s306_s16] sm:$0xff] %v4245_v8 }
 0xb23   : > { %v4943_v28 = vpop.eup %4942 }
 0xb24   : > { %v4244_v26 = vmul.f32 0.6931472, %v4943_v28 }
 0xb26   : > { %v4246_v19 = vsub.f32 %v4232_v63, %v4244_v26 }
 0xb28   : > { %4248 = vst [vmem:[%s306_s16 + $0x8] sm:$0xff] %v4246_v19 }
 0xb29   : > { %4981 = shalt.err (!%p4978_p3)
}
 0xb2a   : > { %s5019_s8 = smov 128   ;;  %s5020_s16 = smov 8  }
 0xb2b   : > { %4718 = dma.vmem_to_hbm [thread:$0]  (%p5096_p5), %s4263_s18, 256, %s4265_s19, %s4250_s20, %s5019_s8, %s5019_s8, %s5020_s16  }
 0xb2c PF: > { %p4724_p4 = scmp.ge.s32.totalorder %s5016_s27, 2  ;;  %s4279_s17 = sand.u32 1, %s5004_s24  }
 0xb2d   : > { %s4280_s23 = scalar_lea.sflag [#allocation3], %s4279_s17 }
 0xb2e   : > { %p4721_p7 = pnand %p4724_p4, %p5100_p6 }
 0xb30   : > { %p4722_p8 = pneg %p4721_p7 }
 0xb32   : > { %4999 = dma.done.wait (%p4722_p8), %s4280_s23, 256  }
 0xb33   : > { %5001 = vsyncadd (%p4722_p8), %s4280_s23, 4294967040  ;;  %p17_p9 = scmp.ge.s32.totalorder %s5084_s30, 4   ;;  %s6694_s24 = smov %s5008_s25 }
 0xb34   : > { %s6695_s25 = smov %s5012_s26  ;;  %s6696_s26 = smov %s5094_s10 }
 0xb35   : > { %s6697_s27 = smov %s5084_s30  ;;  %19 = sbr.rel (!%p17_p9) target bundleno = 3 (0x3), region = 89 }
 0xb3a   :  { %4286 = vsyncpa [#allocation3], 1 }
 0xb3b   :  { %4288 = vsyncpa [#allocation3 + $0x1], 1 }

</bundles_post_ra>
